<compile_context>
chip_gen: v7x
topology: tpu7x:2x2x1
jax: 0.10.0
libtpu: 0.0.40
codegen_flags: <defaults>
</compile_context>

<pallas_src>
import functools

import jax
import jax.numpy as jnp
from jax.experimental import pallas as pl
from jax.experimental.pallas import tpu as pltpu


# ----------------------------- Pallas kernel -----------------------------

def _layer_kernel(p_ref, w_ref, b_ref, g_ref, be_ref, o_ref, *, use_norm, act):
    # p_ref : (1, K, HW)  bf16 patches, K = C_in*kh*kw (sublanes), HW on lanes
    # w_ref : (C_out, K)  bf16
    # b/g/be: (C_out, 1)  f32
    # o_ref : (1, C_out, HW) f32
    p = p_ref[0]                                          # (K, HW)      bf16
    w = w_ref[...]                                        # (C_out, K)   bf16
    # MXU matmul with f32 accumulation; HW is the wide (lane / MXU-N) dim.
    y = jnp.dot(w, p, preferred_element_type=jnp.float32)  # (C_out, HW) f32
    y = y + b_ref[...]
    if use_norm:
        # InstanceNorm2d: per-sample, per-channel stats over spatial (HW = lane)
        # axis, biased variance, eps=1e-5, affine.  All in f32.
        mu = jnp.mean(y, axis=1, keepdims=True)
        var = jnp.mean(jnp.square(y - mu), axis=1, keepdims=True)
        y = (y - mu) * jax.lax.rsqrt(var + 1e-5)
        y = y * g_ref[...] + be_ref[...]
    if act == "lrelu":
        y = jnp.maximum(y, 0.2 * y)                       # LeakyReLU(0.2)
    elif act == "sigmoid":
        y = pl.reciprocal(1.0 + jnp.exp(-y), approx=True)  # sigmoid via EUP
    o_ref[0] = y.astype(o_ref.dtype)


def conv_layer_pallas(patches, w_mat, bias, gamma, beta, *, use_norm, act):
    """patches: (N, K, HW) bf16; w_mat: (C_out, K) bf16; bias/gamma/beta: (C_out,1) f32."""
    N, K, HW = patches.shape
    C = w_mat.shape[0]
    kernel = functools.partial(_layer_kernel, use_norm=use_norm, act=act)
    return pl.pallas_call(
        kernel,
        out_shape=jax.ShapeDtypeStruct((N, C, HW), jnp.float32),
        grid_spec=pltpu.PrefetchScalarGridSpec(
            num_scalar_prefetch=0,
            grid=(N,),
            in_specs=[
                pl.BlockSpec((1, K, HW), lambda n: (n, 0, 0)),   # patches (per-sample)
                pl.BlockSpec((C, K), lambda n: (0, 0)),          # weight matrix
                pl.BlockSpec((C, 1), lambda n: (0, 0)),          # bias
                pl.BlockSpec((C, 1), lambda n: (0, 0)),          # gamma
                pl.BlockSpec((C, 1), lambda n: (0, 0)),          # beta
            ],
            out_specs=pl.BlockSpec((1, C, HW), lambda n: (n, 0, 0)),
        ),
        compiler_params=pltpu.CompilerParams(
            dimension_semantics=("parallel",)),
    )(patches, w_mat, bias, gamma, beta)


# ------------------------------- JAX glue --------------------------------

def im2col_cmajor(x, k, stride, pad):
    """x: (N, C, H, W) NCHW -> (N, C*k*k, Ho*Wo); K ordered (C, kh, kw).

    No transposes: only pad, strided slices, stack along a new axis adjacent
    to C, and contiguous reshapes.
    """
    N, C, H, W = x.shape
    xp = jnp.pad(x, ((0, 0), (0, 0), (pad, pad), (pad, pad)))
    Ho = (H + 2 * pad - k) // stride + 1
    Wo = (W + 2 * pad - k) // stride + 1
    cols = []
    for i in range(k):
        for j in range(k):
            cols.append(xp[:, :, i:i + stride * Ho:stride, j:j + stride * Wo:stride])
    p = jnp.stack(cols, axis=2)                       # (N, C, k*k, Ho, Wo)
    return p.reshape(N, C * k * k, Ho * Wo), Ho, Wo


def init_params(key, img_channels, features):
    """Deterministic synthetic parameters matching Critic.__init__ shapes."""
    layer_defs = [
        # (c_in, c_out, k, stride, pad, use_norm, act)
        (img_channels,  features,      4, 2, 1, False, "lrelu"),
        (features,      features * 2,  4, 2, 1, True,  "lrelu"),
        (features * 2,  features * 4,  4, 2, 1, True,  "lrelu"),
        (features * 4,  features * 8,  4, 2, 1, True,  "lrelu"),
        (features * 8,  features * 16, 4, 2, 1, True,  "lrelu"),
        (features * 16, 1,             4, 1, 0, False, "sigmoid"),
    ]
    layers = []
    for (c_in, c_out, k, stride, pad, use_norm, act) in layer_defs:
        key, kw_, kb_ = jax.random.split(key, 3)
        w = 0.05 * jax.random.normal(kw_, (c_out, c_in, k, k), jnp.float32)
        b = 0.02 * jax.random.normal(kb_, (c_out,), jnp.float32)
        gamma = jnp.ones((c_out,), jnp.float32)
        beta = jnp.zeros((c_out,), jnp.float32)
        layers.append(dict(
            # f32 originals (reference path)
            w=w, b=b, gamma=gamma, beta=beta,
            # Pallas path: (C_out, K) bf16 weight matrix + column vectors
            w2d=w.reshape(c_out, -1).astype(jnp.bfloat16),
            b2d=b.reshape(c_out, 1),
            g2d=gamma.reshape(c_out, 1),
            be2d=beta.reshape(c_out, 1),
            k=k, stride=stride, pad=pad, use_norm=use_norm, act=act,
        ))
    return layers


def critic_forward(x, layers):
    """Pallas-backed forward.  x: (N, C, H, W) NCHW."""
    N = x.shape[0]
    for L in layers:
        patches, Ho, Wo = im2col_cmajor(x, L["k"], L["k_"] if False else L["stride"], L["pad"]) \
            if False else im2col_cmajor(x, L["k"], L["stride"], L["pad"])
        c_out = L["w2d"].shape[0]
        out = conv_layer_pallas(
            patches.astype(jnp.bfloat16),            # bf16 matmul operands
            L["w2d"], L["b2d"], L["g2d"], L["be2d"],
            use_norm=L["use_norm"], act=L["act"])
        # (N, C_out, Ho*Wo) is NCHW-flattened: reshape only, no transpose.
        x = out.reshape(N, c_out, Ho, Wo)
    return x                                          # (N, 1, 1, 1)


def critic_ref(x, layers):
    """Pure-JAX reference (for sanity check)."""
    for L in layers:
        y = jax.lax.conv_general_dilated(
            x, L["w"], (L["stride"], L["stride"]),
            [(L["pad"], L["pad"]), (L["pad"], L["pad"])],
            dimension_numbers=("NCHW", "OIHW", "NCHW"))
        y = y + L["b"].reshape(1, -1, 1, 1)
        if L["use_norm"]:
            mu = jnp.mean(y, axis=(2, 3), keepdims=True)
            var = jnp.mean((y - mu) ** 2, axis=(2, 3), keepdims=True)
            y = (y - mu) / jnp.sqrt(var + 1e-5)
            y = y * L["gamma"].reshape(1, -1, 1, 1) + L["beta"].reshape(1, -1, 1, 1)
        if L["act"] == "lrelu":
            y = jnp.where(y > 0, y, 0.2 * y)
        elif L["act"] == "sigmoid":
            y = jax.nn.sigmoid(y)
        x = y
    return x


if __name__ == "__main__":
    # 128x128 input is implied by the architecture (5 stride-2 convs -> 4x4,
    # then the final 4x4 valid conv -> 1x1).  Small channel counts.
    img_channels, features, batch, spatial = 3, 4, 2, 128

    key = jax.random.PRNGKey(0)
    kx, kp = jax.random.split(key)
    x = jax.random.normal(kx, (batch, img_channels, spatial, spatial), jnp.float32)
    layers = init_params(kp, img_channels, features)

    fwd = jax.jit(lambda xx: critic_forward(xx, layers))
    y = jax.block_until_ready(fwd(x))

    assert y.shape == (batch, 1, 1, 1), y.shape
    assert bool(jnp.all(jnp.isfinite(y)))

    y_ref = critic_ref(x, layers)
    assert bool(jnp.allclose(y, y_ref, atol=5e-2, rtol=5e-2)), (y, y_ref)

    print("KERNEL_OK")
</pallas_src>

<mosaic_0001>
module attributes {stable_mosaic.version = 11 : i64} {
  func.func @_layer_kernel(%arg0: i32, %arg1: memref<1x48x4096xbf16, #tpu.memory_space<vmem>>, %arg2: memref<4x48xbf16, #tpu.memory_space<vmem>>, %arg3: memref<4x1xf32, #tpu.memory_space<vmem>>, %arg4: memref<4x1xf32, #tpu.memory_space<vmem>>, %arg5: memref<4x1xf32, #tpu.memory_space<vmem>>, %arg6: memref<1x4x4096xf32, #tpu.memory_space<vmem>>) attributes {dimension_semantics = [#tpu.dimension_semantics<parallel>], iteration_bounds = array<i64: 2>, scalar_prefetch = 0 : i64, scratch_operands = 0 : i64, tpu.core_type = #tpu.core_type<tc>, window_params = [{transform_indices = @transform_0, window_bounds = array<i64: 1, 48, 4096>}, {pipeline_mode = #tpu.pipeline_mode<synchronous>, transform_indices = @transform_1, window_bounds = array<i64: 4, 48>}, {pipeline_mode = #tpu.pipeline_mode<synchronous>, transform_indices = @transform_2, window_bounds = array<i64: 4, 1>}, {pipeline_mode = #tpu.pipeline_mode<synchronous>, transform_indices = @transform_3, window_bounds = array<i64: 4, 1>}, {pipeline_mode = #tpu.pipeline_mode<synchronous>, transform_indices = @transform_4, window_bounds = array<i64: 4, 1>}, {transform_indices = @transform_5, window_bounds = array<i64: 1, 4, 4096>}]} {
    %c0 = arith.constant 0 : index
    %c0_0 = arith.constant 0 : index
    %c0_1 = arith.constant 0 : index
    %0 = vector.load %arg1[%c0, %c0_0, %c0_1] : memref<1x48x4096xbf16, #tpu.memory_space<vmem>>, vector<1x48x4096xbf16>
    %1 = vector.shape_cast %0 : vector<1x48x4096xbf16> to vector<48x4096xbf16>
    %c0_2 = arith.constant 0 : index
    %c0_3 = arith.constant 0 : index
    %2 = vector.load %arg2[%c0_2, %c0_3] : memref<4x48xbf16, #tpu.memory_space<vmem>>, vector<4x48xbf16>
    %cst = arith.constant dense<0.000000e+00> : vector<4x4096xf32>
    %3 = tpu.matmul %2, %1, %cst {dimension_numbers = #tpu.dot_dimension_numbers<[1], [0], [0], [1], [0, 0, 1, 1], [], []>} : vector<4x48xbf16>, vector<48x4096xbf16>, vector<4x4096xf32> -> vector<4x4096xf32>
    %c0_4 = arith.constant 0 : index
    %c0_5 = arith.constant 0 : index
    %4 = vector.load %arg3[%c0_4, %c0_5] : memref<4x1xf32, #tpu.memory_space<vmem>>, vector<4x1xf32>
    %5 = vector.broadcast %4 : vector<4x1xf32> to vector<4x4096xf32>
    %6 = arith.addf %3, %5 : vector<4x4096xf32>
    %cst_6 = arith.constant 2.000000e-01 : f32
    %7 = vector.broadcast %cst_6 : f32 to vector<4x4096xf32>
    %8 = arith.mulf %7, %6 : vector<4x4096xf32>
    %9 = arith.maximumf %6, %8 : vector<4x4096xf32>
    %c0_7 = arith.constant 0 : index
    %c0_8 = arith.constant 0 : index
    %c0_9 = arith.constant 0 : index
    %10 = vector.load %arg6[%c0_7, %c0_8, %c0_9] : memref<1x4x4096xf32, #tpu.memory_space<vmem>>, vector<1x4x4096xf32>
    %11 = vector.shape_cast %10 : vector<1x4x4096xf32> to vector<4x4096xf32>
    %12 = vector.shape_cast %9 : vector<4x4096xf32> to vector<1x4x4096xf32>
    tpu.vector_store %arg6[%c0_7, %c0_8, %c0_9], %12 {strides = array<i32>} : memref<1x4x4096xf32, #tpu.memory_space<vmem>>, vector<1x4x4096xf32>,
    return
  }
  func.func @transform_0(%arg0: i32) -> (i32, i32, i32) {
    %c0_i32 = arith.constant 0 : i32
    %c0_i32_0 = arith.constant 0 : i32
    %c0_i32_1 = arith.constant 0 : i32
    return %arg0, %c0_i32, %c0_i32_0 : i32, i32, i32
  }
  func.func @transform_1(%arg0: i32) -> (i32, i32) {
    %c0_i32 = arith.constant 0 : i32
    %c0_i32_0 = arith.constant 0 : i32
    %c0_i32_1 = arith.constant 0 : i32
    return %c0_i32, %c0_i32_0 : i32, i32
  }
  func.func @transform_2(%arg0: i32) -> (i32, i32) {
    %c0_i32 = arith.constant 0 : i32
    %c0_i32_0 = arith.constant 0 : i32
    %c0_i32_1 = arith.constant 0 : i32
    return %c0_i32, %c0_i32_0 : i32, i32
  }
  func.func @transform_3(%arg0: i32) -> (i32, i32) {
    %c0_i32 = arith.constant 0 : i32
    %c0_i32_0 = arith.constant 0 : i32
    %c0_i32_1 = arith.constant 0 : i32
    return %c0_i32, %c0_i32_0 : i32, i32
  }
  func.func @transform_4(%arg0: i32) -> (i32, i32) {
    %c0_i32 = arith.constant 0 : i32
    %c0_i32_0 = arith.constant 0 : i32
    %c0_i32_1 = arith.constant 0 : i32
    return %c0_i32, %c0_i32_0 : i32, i32
  }
  func.func @transform_5(%arg0: i32) -> (i32, i32, i32) {
    %c0_i32 = arith.constant 0 : i32
    %c0_i32_0 = arith.constant 0 : i32
    %c0_i32_1 = arith.constant 0 : i32
    return %arg0, %c0_i32, %c0_i32_0 : i32, i32, i32
  }
}

module attributes {stable_mosaic.version = 11 : i64} {
  func.func @_layer_kernel(%arg0: i32, %arg1: memref<1x64x1024xbf16, #tpu.memory_space<vmem>>, %arg2: memref<8x64xbf16, #tpu.memory_space<vmem>>, %arg3: memref<8x1xf32, #tpu.memory_space<vmem>>, %arg4: memref<8x1xf32, #tpu.memory_space<vmem>>, %arg5: memref<8x1xf32, #tpu.memory_space<vmem>>, %arg6: memref<1x8x1024xf32, #tpu.memory_space<vmem>>) attributes {dimension_semantics = [#tpu.dimension_semantics<parallel>], iteration_bounds = array<i64: 2>, scalar_prefetch = 0 : i64, scratch_operands = 0 : i64, tpu.core_type = #tpu.core_type<tc>, window_params = [{transform_indices = @transform_0, window_bounds = array<i64: 1, 64, 1024>}, {pipeline_mode = #tpu.pipeline_mode<synchronous>, transform_indices = @transform_1, window_bounds = array<i64: 8, 64>}, {pipeline_mode = #tpu.pipeline_mode<synchronous>, transform_indices = @transform_2, window_bounds = array<i64: 8, 1>}, {pipeline_mode = #tpu.pipeline_mode<synchronous>, transform_indices = @transform_3, window_bounds = array<i64: 8, 1>}, {pipeline_mode = #tpu.pipeline_mode<synchronous>, transform_indices = @transform_4, window_bounds = array<i64: 8, 1>}, {transform_indices = @transform_5, window_bounds = array<i64: 1, 8, 1024>}]} {
    %c0 = arith.constant 0 : index
    %c0_0 = arith.constant 0 : index
    %c0_1 = arith.constant 0 : index
    %0 = vector.load %arg1[%c0, %c0_0, %c0_1] : memref<1x64x1024xbf16, #tpu.memory_space<vmem>>, vector<1x64x1024xbf16>
    %1 = vector.shape_cast %0 : vector<1x64x1024xbf16> to vector<64x1024xbf16>
    %c0_2 = arith.constant 0 : index
    %c0_3 = arith.constant 0 : index
    %2 = vector.load %arg2[%c0_2, %c0_3] : memref<8x64xbf16, #tpu.memory_space<vmem>>, vector<8x64xbf16>
    %cst = arith.constant dense<0.000000e+00> : vector<8x1024xf32>
    %3 = tpu.matmul %2, %1, %cst {dimension_numbers = #tpu.dot_dimension_numbers<[1], [0], [0], [1], [0, 0, 1, 1], [], []>} : vector<8x64xbf16>, vector<64x1024xbf16>, vector<8x1024xf32> -> vector<8x1024xf32>
    %c0_4 = arith.constant 0 : index
    %c0_5 = arith.constant 0 : index
    %4 = vector.load %arg3[%c0_4, %c0_5] : memref<8x1xf32, #tpu.memory_space<vmem>>, vector<8x1xf32>
    %5 = vector.broadcast %4 : vector<8x1xf32> to vector<8x1024xf32>
    %6 = arith.addf %3, %5 : vector<8x1024xf32>
    %cst_6 = arith.constant dense<0.000000e+00> : vector<8xf32>
    %7 = vector.multi_reduction <add>, %6, %cst_6 [1] : vector<8x1024xf32> to vector<8xf32>
    %8 = vector.shape_cast %7 : vector<8xf32> to vector<8x1xf32>
    %cst_7 = arith.constant 1.024000e+03 : f32
    %9 = vector.broadcast %cst_7 : f32 to vector<8x1xf32>
    %10 = arith.divf %8, %9 : vector<8x1xf32>
    %11 = vector.broadcast %10 : vector<8x1xf32> to vector<8x1024xf32>
    %12 = arith.subf %6, %11 : vector<8x1024xf32>
    %13 = arith.mulf %12, %12 : vector<8x1024xf32>
    %cst_8 = arith.constant dense<0.000000e+00> : vector<8xf32>
    %14 = vector.multi_reduction <add>, %13, %cst_8 [1] : vector<8x1024xf32> to vector<8xf32>
    %15 = vector.shape_cast %14 : vector<8xf32> to vector<8x1xf32>
    %cst_9 = arith.constant 1.024000e+03 : f32
    %16 = vector.broadcast %cst_9 : f32 to vector<8x1xf32>
    %17 = arith.divf %15, %16 : vector<8x1xf32>
    %18 = vector.broadcast %10 : vector<8x1xf32> to vector<8x1024xf32>
    %19 = arith.subf %6, %18 : vector<8x1024xf32>
    %cst_10 = arith.constant 9.99999974E-6 : f32
    %20 = vector.broadcast %cst_10 : f32 to vector<8x1xf32>
    %21 = arith.addf %17, %20 : vector<8x1xf32>
    %22 = math.rsqrt %21 : vector<8x1xf32>
    %23 = vector.broadcast %22 : vector<8x1xf32> to vector<8x1024xf32>
    %24 = arith.mulf %19, %23 : vector<8x1024xf32>
    %c0_11 = arith.constant 0 : index
    %c0_12 = arith.constant 0 : index
    %25 = vector.load %arg4[%c0_11, %c0_12] : memref<8x1xf32, #tpu.memory_space<vmem>>, vector<8x1xf32>
    %26 = vector.broadcast %25 : vector<8x1xf32> to vector<8x1024xf32>
    %27 = arith.mulf %24, %26 : vector<8x1024xf32>
    %c0_13 = arith.constant 0 : index
    %c0_14 = arith.constant 0 : index
    %28 = vector.load %arg5[%c0_13, %c0_14] : memref<8x1xf32, #tpu.memory_space<vmem>>, vector<8x1xf32>
    %29 = vector.broadcast %28 : vector<8x1xf32> to vector<8x1024xf32>
    %30 = arith.addf %27, %29 : vector<8x1024xf32>
    %cst_15 = arith.constant 2.000000e-01 : f32
    %31 = vector.broadcast %cst_15 : f32 to vector<8x1024xf32>
    %32 = arith.mulf %31, %30 : vector<8x1024xf32>
    %33 = arith.maximumf %30, %32 : vector<8x1024xf32>
    %c0_16 = arith.constant 0 : index
    %c0_17 = arith.constant 0 : index
    %c0_18 = arith.constant 0 : index
    %34 = vector.load %arg6[%c0_16, %c0_17, %c0_18] : memref<1x8x1024xf32, #tpu.memory_space<vmem>>, vector<1x8x1024xf32>
    %35 = vector.shape_cast %34 : vector<1x8x1024xf32> to vector<8x1024xf32>
    %36 = vector.shape_cast %33 : vector<8x1024xf32> to vector<1x8x1024xf32>
    tpu.vector_store %arg6[%c0_16, %c0_17, %c0_18], %36 {strides = array<i32>} : memref<1x8x1024xf32, #tpu.memory_space<vmem>>, vector<1x8x1024xf32>,
    return
  }
  func.func @transform_0(%arg0: i32) -> (i32, i32, i32) {
    %c0_i32 = arith.constant 0 : i32
    %c0_i32_0 = arith.constant 0 : i32
    %c0_i32_1 = arith.constant 0 : i32
    return %arg0, %c0_i32, %c0_i32_0 : i32, i32, i32
  }
  func.func @transform_1(%arg0: i32) -> (i32, i32) {
    %c0_i32 = arith.constant 0 : i32
    %c0_i32_0 = arith.constant 0 : i32
    %c0_i32_1 = arith.constant 0 : i32
    return %c0_i32, %c0_i32_0 : i32, i32
  }
  func.func @transform_2(%arg0: i32) -> (i32, i32) {
    %c0_i32 = arith.constant 0 : i32
    %c0_i32_0 = arith.constant 0 : i32
    %c0_i32_1 = arith.constant 0 : i32
    return %c0_i32, %c0_i32_0 : i32, i32
  }
  func.func @transform_3(%arg0: i32) -> (i32, i32) {
    %c0_i32 = arith.constant 0 : i32
    %c0_i32_0 = arith.constant 0 : i32
    %c0_i32_1 = arith.constant 0 : i32
    return %c0_i32, %c0_i32_0 : i32, i32
  }
  func.func @transform_4(%arg0: i32) -> (i32, i32) {
    %c0_i32 = arith.constant 0 : i32
    %c0_i32_0 = arith.constant 0 : i32
    %c0_i32_1 = arith.constant 0 : i32
    return %c0_i32, %c0_i32_0 : i32, i32
  }
  func.func @transform_5(%arg0: i32) -> (i32, i32, i32) {
    %c0_i32 = arith.constant 0 : i32
    %c0_i32_0 = arith.constant 0 : i32
    %c0_i32_1 = arith.constant 0 : i32
    return %arg0, %c0_i32, %c0_i32_0 : i32, i32, i32
  }
}

module attributes {stable_mosaic.version = 11 : i64} {
  func.func @_layer_kernel(%arg0: i32, %arg1: memref<1x128x256xbf16, #tpu.memory_space<vmem>>, %arg2: memref<16x128xbf16, #tpu.memory_space<vmem>>, %arg3: memref<16x1xf32, #tpu.memory_space<vmem>>, %arg4: memref<16x1xf32, #tpu.memory_space<vmem>>, %arg5: memref<16x1xf32, #tpu.memory_space<vmem>>, %arg6: memref<1x16x256xf32, #tpu.memory_space<vmem>>) attributes {dimension_semantics = [#tpu.dimension_semantics<parallel>], iteration_bounds = array<i64: 2>, scalar_prefetch = 0 : i64, scratch_operands = 0 : i64, tpu.core_type = #tpu.core_type<tc>, window_params = [{transform_indices = @transform_0, window_bounds = array<i64: 1, 128, 256>}, {pipeline_mode = #tpu.pipeline_mode<synchronous>, transform_indices = @transform_1, window_bounds = array<i64: 16, 128>}, {pipeline_mode = #tpu.pipeline_mode<synchronous>, transform_indices = @transform_2, window_bounds = array<i64: 16, 1>}, {pipeline_mode = #tpu.pipeline_mode<synchronous>, transform_indices = @transform_3, window_bounds = array<i64: 16, 1>}, {pipeline_mode = #tpu.pipeline_mode<synchronous>, transform_indices = @transform_4, window_bounds = array<i64: 16, 1>}, {transform_indices = @transform_5, window_bounds = array<i64: 1, 16, 256>}]} {
    %c0 = arith.constant 0 : index
    %c0_0 = arith.constant 0 : index
    %c0_1 = arith.constant 0 : index
    %0 = vector.load %arg1[%c0, %c0_0, %c0_1] : memref<1x128x256xbf16, #tpu.memory_space<vmem>>, vector<1x128x256xbf16>
    %1 = vector.shape_cast %0 : vector<1x128x256xbf16> to vector<128x256xbf16>
    %c0_2 = arith.constant 0 : index
    %c0_3 = arith.constant 0 : index
    %2 = vector.load %arg2[%c0_2, %c0_3] : memref<16x128xbf16, #tpu.memory_space<vmem>>, vector<16x128xbf16>
    %cst = arith.constant dense<0.000000e+00> : vector<16x256xf32>
    %3 = tpu.matmul %2, %1, %cst {dimension_numbers = #tpu.dot_dimension_numbers<[1], [0], [0], [1], [0, 0, 1, 1], [], []>} : vector<16x128xbf16>, vector<128x256xbf16>, vector<16x256xf32> -> vector<16x256xf32>
    %c0_4 = arith.constant 0 : index
    %c0_5 = arith.constant 0 : index
    %4 = vector.load %arg3[%c0_4, %c0_5] : memref<16x1xf32, #tpu.memory_space<vmem>>, vector<16x1xf32>
    %5 = vector.broadcast %4 : vector<16x1xf32> to vector<16x256xf32>
    %6 = arith.addf %3, %5 : vector<16x256xf32>
    %cst_6 = arith.constant dense<0.000000e+00> : vector<16xf32>
    %7 = vector.multi_reduction <add>, %6, %cst_6 [1] : vector<16x256xf32> to vector<16xf32>
    %8 = vector.shape_cast %7 : vector<16xf32> to vector<16x1xf32>
    %cst_7 = arith.constant 2.560000e+02 : f32
    %9 = vector.broadcast %cst_7 : f32 to vector<16x1xf32>
    %10 = arith.divf %8, %9 : vector<16x1xf32>
    %11 = vector.broadcast %10 : vector<16x1xf32> to vector<16x256xf32>
    %12 = arith.subf %6, %11 : vector<16x256xf32>
    %13 = arith.mulf %12, %12 : vector<16x256xf32>
    %cst_8 = arith.constant dense<0.000000e+00> : vector<16xf32>
    %14 = vector.multi_reduction <add>, %13, %cst_8 [1] : vector<16x256xf32> to vector<16xf32>
    %15 = vector.shape_cast %14 : vector<16xf32> to vector<16x1xf32>
    %cst_9 = arith.constant 2.560000e+02 : f32
    %16 = vector.broadcast %cst_9 : f32 to vector<16x1xf32>
    %17 = arith.divf %15, %16 : vector<16x1xf32>
    %18 = vector.broadcast %10 : vector<16x1xf32> to vector<16x256xf32>
    %19 = arith.subf %6, %18 : vector<16x256xf32>
    %cst_10 = arith.constant 9.99999974E-6 : f32
    %20 = vector.broadcast %cst_10 : f32 to vector<16x1xf32>
    %21 = arith.addf %17, %20 : vector<16x1xf32>
    %22 = math.rsqrt %21 : vector<16x1xf32>
    %23 = vector.broadcast %22 : vector<16x1xf32> to vector<16x256xf32>
    %24 = arith.mulf %19, %23 : vector<16x256xf32>
    %c0_11 = arith.constant 0 : index
    %c0_12 = arith.constant 0 : index
    %25 = vector.load %arg4[%c0_11, %c0_12] : memref<16x1xf32, #tpu.memory_space<vmem>>, vector<16x1xf32>
    %26 = vector.broadcast %25 : vector<16x1xf32> to vector<16x256xf32>
    %27 = arith.mulf %24, %26 : vector<16x256xf32>
    %c0_13 = arith.constant 0 : index
    %c0_14 = arith.constant 0 : index
    %28 = vector.load %arg5[%c0_13, %c0_14] : memref<16x1xf32, #tpu.memory_space<vmem>>, vector<16x1xf32>
    %29 = vector.broadcast %28 : vector<16x1xf32> to vector<16x256xf32>
    %30 = arith.addf %27, %29 : vector<16x256xf32>
    %cst_15 = arith.constant 2.000000e-01 : f32
    %31 = vector.broadcast %cst_15 : f32 to vector<16x256xf32>
    %32 = arith.mulf %31, %30 : vector<16x256xf32>
    %33 = arith.maximumf %30, %32 : vector<16x256xf32>
    %c0_16 = arith.constant 0 : index
    %c0_17 = arith.constant 0 : index
    %c0_18 = arith.constant 0 : index
    %34 = vector.load %arg6[%c0_16, %c0_17, %c0_18] : memref<1x16x256xf32, #tpu.memory_space<vmem>>, vector<1x16x256xf32>
    %35 = vector.shape_cast %34 : vector<1x16x256xf32> to vector<16x256xf32>
    %36 = vector.shape_cast %33 : vector<16x256xf32> to vector<1x16x256xf32>
    tpu.vector_store %arg6[%c0_16, %c0_17, %c0_18], %36 {strides = array<i32>} : memref<1x16x256xf32, #tpu.memory_space<vmem>>, vector<1x16x256xf32>,
    return
  }
  func.func @transform_0(%arg0: i32) -> (i32, i32, i32) {
    %c0_i32 = arith.constant 0 : i32
    %c0_i32_0 = arith.constant 0 : i32
    %c0_i32_1 = arith.constant 0 : i32
    return %arg0, %c0_i32, %c0_i32_0 : i32, i32, i32
  }
  func.func @transform_1(%arg0: i32) -> (i32, i32) {
    %c0_i32 = arith.constant 0 : i32
    %c0_i32_0 = arith.constant 0 : i32
    %c0_i32_1 = arith.constant 0 : i32
    return %c0_i32, %c0_i32_0 : i32, i32
  }
  func.func @transform_2(%arg0: i32) -> (i32, i32) {
    %c0_i32 = arith.constant 0 : i32
    %c0_i32_0 = arith.constant 0 : i32
    %c0_i32_1 = arith.constant 0 : i32
    return %c0_i32, %c0_i32_0 : i32, i32
  }
  func.func @transform_3(%arg0: i32) -> (i32, i32) {
    %c0_i32 = arith.constant 0 : i32
    %c0_i32_0 = arith.constant 0 : i32
    %c0_i32_1 = arith.constant 0 : i32
    return %c0_i32, %c0_i32_0 : i32, i32
  }
  func.func @transform_4(%arg0: i32) -> (i32, i32) {
    %c0_i32 = arith.constant 0 : i32
    %c0_i32_0 = arith.constant 0 : i32
    %c0_i32_1 = arith.constant 0 : i32
    return %c0_i32, %c0_i32_0 : i32, i32
  }
  func.func @transform_5(%arg0: i32) -> (i32, i32, i32) {
    %c0_i32 = arith.constant 0 : i32
    %c0_i32_0 = arith.constant 0 : i32
    %c0_i32_1 = arith.constant 0 : i32
    return %arg0, %c0_i32, %c0_i32_0 : i32, i32, i32
  }
}

module attributes {stable_mosaic.version = 11 : i64} {
  func.func @_layer_kernel(%arg0: i32, %arg1: memref<1x256x64xbf16, #tpu.memory_space<vmem>>, %arg2: memref<32x256xbf16, #tpu.memory_space<vmem>>, %arg3: memref<32x1xf32, #tpu.memory_space<vmem>>, %arg4: memref<32x1xf32, #tpu.memory_space<vmem>>, %arg5: memref<32x1xf32, #tpu.memory_space<vmem>>, %arg6: memref<1x32x64xf32, #tpu.memory_space<vmem>>) attributes {dimension_semantics = [#tpu.dimension_semantics<parallel>], iteration_bounds = array<i64: 2>, scalar_prefetch = 0 : i64, scratch_operands = 0 : i64, tpu.core_type = #tpu.core_type<tc>, window_params = [{transform_indices = @transform_0, window_bounds = array<i64: 1, 256, 64>}, {pipeline_mode = #tpu.pipeline_mode<synchronous>, transform_indices = @transform_1, window_bounds = array<i64: 32, 256>}, {pipeline_mode = #tpu.pipeline_mode<synchronous>, transform_indices = @transform_2, window_bounds = array<i64: 32, 1>}, {pipeline_mode = #tpu.pipeline_mode<synchronous>, transform_indices = @transform_3, window_bounds = array<i64: 32, 1>}, {pipeline_mode = #tpu.pipeline_mode<synchronous>, transform_indices = @transform_4, window_bounds = array<i64: 32, 1>}, {transform_indices = @transform_5, window_bounds = array<i64: 1, 32, 64>}]} {
    %c0 = arith.constant 0 : index
    %c0_0 = arith.constant 0 : index
    %c0_1 = arith.constant 0 : index
    %0 = vector.load %arg1[%c0, %c0_0, %c0_1] : memref<1x256x64xbf16, #tpu.memory_space<vmem>>, vector<1x256x64xbf16>
    %1 = vector.shape_cast %0 : vector<1x256x64xbf16> to vector<256x64xbf16>
    %c0_2 = arith.constant 0 : index
    %c0_3 = arith.constant 0 : index
    %2 = vector.load %arg2[%c0_2, %c0_3] : memref<32x256xbf16, #tpu.memory_space<vmem>>, vector<32x256xbf16>
    %cst = arith.constant dense<0.000000e+00> : vector<32x64xf32>
    %3 = tpu.matmul %2, %1, %cst {dimension_numbers = #tpu.dot_dimension_numbers<[1], [0], [0], [1], [0, 0, 1, 1], [], []>} : vector<32x256xbf16>, vector<256x64xbf16>, vector<32x64xf32> -> vector<32x64xf32>
    %c0_4 = arith.constant 0 : index
    %c0_5 = arith.constant 0 : index
    %4 = vector.load %arg3[%c0_4, %c0_5] : memref<32x1xf32, #tpu.memory_space<vmem>>, vector<32x1xf32>
    %5 = vector.broadcast %4 : vector<32x1xf32> to vector<32x64xf32>
    %6 = arith.addf %3, %5 : vector<32x64xf32>
    %cst_6 = arith.constant dense<0.000000e+00> : vector<32xf32>
    %7 = vector.multi_reduction <add>, %6, %cst_6 [1] : vector<32x64xf32> to vector<32xf32>
    %8 = vector.shape_cast %7 : vector<32xf32> to vector<32x1xf32>
    %cst_7 = arith.constant 6.400000e+01 : f32
    %9 = vector.broadcast %cst_7 : f32 to vector<32x1xf32>
    %10 = arith.divf %8, %9 : vector<32x1xf32>
    %11 = vector.broadcast %10 : vector<32x1xf32> to vector<32x64xf32>
    %12 = arith.subf %6, %11 : vector<32x64xf32>
    %13 = arith.mulf %12, %12 : vector<32x64xf32>
    %cst_8 = arith.constant dense<0.000000e+00> : vector<32xf32>
    %14 = vector.multi_reduction <add>, %13, %cst_8 [1] : vector<32x64xf32> to vector<32xf32>
    %15 = vector.shape_cast %14 : vector<32xf32> to vector<32x1xf32>
    %cst_9 = arith.constant 6.400000e+01 : f32
    %16 = vector.broadcast %cst_9 : f32 to vector<32x1xf32>
    %17 = arith.divf %15, %16 : vector<32x1xf32>
    %18 = vector.broadcast %10 : vector<32x1xf32> to vector<32x64xf32>
    %19 = arith.subf %6, %18 : vector<32x64xf32>
    %cst_10 = arith.constant 9.99999974E-6 : f32
    %20 = vector.broadcast %cst_10 : f32 to vector<32x1xf32>
    %21 = arith.addf %17, %20 : vector<32x1xf32>
    %22 = math.rsqrt %21 : vector<32x1xf32>
    %23 = vector.broadcast %22 : vector<32x1xf32> to vector<32x64xf32>
    %24 = arith.mulf %19, %23 : vector<32x64xf32>
    %c0_11 = arith.constant 0 : index
    %c0_12 = arith.constant 0 : index
    %25 = vector.load %arg4[%c0_11, %c0_12] : memref<32x1xf32, #tpu.memory_space<vmem>>, vector<32x1xf32>
    %26 = vector.broadcast %25 : vector<32x1xf32> to vector<32x64xf32>
    %27 = arith.mulf %24, %26 : vector<32x64xf32>
    %c0_13 = arith.constant 0 : index
    %c0_14 = arith.constant 0 : index
    %28 = vector.load %arg5[%c0_13, %c0_14] : memref<32x1xf32, #tpu.memory_space<vmem>>, vector<32x1xf32>
    %29 = vector.broadcast %28 : vector<32x1xf32> to vector<32x64xf32>
    %30 = arith.addf %27, %29 : vector<32x64xf32>
    %cst_15 = arith.constant 2.000000e-01 : f32
    %31 = vector.broadcast %cst_15 : f32 to vector<32x64xf32>
    %32 = arith.mulf %31, %30 : vector<32x64xf32>
    %33 = arith.maximumf %30, %32 : vector<32x64xf32>
    %c0_16 = arith.constant 0 : index
    %c0_17 = arith.constant 0 : index
    %c0_18 = arith.constant 0 : index
    %34 = vector.load %arg6[%c0_16, %c0_17, %c0_18] : memref<1x32x64xf32, #tpu.memory_space<vmem>>, vector<1x32x64xf32>
    %35 = vector.shape_cast %34 : vector<1x32x64xf32> to vector<32x64xf32>
    %36 = vector.shape_cast %33 : vector<32x64xf32> to vector<1x32x64xf32>
    tpu.vector_store %arg6[%c0_16, %c0_17, %c0_18], %36 {strides = array<i32>} : memref<1x32x64xf32, #tpu.memory_space<vmem>>, vector<1x32x64xf32>,
    return
  }
  func.func @transform_0(%arg0: i32) -> (i32, i32, i32) {
    %c0_i32 = arith.constant 0 : i32
    %c0_i32_0 = arith.constant 0 : i32
    %c0_i32_1 = arith.constant 0 : i32
    return %arg0, %c0_i32, %c0_i32_0 : i32, i32, i32
  }
  func.func @transform_1(%arg0: i32) -> (i32, i32) {
    %c0_i32 = arith.constant 0 : i32
    %c0_i32_0 = arith.constant 0 : i32
    %c0_i32_1 = arith.constant 0 : i32
    return %c0_i32, %c0_i32_0 : i32, i32
  }
  func.func @transform_2(%arg0: i32) -> (i32, i32) {
    %c0_i32 = arith.constant 0 : i32
    %c0_i32_0 = arith.constant 0 : i32
    %c0_i32_1 = arith.constant 0 : i32
    return %c0_i32, %c0_i32_0 : i32, i32
  }
  func.func @transform_3(%arg0: i32) -> (i32, i32) {
    %c0_i32 = arith.constant 0 : i32
    %c0_i32_0 = arith.constant 0 : i32
    %c0_i32_1 = arith.constant 0 : i32
    return %c0_i32, %c0_i32_0 : i32, i32
  }
  func.func @transform_4(%arg0: i32) -> (i32, i32) {
    %c0_i32 = arith.constant 0 : i32
    %c0_i32_0 = arith.constant 0 : i32
    %c0_i32_1 = arith.constant 0 : i32
    return %c0_i32, %c0_i32_0 : i32, i32
  }
  func.func @transform_5(%arg0: i32) -> (i32, i32, i32) {
    %c0_i32 = arith.constant 0 : i32
    %c0_i32_0 = arith.constant 0 : i32
    %c0_i32_1 = arith.constant 0 : i32
    return %arg0, %c0_i32, %c0_i32_0 : i32, i32, i32
  }
}

module attributes {stable_mosaic.version = 11 : i64} {
  func.func @_layer_kernel(%arg0: i32, %arg1: memref<1x512x16xbf16, #tpu.memory_space<vmem>>, %arg2: memref<64x512xbf16, #tpu.memory_space<vmem>>, %arg3: memref<64x1xf32, #tpu.memory_space<vmem>>, %arg4: memref<64x1xf32, #tpu.memory_space<vmem>>, %arg5: memref<64x1xf32, #tpu.memory_space<vmem>>, %arg6: memref<1x64x16xf32, #tpu.memory_space<vmem>>) attributes {dimension_semantics = [#tpu.dimension_semantics<parallel>], iteration_bounds = array<i64: 2>, scalar_prefetch = 0 : i64, scratch_operands = 0 : i64, tpu.core_type = #tpu.core_type<tc>, window_params = [{transform_indices = @transform_0, window_bounds = array<i64: 1, 512, 16>}, {pipeline_mode = #tpu.pipeline_mode<synchronous>, transform_indices = @transform_1, window_bounds = array<i64: 64, 512>}, {pipeline_mode = #tpu.pipeline_mode<synchronous>, transform_indices = @transform_2, window_bounds = array<i64: 64, 1>}, {pipeline_mode = #tpu.pipeline_mode<synchronous>, transform_indices = @transform_3, window_bounds = array<i64: 64, 1>}, {pipeline_mode = #tpu.pipeline_mode<synchronous>, transform_indices = @transform_4, window_bounds = array<i64: 64, 1>}, {transform_indices = @transform_5, window_bounds = array<i64: 1, 64, 16>}]} {
    %c0 = arith.constant 0 : index
    %c0_0 = arith.constant 0 : index
    %c0_1 = arith.constant 0 : index
    %0 = vector.load %arg1[%c0, %c0_0, %c0_1] : memref<1x512x16xbf16, #tpu.memory_space<vmem>>, vector<1x512x16xbf16>
    %1 = vector.shape_cast %0 : vector<1x512x16xbf16> to vector<512x16xbf16>
    %c0_2 = arith.constant 0 : index
    %c0_3 = arith.constant 0 : index
    %2 = vector.load %arg2[%c0_2, %c0_3] : memref<64x512xbf16, #tpu.memory_space<vmem>>, vector<64x512xbf16>
    %cst = arith.constant dense<0.000000e+00> : vector<64x16xf32>
    %3 = tpu.matmul %2, %1, %cst {dimension_numbers = #tpu.dot_dimension_numbers<[1], [0], [0], [1], [0, 0, 1, 1], [], []>} : vector<64x512xbf16>, vector<512x16xbf16>, vector<64x16xf32> -> vector<64x16xf32>
    %c0_4 = arith.constant 0 : index
    %c0_5 = arith.constant 0 : index
    %4 = vector.load %arg3[%c0_4, %c0_5] : memref<64x1xf32, #tpu.memory_space<vmem>>, vector<64x1xf32>
    %5 = vector.broadcast %4 : vector<64x1xf32> to vector<64x16xf32>
    %6 = arith.addf %3, %5 : vector<64x16xf32>
    %cst_6 = arith.constant dense<0.000000e+00> : vector<64xf32>
    %7 = vector.multi_reduction <add>, %6, %cst_6 [1] : vector<64x16xf32> to vector<64xf32>
    %8 = vector.shape_cast %7 : vector<64xf32> to vector<64x1xf32>
    %cst_7 = arith.constant 1.600000e+01 : f32
    %9 = vector.broadcast %cst_7 : f32 to vector<64x1xf32>
    %10 = arith.divf %8, %9 : vector<64x1xf32>
    %11 = vector.broadcast %10 : vector<64x1xf32> to vector<64x16xf32>
    %12 = arith.subf %6, %11 : vector<64x16xf32>
    %13 = arith.mulf %12, %12 : vector<64x16xf32>
    %cst_8 = arith.constant dense<0.000000e+00> : vector<64xf32>
    %14 = vector.multi_reduction <add>, %13, %cst_8 [1] : vector<64x16xf32> to vector<64xf32>
    %15 = vector.shape_cast %14 : vector<64xf32> to vector<64x1xf32>
    %cst_9 = arith.constant 1.600000e+01 : f32
    %16 = vector.broadcast %cst_9 : f32 to vector<64x1xf32>
    %17 = arith.divf %15, %16 : vector<64x1xf32>
    %18 = vector.broadcast %10 : vector<64x1xf32> to vector<64x16xf32>
    %19 = arith.subf %6, %18 : vector<64x16xf32>
    %cst_10 = arith.constant 9.99999974E-6 : f32
    %20 = vector.broadcast %cst_10 : f32 to vector<64x1xf32>
    %21 = arith.addf %17, %20 : vector<64x1xf32>
    %22 = math.rsqrt %21 : vector<64x1xf32>
    %23 = vector.broadcast %22 : vector<64x1xf32> to vector<64x16xf32>
    %24 = arith.mulf %19, %23 : vector<64x16xf32>
    %c0_11 = arith.constant 0 : index
    %c0_12 = arith.constant 0 : index
    %25 = vector.load %arg4[%c0_11, %c0_12] : memref<64x1xf32, #tpu.memory_space<vmem>>, vector<64x1xf32>
    %26 = vector.broadcast %25 : vector<64x1xf32> to vector<64x16xf32>
    %27 = arith.mulf %24, %26 : vector<64x16xf32>
    %c0_13 = arith.constant 0 : index
    %c0_14 = arith.constant 0 : index
    %28 = vector.load %arg5[%c0_13, %c0_14] : memref<64x1xf32, #tpu.memory_space<vmem>>, vector<64x1xf32>
    %29 = vector.broadcast %28 : vector<64x1xf32> to vector<64x16xf32>
    %30 = arith.addf %27, %29 : vector<64x16xf32>
    %cst_15 = arith.constant 2.000000e-01 : f32
    %31 = vector.broadcast %cst_15 : f32 to vector<64x16xf32>
    %32 = arith.mulf %31, %30 : vector<64x16xf32>
    %33 = arith.maximumf %30, %32 : vector<64x16xf32>
    %c0_16 = arith.constant 0 : index
    %c0_17 = arith.constant 0 : index
    %c0_18 = arith.constant 0 : index
    %34 = vector.load %arg6[%c0_16, %c0_17, %c0_18] : memref<1x64x16xf32, #tpu.memory_space<vmem>>, vector<1x64x16xf32>
    %35 = vector.shape_cast %34 : vector<1x64x16xf32> to vector<64x16xf32>
    %36 = vector.shape_cast %33 : vector<64x16xf32> to vector<1x64x16xf32>
    tpu.vector_store %arg6[%c0_16, %c0_17, %c0_18], %36 {strides = array<i32>} : memref<1x64x16xf32, #tpu.memory_space<vmem>>, vector<1x64x16xf32>,
    return
  }
  func.func @transform_0(%arg0: i32) -> (i32, i32, i32) {
    %c0_i32 = arith.constant 0 : i32
    %c0_i32_0 = arith.constant 0 : i32
    %c0_i32_1 = arith.constant 0 : i32
    return %arg0, %c0_i32, %c0_i32_0 : i32, i32, i32
  }
  func.func @transform_1(%arg0: i32) -> (i32, i32) {
    %c0_i32 = arith.constant 0 : i32
    %c0_i32_0 = arith.constant 0 : i32
    %c0_i32_1 = arith.constant 0 : i32
    return %c0_i32, %c0_i32_0 : i32, i32
  }
  func.func @transform_2(%arg0: i32) -> (i32, i32) {
    %c0_i32 = arith.constant 0 : i32
    %c0_i32_0 = arith.constant 0 : i32
    %c0_i32_1 = arith.constant 0 : i32
    return %c0_i32, %c0_i32_0 : i32, i32
  }
  func.func @transform_3(%arg0: i32) -> (i32, i32) {
    %c0_i32 = arith.constant 0 : i32
    %c0_i32_0 = arith.constant 0 : i32
    %c0_i32_1 = arith.constant 0 : i32
    return %c0_i32, %c0_i32_0 : i32, i32
  }
  func.func @transform_4(%arg0: i32) -> (i32, i32) {
    %c0_i32 = arith.constant 0 : i32
    %c0_i32_0 = arith.constant 0 : i32
    %c0_i32_1 = arith.constant 0 : i32
    return %c0_i32, %c0_i32_0 : i32, i32
  }
  func.func @transform_5(%arg0: i32) -> (i32, i32, i32) {
    %c0_i32 = arith.constant 0 : i32
    %c0_i32_0 = arith.constant 0 : i32
    %c0_i32_1 = arith.constant 0 : i32
    return %arg0, %c0_i32, %c0_i32_0 : i32, i32, i32
  }
}

module attributes {stable_mosaic.version = 11 : i64} {
  func.func @_layer_kernel(%arg0: i32, %arg1: memref<1x1024x1xbf16, #tpu.memory_space<vmem>>, %arg2: memref<1x1024xbf16, #tpu.memory_space<vmem>>, %arg3: memref<1x1xf32, #tpu.memory_space<vmem>>, %arg4: memref<1x1xf32, #tpu.memory_space<vmem>>, %arg5: memref<1x1xf32, #tpu.memory_space<vmem>>, %arg6: memref<1x1x1xf32, #tpu.memory_space<vmem>>) attributes {dimension_semantics = [#tpu.dimension_semantics<parallel>], iteration_bounds = array<i64: 2>, scalar_prefetch = 0 : i64, scratch_operands = 0 : i64, tpu.core_type = #tpu.core_type<tc>, window_params = [{transform_indices = @transform_0, window_bounds = array<i64: 1, 1024, 1>}, {pipeline_mode = #tpu.pipeline_mode<synchronous>, transform_indices = @transform_1, window_bounds = array<i64: 1, 1024>}, {pipeline_mode = #tpu.pipeline_mode<synchronous>, transform_indices = @transform_2, window_bounds = array<i64: 1, 1>}, {pipeline_mode = #tpu.pipeline_mode<synchronous>, transform_indices = @transform_3, window_bounds = array<i64: 1, 1>}, {pipeline_mode = #tpu.pipeline_mode<synchronous>, transform_indices = @transform_4, window_bounds = array<i64: 1, 1>}, {transform_indices = @transform_5, window_bounds = array<i64: 1, 1, 1>}]} {
    %c0 = arith.constant 0 : index
    %c0_0 = arith.constant 0 : index
    %c0_1 = arith.constant 0 : index
    %0 = vector.load %arg1[%c0, %c0_0, %c0_1] : memref<1x1024x1xbf16, #tpu.memory_space<vmem>>, vector<1x1024x1xbf16>
    %1 = vector.shape_cast %0 : vector<1x1024x1xbf16> to vector<1024x1xbf16>
    %c0_2 = arith.constant 0 : index
    %c0_3 = arith.constant 0 : index
    %2 = vector.load %arg2[%c0_2, %c0_3] : memref<1x1024xbf16, #tpu.memory_space<vmem>>, vector<1x1024xbf16>
    %cst = arith.constant dense<0.000000e+00> : vector<1x1xf32>
    %3 = tpu.matmul %2, %1, %cst {dimension_numbers = #tpu.dot_dimension_numbers<[1], [0], [0], [1], [0, 0, 1, 1], [], []>} : vector<1x1024xbf16>, vector<1024x1xbf16>, vector<1x1xf32> -> vector<1x1xf32>
    %c0_4 = arith.constant 0 : index
    %c0_5 = arith.constant 0 : index
    %4 = vector.load %arg3[%c0_4, %c0_5] : memref<1x1xf32, #tpu.memory_space<vmem>>, vector<1x1xf32>
    %5 = arith.addf %3, %4 : vector<1x1xf32>
    %cst_6 = arith.constant 0.000000e+00 : f32
    %6 = vector.broadcast %cst_6 : f32 to vector<1x1xf32>
    %7 = arith.subf %6, %5 : vector<1x1xf32>
    %8 = math.exp %7 : vector<1x1xf32>
    %cst_7 = arith.constant 1.000000e+00 : f32
    %9 = vector.broadcast %cst_7 : f32 to vector<1x1xf32>
    %10 = arith.addf %9, %8 : vector<1x1xf32>
    %11 = tpu.reciprocal %10 {approx = true} : vector<1x1xf32> -> vector<1x1xf32>
    %c0_8 = arith.constant 0 : index
    %c0_9 = arith.constant 0 : index
    %c0_10 = arith.constant 0 : index
    %12 = vector.load %arg6[%c0_8, %c0_9, %c0_10] : memref<1x1x1xf32, #tpu.memory_space<vmem>>, vector<1x1x1xf32>
    %13 = vector.shape_cast %12 : vector<1x1x1xf32> to vector<1x1xf32>
    %14 = vector.shape_cast %11 : vector<1x1xf32> to vector<1x1x1xf32>
    tpu.vector_store %arg6[%c0_8, %c0_9, %c0_10], %14 {strides = array<i32>} : memref<1x1x1xf32, #tpu.memory_space<vmem>>, vector<1x1x1xf32>,
    return
  }
  func.func @transform_0(%arg0: i32) -> (i32, i32, i32) {
    %c0_i32 = arith.constant 0 : i32
    %c0_i32_0 = arith.constant 0 : i32
    %c0_i32_1 = arith.constant 0 : i32
    return %arg0, %c0_i32, %c0_i32_0 : i32, i32, i32
  }
  func.func @transform_1(%arg0: i32) -> (i32, i32) {
    %c0_i32 = arith.constant 0 : i32
    %c0_i32_0 = arith.constant 0 : i32
    %c0_i32_1 = arith.constant 0 : i32
    return %c0_i32, %c0_i32_0 : i32, i32
  }
  func.func @transform_2(%arg0: i32) -> (i32, i32) {
    %c0_i32 = arith.constant 0 : i32
    %c0_i32_0 = arith.constant 0 : i32
    %c0_i32_1 = arith.constant 0 : i32
    return %c0_i32, %c0_i32_0 : i32, i32
  }
  func.func @transform_3(%arg0: i32) -> (i32, i32) {
    %c0_i32 = arith.constant 0 : i32
    %c0_i32_0 = arith.constant 0 : i32
    %c0_i32_1 = arith.constant 0 : i32
    return %c0_i32, %c0_i32_0 : i32, i32
  }
  func.func @transform_4(%arg0: i32) -> (i32, i32) {
    %c0_i32 = arith.constant 0 : i32
    %c0_i32_0 = arith.constant 0 : i32
    %c0_i32_1 = arith.constant 0 : i32
    return %c0_i32, %c0_i32_0 : i32, i32
  }
  func.func @transform_5(%arg0: i32) -> (i32, i32, i32) {
    %c0_i32 = arith.constant 0 : i32
    %c0_i32_0 = arith.constant 0 : i32
    %c0_i32_1 = arith.constant 0 : i32
    return %arg0, %c0_i32, %c0_i32_0 : i32, i32, i32
  }
}

</mosaic_0001>

<bundles_post_ra>
// kernel: _lambda_.6
= control target key start
LH: loop header
LB: loop body
LE: loop exit
PB: predicated region body
PF: predicated region fallthrough
CT: control target
= control target key end

     0   :  { %s1841_s18 = smov 0   ;;  %s2069_s0 = inlined_call_operand.vmem [shape: bf16[2,48,4096], index: 0, kind: input, shape index: {}]   ;;  %s2070_s1 = inlined_call_operand.vmem [shape: bf16[4,48], index: 1, kind: input, shape index: {}]   ;;  %s2071_s2 = inlined_call_operand.vmem [shape: f32[4,1], index: 2, kind: input, shape index: {}]   ;;  %s2072_s3 = inlined_call_operand.vmem [shape: f32[4,1], index: 3, kind: input, shape index: {}]   ;;  %s2073_s4 = inlined_call_operand.vmem [shape: f32[4,1], index: 4, kind: input, shape index: {}]   ;;  %s2074_s5 = inlined_call_operand.vmem [shape: f32[2,4,4096], index: 5, kind: output, shape index: {}]  }
   0x1 LB: > { %s1668_s19 = sadd.s32 4294967295, %s1808_s18   ;;  %p1672_p0 = scmp.ge.s32.totalorder %s1808_s18, 1  ;;  %s1808_s18 = sphi %s1841_s18, %s15_s18  }
   0x2   : > { %p187_p1 = scmp.lt.s32.totalorder %s1808_s18, 3 }
   0x4   : > { %p188_p2 = pnand %p1672_p0, %p187_p1 }
   0x5   : > { %p215_p3 = scmp.lt.s32.totalorder (!%p188_p2), %s1668_s19, 1  ;;  %v1810_v0 = vmov (!%p188_p2), 0   ;;  %v323_v1 = vld [vmem:[%s2071_s2] sm:$0xf] (!%p188_p2)  ;;  %vm809_vm0 = vcmask (!%p188_p2), 392192  }
   0x6   : > { %191 = sbr.rel (%p188_p2) target bundleno = 339 (0x153), region = 40  ;;  %845 = vmatprep.mubr.bf16.mxu0 (!%p188_p2), %v1810_v0  ;;  %886 = vmatprep.mubr.bf16.mxu1 (!%p188_p2), %v1810_v0  ;;  %v1886_v36 = vld [vmem:[%s2070_s1] sm:$0x3] (!%p188_p2) }
   0x7   : > { %1801 = vset.pattern.permute.xlu0 (!%p188_p2), %v1810_v0 }
   0x8   : > { %326 = vperm.xlu0 (!%p188_p2), %1801, %v323_v1  }
   0xd   : > { %s2076_s19 = smov (!%p215_p3, %s1668_s19), 1 }
   0xe   : > { %s1791_s20 = smul.u32 768, %s2076_s19  ;;  %s1790_s26 = sshll.u32 %s2076_s19, 7 }
   0xf   : > { %s2020_s29 = scalar_lea.vmem %s2074_s5, %s1790_s26 }
  0x10   : > { %s1861_s23 = scalar_lea.vmem %s2069_s0, %s1791_s20 }
  0x11   : > { %v226_v2 = vld [vmem:[%s1861_s23] sm:$0xff]  ;;  %v227_v4 = vld [vmem:[%s1861_s23 + $0x8] sm:$0xff]  ;;  %v228_v24 = vld [vmem:[%s1861_s23 + $0x10] sm:$0xff] }
  0x12   : > { %v242_v3 = vld [vmem:[%s1861_s23 + $0x80] sm:$0xff]  ;;  %v243_v6 = vld [vmem:[%s1861_s23 + $0x88] sm:$0xff]  ;;  %v244_v25 = vld [vmem:[%s1861_s23 + $0x90] sm:$0xff] }
  0x13   : > { %v1677_v5 = vcombine.high %v226_v2, %v242_v3  ;;  %v1676_v7 = vcombine.low %v226_v2, %v242_v3  ;;  %v258_v8 = vld [vmem:[%s1861_s23 + $0x100] sm:$0xff]  ;;  %v1679_v10 = vcombine.high %v227_v4, %v243_v6  ;;  %v1678_v11 = vcombine.low %v227_v4, %v243_v6  ;;  %v259_v13 = vld [vmem:[%s1861_s23 + $0x108] sm:$0xff]  ;;  %v229_v26 = vld [vmem:[%s1861_s23 + $0x18] sm:$0xff] }
  0x14   : > { %v274_v9 = vld [vmem:[%s1861_s23 + $0x180] sm:$0xff]  ;;  %v275_v14 = vld [vmem:[%s1861_s23 + $0x188] sm:$0xff]  ;;  %v245_v27 = vld [vmem:[%s1861_s23 + $0x98] sm:$0xff]  ;;  %v1681_v30 = vcombine.high %v228_v24, %v244_v25  ;;  %v1680_v37 = vcombine.low %v228_v24, %v244_v25 }
  0x15   : > { %v1709_v12 = vcombine.high %v258_v8, %v274_v9  ;;  %v290_v15 = vld [vmem:[%s1861_s23 + $0x200] sm:$0xff]  ;;  %813 = vmatprep.subr.bf16.mxu0 %v1677_v5  ;;  %v1711_v16 = vcombine.high %v259_v13, %v275_v14  ;;  %v291_v18 = vld [vmem:[%s1861_s23 + $0x208] sm:$0xff]  ;;  %854 = vmatprep.subr.bf16.mxu1 %v1679_v10  ;;  %v1708_v20 = vcombine.low %v258_v8, %v274_v9  ;;  %v260_v32 = vld [vmem:[%s1861_s23 + $0x110] sm:$0xff] }
  0x16   : > { %v306_v17 = vld [vmem:[%s1861_s23 + $0x280] sm:$0xff]  ;;  %v307_v19 = vld [vmem:[%s1861_s23 + $0x288] sm:$0xff]  ;;  %814 = vmatpush1.bf16.msra.mxu0 %v1676_v7  ;;  %855 = vmatpush1.bf16.msra.mxu1 %v1678_v11  ;;  %v1710_v21 = vcombine.low %v259_v13, %v275_v14  ;;  %v1683_v31 = vcombine.high %v229_v26, %v245_v27  ;;  %v276_v33 = vld [vmem:[%s1861_s23 + $0x190] sm:$0xff]  ;;  %v1682_v38 = vcombine.low %v229_v26, %v245_v27 }
  0x17   : > { %815 = vmatprep.subr.bf16.mxu0 %v1709_v12  ;;  %v1741_v22 = vcombine.high %v290_v15, %v306_v17  ;;  %856 = vmatprep.subr.bf16.mxu1 %v1711_v16  ;;  %v1743_v23 = vcombine.high %v291_v18, %v307_v19  ;;  %v1740_v28 = vcombine.low %v290_v15, %v306_v17  ;;  %v261_v34 = vld [vmem:[%s1861_s23 + $0x118] sm:$0xff]  ;;  %v292_v41 = vld [vmem:[%s1861_s23 + $0x210] sm:$0xff]  ;;  %v230_v49 = vld [vmem:[%s1861_s23 + $0x20] sm:$0xff] }
  0x18   : > { %v1742_v29 = vcombine.low %v291_v18, %v307_v19  ;;  %v277_v35 = vld [vmem:[%s1861_s23 + $0x198] sm:$0xff]  ;;  %v1713_v39 = vcombine.high %v260_v32, %v276_v33  ;;  %v308_v42 = vld [vmem:[%s1861_s23 + $0x290] sm:$0xff]  ;;  %v1712_v45 = vcombine.low %v260_v32, %v276_v33  ;;  %v246_v50 = vld [vmem:[%s1861_s23 + $0xa0] sm:$0xff] }
  0x19   : > { %v1715_v40 = vcombine.high %v261_v34, %v277_v35  ;;  %v293_v43 = vld [vmem:[%s1861_s23 + $0x218] sm:$0xff]  ;;  %v1714_v46 = vcombine.low %v261_v34, %v277_v35  ;;  %v1745_v47 = vcombine.high %v292_v41, %v308_v42  ;;  %v231_v51 = vld [vmem:[%s1861_s23 + $0x28] sm:$0xff]  ;;  %v1744_v53 = vcombine.low %v292_v41, %v308_v42  ;;  %v262_v57 = vld [vmem:[%s1861_s23 + $0x120] sm:$0xff] }
  0x1a   : > { %816 = vmatpush1.bf16.msra.mxu0 %v1708_v20  ;;  %857 = vmatpush1.bf16.msra.mxu1 %v1710_v21  ;;  %v309_v44 = vld [vmem:[%s1861_s23 + $0x298] sm:$0xff]  ;;  %v247_v52 = vld [vmem:[%s1861_s23 + $0xa8] sm:$0xff]  ;;  %v1685_v55 = vcombine.high %v230_v49, %v246_v50  ;;  %v278_v58 = vld [vmem:[%s1861_s23 + $0x1a0] sm:$0xff]  ;;  %v1684_v61 = vcombine.low %v230_v49, %v246_v50 }
  0x1b   : > { %817 = vmatprep.subr.bf16.mxu0 %v1741_v22  ;;  %858 = vmatprep.subr.bf16.mxu1 %v1743_v23  ;;  %v1747_v48 = vcombine.high %v293_v43, %v309_v44  ;;  %v1746_v54 = vcombine.low %v293_v43, %v309_v44  ;;  %v1687_v56 = vcombine.high %v231_v51, %v247_v52  ;;  %v263_v59 = vld [vmem:[%s1861_s23 + $0x128] sm:$0xff]  ;;  %v294_v2 = vld [vmem:[%s1861_s23 + $0x220] sm:$0xff]  ;;  %v232_v10 = vld [vmem:[%s1861_s23 + $0x30] sm:$0xff] }
  0x1c   : > { %v279_v60 = vld [vmem:[%s1861_s23 + $0x1a8] sm:$0xff]  ;;  %v1686_v62 = vcombine.low %v231_v51, %v247_v52  ;;  %v1717_v63 = vcombine.high %v262_v57, %v278_v58  ;;  %v310_v3 = vld [vmem:[%s1861_s23 + $0x2a0] sm:$0xff]  ;;  %v1716_v6 = vcombine.low %v262_v57, %v278_v58  ;;  %v248_v11 = vld [vmem:[%s1861_s23 + $0xb0] sm:$0xff] }
  0x1d   : > { %v1719_v1 = vcombine.high %v263_v59, %v279_v60  ;;  %v295_v4 = vld [vmem:[%s1861_s23 + $0x228] sm:$0xff]  ;;  %v1718_v7 = vcombine.low %v263_v59, %v279_v60  ;;  %v1749_v8 = vcombine.high %v294_v2, %v310_v3  ;;  %v233_v12 = vld [vmem:[%s1861_s23 + $0x38] sm:$0xff]  ;;  %v1748_v14 = vcombine.low %v294_v2, %v310_v3  ;;  %v264_v18 = vld [vmem:[%s1861_s23 + $0x130] sm:$0xff] }
  0x1e   : > { %818 = vmatpush1.bf16.msra.mxu0 %v1740_v28  ;;  %859 = vmatpush1.bf16.msra.mxu1 %v1742_v29  ;;  %v311_v5 = vld [vmem:[%s1861_s23 + $0x2a8] sm:$0xff]  ;;  %v249_v13 = vld [vmem:[%s1861_s23 + $0xb8] sm:$0xff]  ;;  %v1689_v16 = vcombine.high %v232_v10, %v248_v11  ;;  %v280_v19 = vld [vmem:[%s1861_s23 + $0x1b0] sm:$0xff]  ;;  %v1688_v22 = vcombine.low %v232_v10, %v248_v11 }
  0x1f   : > { %895 = vmatprep.subr.bf16.mxu0 %v1681_v30  ;;  %936 = vmatprep.subr.bf16.mxu1 %v1683_v31  ;;  %v1751_v9 = vcombine.high %v295_v4, %v311_v5  ;;  %v1750_v15 = vcombine.low %v295_v4, %v311_v5  ;;  %v1691_v17 = vcombine.high %v233_v12, %v249_v13  ;;  %v265_v20 = vld [vmem:[%s1861_s23 + $0x138] sm:$0xff]  ;;  %v296_v26 = vld [vmem:[%s1861_s23 + $0x230] sm:$0xff]  ;;  %v234_v34 = vld [vmem:[%s1861_s23 + $0x40] sm:$0xff] }
  0x20   : > { %v281_v21 = vld [vmem:[%s1861_s23 + $0x1b8] sm:$0xff]  ;;  %v1690_v23 = vcombine.low %v233_v12, %v249_v13  ;;  %v1721_v24 = vcombine.high %v264_v18, %v280_v19  ;;  %v312_v27 = vld [vmem:[%s1861_s23 + $0x2b0] sm:$0xff]  ;;  %v1720_v30 = vcombine.low %v264_v18, %v280_v19  ;;  %v250_v35 = vld [vmem:[%s1861_s23 + $0xc0] sm:$0xff] }
  0x21   : > { %1772 = vmatmul.mubr.msk.bf16.vlgmr.msra.gmra.mrb[0].mxu0 %vm809_vm0, %v1886_v36  ;;  %1773 = vmatmul.mubr.msk.bf16.vlgmr.msra.gmra.mrb[0].mxu1 %vm809_vm0, %v1886_v36  ;;  %v1723_v25 = vcombine.high %v265_v20, %v281_v21  ;;  %v297_v28 = vld [vmem:[%s1861_s23 + $0x238] sm:$0xff]  ;;  %v1722_v31 = vcombine.low %v265_v20, %v281_v21  ;;  %v1753_v32 = vcombine.high %v296_v26, %v312_v27  ;;  %v266_v43 = vld [vmem:[%s1861_s23 + $0x140] sm:$0xff]  ;;  %v236_v59 = vld [vmem:[%s1861_s23 + $0x50] sm:$0xff] }
  0x22   : > { %896 = vmatpush1.bf16.msra.mxu0 %v1680_v37  ;;  %937 = vmatpush1.bf16.msra.mxu1 %v1682_v38  ;;  %v313_v29 = vld [vmem:[%s1861_s23 + $0x2b8] sm:$0xff]  ;;  %v235_v37 = vld [vmem:[%s1861_s23 + $0x48] sm:$0xff]  ;;  %v1693_v41 = vcombine.high %v234_v34, %v250_v35  ;;  %v282_v44 = vld [vmem:[%s1861_s23 + $0x1c0] sm:$0xff] }
  0x23   : > { %897 = vmatprep.subr.bf16.mxu0 %v1713_v39  ;;  %938 = vmatprep.subr.bf16.mxu1 %v1715_v40  ;;  %v1755_v33 = vcombine.high %v297_v28, %v313_v29  ;;  %v251_v38 = vld [vmem:[%s1861_s23 + $0xc8] sm:$0xff]  ;;  %v1752_v39 = vcombine.low %v296_v26, %v312_v27  ;;  %v1754_v40 = vcombine.low %v297_v28, %v313_v29  ;;  %v298_v51 = vld [vmem:[%s1861_s23 + $0x240] sm:$0xff]  ;;  %v252_v60 = vld [vmem:[%s1861_s23 + $0xd0] sm:$0xff] }
  0x24   : > { %927 = vmatprep.mubr.bf16.mxu0 %v1810_v0  ;;  %968 = vmatprep.mubr.bf16.mxu1 %v1810_v0  ;;  %v1695_v42 = vcombine.high %v235_v37, %v251_v38  ;;  %v1725_v49 = vcombine.high %v266_v43, %v282_v44  ;;  %v314_v52 = vld [vmem:[%s1861_s23 + $0x2c0] sm:$0xff]  ;;  %v1697_v2 = vcombine.high %v236_v59, %v252_v60  ;;  %v268_v4 = vld [vmem:[%s1861_s23 + $0x150] sm:$0xff] }
  0x25   : > { %v1757_v57 = vcombine.high %v298_v51, %v314_v52  ;;  %v284_v5 = vld [vmem:[%s1861_s23 + $0x1d0] sm:$0xff]  ;;  %v238_v20 = vld [vmem:[%s1861_s23 + $0x60] sm:$0xff] }
  0x26   : > { %898 = vmatpush1.bf16.msra.mxu0 %v1712_v45  ;;  %939 = vmatpush1.bf16.msra.mxu1 %v1714_v46  ;;  %v267_v45 = vld [vmem:[%s1861_s23 + $0x148] sm:$0xff]  ;;  %v1729_v10 = vcombine.high %v268_v4, %v284_v5  ;;  %v300_v12 = vld [vmem:[%s1861_s23 + $0x250] sm:$0xff]  ;;  %v254_v21 = vld [vmem:[%s1861_s23 + $0xe0] sm:$0xff] }
  0x27   : > { %899 = vmatprep.subr.bf16.mxu0 %v1745_v47  ;;  %940 = vmatprep.subr.bf16.mxu1 %v1747_v48  ;;  %v283_v46 = vld [vmem:[%s1861_s23 + $0x1c8] sm:$0xff]  ;;  %v1692_v47 = vcombine.low %v234_v34, %v250_v35  ;;  %v1694_v48 = vcombine.low %v235_v37, %v251_v38  ;;  %v316_v13 = vld [vmem:[%s1861_s23 + $0x2d0] sm:$0xff]  ;;  %v1701_v26 = vcombine.high %v238_v20, %v254_v21  ;;  %v270_v28 = vld [vmem:[%s1861_s23 + $0x160] sm:$0xff] }
  0x28   : > { %v1727_v50 = vcombine.high %v267_v45, %v283_v46  ;;  %v1761_v18 = vcombine.high %v300_v12, %v316_v13  ;;  %v286_v29 = vld [vmem:[%s1861_s23 + $0x1e0] sm:$0xff] }
  0x29   : > { %v1733_v34 = vcombine.high %v270_v28, %v286_v29  ;;  %v302_v37 = vld [vmem:[%s1861_s23 + $0x260] sm:$0xff] }
  0x2a   : > { %900 = vmatpush1.bf16.msra.mxu0 %v1744_v53  ;;  %941 = vmatpush1.bf16.msra.mxu1 %v1746_v54  ;;  %v299_v53 = vld [vmem:[%s1861_s23 + $0x248] sm:$0xff]  ;;  %v318_v38 = vld [vmem:[%s1861_s23 + $0x2e0] sm:$0xff] }
  0x2b   : > { %977 = vmatprep.subr.bf16.mxu0 %v1685_v55  ;;  %1018 = vmatprep.subr.bf16.mxu1 %v1687_v56  ;;  %v315_v54 = vld [vmem:[%s1861_s23 + $0x2c8] sm:$0xff]  ;;  %v1724_v55 = vcombine.low %v266_v43, %v282_v44  ;;  %v1726_v56 = vcombine.low %v267_v45, %v283_v46  ;;  %v1765_v43 = vcombine.high %v302_v37, %v318_v38  ;;  %v240_v45 = vld [vmem:[%s1861_s23 + $0x70] sm:$0xff] }
  0x2c   : > { %v1759_v58 = vcombine.high %v299_v53, %v315_v54  ;;  %v256_v46 = vld [vmem:[%s1861_s23 + $0xf0] sm:$0xff] }
  0x2d   : > { %1774 = vmatmul.mubr.msk.bf16.vlgmr.msra.gmra.mrb[4].mxu0 %vm809_vm0, %v1886_v36  ;;  %1775 = vmatmul.mubr.msk.bf16.vlgmr.msra.gmra.mrb[4].mxu1 %vm809_vm0, %v1886_v36 }
  0x2e   : > { %978 = vmatpush1.bf16.msra.mxu0 %v1684_v61  ;;  %1019 = vmatpush1.bf16.msra.mxu1 %v1686_v62  ;;  %v237_v61 = vld [vmem:[%s1861_s23 + $0x58] sm:$0xff] }
  0x2f   : > { %979 = vmatprep.subr.bf16.mxu0 %v1717_v63  ;;  %1020 = vmatprep.subr.bf16.mxu1 %v1719_v1  ;;  %v253_v62 = vld [vmem:[%s1861_s23 + $0xd8] sm:$0xff]  ;;  %v1756_v63 = vcombine.low %v298_v51, %v314_v52  ;;  %v1758_v1 = vcombine.low %v299_v53, %v315_v54  ;;  %v1705_v51 = vcombine.high %v240_v45, %v256_v46  ;;  %v272_v53 = vld [vmem:[%s1861_s23 + $0x170] sm:$0xff] }
  0x30   : > { %1009 = vmatprep.mubr.bf16.mxu0 %v1810_v0  ;;  %1050 = vmatprep.mubr.bf16.mxu1 %v1810_v0  ;;  %v1699_v3 = vcombine.high %v237_v61, %v253_v62  ;;  %v288_v54 = vld [vmem:[%s1861_s23 + $0x1f0] sm:$0xff] }
  0x32   : > { %980 = vmatpush1.bf16.msra.mxu0 %v1716_v6  ;;  %1021 = vmatpush1.bf16.msra.mxu1 %v1718_v7  ;;  %v269_v6 = vld [vmem:[%s1861_s23 + $0x158] sm:$0xff] }
  0x33   : > { %981 = vmatprep.subr.bf16.mxu0 %v1749_v8  ;;  %1022 = vmatprep.subr.bf16.mxu1 %v1751_v9  ;;  %v285_v7 = vld [vmem:[%s1861_s23 + $0x1d8] sm:$0xff]  ;;  %v1696_v8 = vcombine.low %v236_v59, %v252_v60  ;;  %v1698_v9 = vcombine.low %v237_v61, %v253_v62  ;;  %v1737_v59 = vcombine.high %v272_v53, %v288_v54  ;;  %v304_v61 = vld [vmem:[%s1861_s23 + $0x270] sm:$0xff] }
  0x34   : > { %v1731_v11 = vcombine.high %v269_v6, %v285_v7  ;;  %v320_v62 = vld [vmem:[%s1861_s23 + $0x2f0] sm:$0xff] }
  0x36   : > { %982 = vmatpush1.bf16.msra.mxu0 %v1748_v14  ;;  %1023 = vmatpush1.bf16.msra.mxu1 %v1750_v15  ;;  %v301_v14 = vld [vmem:[%s1861_s23 + $0x258] sm:$0xff] }
  0x37   : > { %1059 = vmatprep.subr.bf16.mxu0 %v1689_v16  ;;  %1100 = vmatprep.subr.bf16.mxu1 %v1691_v17  ;;  %v317_v15 = vld [vmem:[%s1861_s23 + $0x2d8] sm:$0xff]  ;;  %v1728_v16 = vcombine.low %v268_v4, %v284_v5  ;;  %v1730_v17 = vcombine.low %v269_v6, %v285_v7  ;;  %v1769_v4 = vcombine.high %v304_v61, %v320_v62 }
  0x38   : > { %v1763_v19 = vcombine.high %v301_v14, %v317_v15  ;;  %v1768_v6 = vcombine.low %v304_v61, %v320_v62 }
  0x39   : > { %1776 = vmatmul.mubr.msk.bf16.vlgmr.msra.gmra.mrb[8].mxu0 %vm809_vm0, %v1886_v36  ;;  %1777 = vmatmul.mubr.msk.bf16.vlgmr.msra.gmra.mrb[8].mxu1 %vm809_vm0, %v1886_v36 }
  0x3a   : > { %1060 = vmatpush1.bf16.msra.mxu0 %v1688_v22  ;;  %1101 = vmatpush1.bf16.msra.mxu1 %v1690_v23  ;;  %v239_v22 = vld [vmem:[%s1861_s23 + $0x68] sm:$0xff] }
  0x3b   : > { %1061 = vmatprep.subr.bf16.mxu0 %v1721_v24  ;;  %1102 = vmatprep.subr.bf16.mxu1 %v1723_v25  ;;  %v255_v23 = vld [vmem:[%s1861_s23 + $0xe8] sm:$0xff]  ;;  %v1760_v24 = vcombine.low %v300_v12, %v316_v13  ;;  %v1762_v25 = vcombine.low %v301_v14, %v317_v15 }
  0x3c   : > { %1091 = vmatprep.mubr.bf16.mxu0 %v1810_v0  ;;  %1132 = vmatprep.mubr.bf16.mxu1 %v1810_v0  ;;  %v1703_v27 = vcombine.high %v239_v22, %v255_v23 }
  0x3e   : > { %1062 = vmatpush1.bf16.msra.mxu0 %v1720_v30  ;;  %1103 = vmatpush1.bf16.msra.mxu1 %v1722_v31  ;;  %v271_v30 = vld [vmem:[%s1861_s23 + $0x168] sm:$0xff] }
  0x3f   : > { %1063 = vmatprep.subr.bf16.mxu0 %v1753_v32  ;;  %1104 = vmatprep.subr.bf16.mxu1 %v1755_v33  ;;  %v287_v31 = vld [vmem:[%s1861_s23 + $0x1e8] sm:$0xff]  ;;  %v1700_v32 = vcombine.low %v238_v20, %v254_v21  ;;  %v1702_v33 = vcombine.low %v239_v22, %v255_v23 }
  0x40   : > { %v1735_v35 = vcombine.high %v271_v30, %v287_v31 }
  0x42   : > { %1064 = vmatpush1.bf16.msra.mxu0 %v1752_v39  ;;  %1105 = vmatpush1.bf16.msra.mxu1 %v1754_v40  ;;  %v303_v39 = vld [vmem:[%s1861_s23 + $0x268] sm:$0xff] }
  0x43   : > { %1141 = vmatprep.subr.bf16.mxu0 %v1693_v41  ;;  %1182 = vmatprep.subr.bf16.mxu1 %v1695_v42  ;;  %v319_v40 = vld [vmem:[%s1861_s23 + $0x2e8] sm:$0xff]  ;;  %v1732_v41 = vcombine.low %v270_v28, %v286_v29  ;;  %v1734_v42 = vcombine.low %v271_v30, %v287_v31 }
  0x44   : > { %v1767_v44 = vcombine.high %v303_v39, %v319_v40 }
  0x45   : > { %1778 = vmatmul.mubr.msk.bf16.vlgmr.msra.gmra.mrb[12].mxu0 %vm809_vm0, %v1886_v36  ;;  %1779 = vmatmul.mubr.msk.bf16.vlgmr.msra.gmra.mrb[12].mxu1 %vm809_vm0, %v1886_v36 }
  0x46   : > { %1142 = vmatpush1.bf16.msra.mxu0 %v1692_v47  ;;  %1183 = vmatpush1.bf16.msra.mxu1 %v1694_v48  ;;  %v241_v47 = vld [vmem:[%s1861_s23 + $0x78] sm:$0xff] }
  0x47   : > { %1143 = vmatprep.subr.bf16.mxu0 %v1725_v49  ;;  %1184 = vmatprep.subr.bf16.mxu1 %v1727_v50  ;;  %v257_v48 = vld [vmem:[%s1861_s23 + $0xf8] sm:$0xff]  ;;  %v1764_v49 = vcombine.low %v302_v37, %v318_v38  ;;  %v1766_v50 = vcombine.low %v303_v39, %v319_v40 }
  0x48   : > { %1173 = vmatprep.mubr.bf16.mxu0 %v1810_v0  ;;  %1214 = vmatprep.mubr.bf16.mxu1 %v1810_v0  ;;  %v1707_v52 = vcombine.high %v241_v47, %v257_v48 }
  0x4a   : > { %1144 = vmatpush1.bf16.msra.mxu0 %v1724_v55  ;;  %1185 = vmatpush1.bf16.msra.mxu1 %v1726_v56  ;;  %v273_v55 = vld [vmem:[%s1861_s23 + $0x178] sm:$0xff] }
  0x4b   : > { %1145 = vmatprep.subr.bf16.mxu0 %v1757_v57  ;;  %1186 = vmatprep.subr.bf16.mxu1 %v1759_v58  ;;  %v289_v56 = vld [vmem:[%s1861_s23 + $0x1f8] sm:$0xff]  ;;  %v1704_v57 = vcombine.low %v240_v45, %v256_v46  ;;  %v1706_v58 = vcombine.low %v241_v47, %v257_v48 }
  0x4c   : > { %v1739_v60 = vcombine.high %v273_v55, %v289_v56 }
  0x4e   : > { %1146 = vmatpush1.bf16.msra.mxu0 %v1756_v63  ;;  %1187 = vmatpush1.bf16.msra.mxu1 %v1758_v1  ;;  %v305_v63 = vld [vmem:[%s1861_s23 + $0x278] sm:$0xff] }
  0x4f   : > { %1223 = vmatprep.subr.bf16.mxu0 %v1697_v2  ;;  %1264 = vmatprep.subr.bf16.mxu1 %v1699_v3  ;;  %v321_v1 = vld [vmem:[%s1861_s23 + $0x2f8] sm:$0xff]  ;;  %v1736_v2 = vcombine.low %v272_v53, %v288_v54  ;;  %v1738_v3 = vcombine.low %v273_v55, %v289_v56 }
  0x50   : > { %v1771_v5 = vcombine.high %v305_v63, %v321_v1  ;;  %v1770_v7 = vcombine.low %v305_v63, %v321_v1 }
  0x51   : > { %1780 = vmatmul.mubr.msk.bf16.vlgmr.msra.gmra.mrb[16].mxu0 %vm809_vm0, %v1886_v36  ;;  %1781 = vmatmul.mubr.msk.bf16.vlgmr.msra.gmra.mrb[16].mxu1 %vm809_vm0, %v1886_v36 }
  0x52   : > { %1224 = vmatpush1.bf16.msra.mxu0 %v1696_v8  ;;  %1265 = vmatpush1.bf16.msra.mxu1 %v1698_v9 }
  0x53   : > { %1225 = vmatprep.subr.bf16.mxu0 %v1729_v10  ;;  %1266 = vmatprep.subr.bf16.mxu1 %v1731_v11 }
  0x54   : > { %1255 = vmatprep.mubr.bf16.mxu0 %v1810_v0  ;;  %1296 = vmatprep.mubr.bf16.mxu1 %v1810_v0 }
  0x56   : > { %1226 = vmatpush1.bf16.msra.mxu0 %v1728_v16  ;;  %1267 = vmatpush1.bf16.msra.mxu1 %v1730_v17 }
  0x57   : > { %1227 = vmatprep.subr.bf16.mxu0 %v1761_v18  ;;  %1268 = vmatprep.subr.bf16.mxu1 %v1763_v19 }
  0x5a   : > { %1228 = vmatpush1.bf16.msra.mxu0 %v1760_v24  ;;  %1269 = vmatpush1.bf16.msra.mxu1 %v1762_v25 }
  0x5b   : > { %1305 = vmatprep.subr.bf16.mxu0 %v1701_v26  ;;  %1346 = vmatprep.subr.bf16.mxu1 %v1703_v27 }
  0x5d   : > { %1782 = vmatmul.mubr.msk.bf16.vlgmr.msra.gmra.mrb[20].mxu0 %vm809_vm0, %v1886_v36  ;;  %1783 = vmatmul.mubr.msk.bf16.vlgmr.msra.gmra.mrb[20].mxu1 %vm809_vm0, %v1886_v36 }
  0x5e   : > { %1306 = vmatpush1.bf16.msra.mxu0 %v1700_v32  ;;  %1347 = vmatpush1.bf16.msra.mxu1 %v1702_v33 }
  0x5f   : > { %1307 = vmatprep.subr.bf16.mxu0 %v1733_v34  ;;  %1348 = vmatprep.subr.bf16.mxu1 %v1735_v35 }
  0x60   : > { %1337 = vmatprep.mubr.bf16.mxu0 %v1810_v0  ;;  %1378 = vmatprep.mubr.bf16.mxu1 %v1810_v0 }
  0x62   : > { %1308 = vmatpush1.bf16.msra.mxu0 %v1732_v41  ;;  %1349 = vmatpush1.bf16.msra.mxu1 %v1734_v42 }
  0x63   : > { %1309 = vmatprep.subr.bf16.mxu0 %v1765_v43  ;;  %1350 = vmatprep.subr.bf16.mxu1 %v1767_v44 }
  0x66   : > { %1310 = vmatpush1.bf16.msra.mxu0 %v1764_v49  ;;  %1351 = vmatpush1.bf16.msra.mxu1 %v1766_v50 }
  0x67   : > { %1387 = vmatprep.subr.bf16.mxu0 %v1705_v51  ;;  %1428 = vmatprep.subr.bf16.mxu1 %v1707_v52 }
  0x69   : > { %1784 = vmatmul.mubr.msk.bf16.vlgmr.msra.gmra.mrb[24].mxu0 %vm809_vm0, %v1886_v36  ;;  %1785 = vmatmul.mubr.msk.bf16.vlgmr.msra.gmra.mrb[24].mxu1 %vm809_vm0, %v1886_v36 }
  0x6a   : > { %1388 = vmatpush1.bf16.msra.mxu0 %v1704_v57  ;;  %1429 = vmatpush1.bf16.msra.mxu1 %v1706_v58 }
  0x6b   : > { %1389 = vmatprep.subr.bf16.mxu0 %v1737_v59  ;;  %1430 = vmatprep.subr.bf16.mxu1 %v1739_v60 }
  0x6c   : > { %1419 = vmatprep.mubr.bf16.mxu0 %v1810_v0  ;;  %1460 = vmatprep.mubr.bf16.mxu1 %v1810_v0 }
  0x6e   : > { %1390 = vmatpush1.bf16.msra.mxu0 %v1736_v2  ;;  %1431 = vmatpush1.bf16.msra.mxu1 %v1738_v3 }
  0x6f   : > { %1391 = vmatprep.subr.bf16.mxu0 %v1769_v4  ;;  %1432 = vmatprep.subr.bf16.mxu1 %v1771_v5 }
  0x72   : > { %1392 = vmatpush1.bf16.msra.mxu0 %v1768_v6  ;;  %1433 = vmatpush1.bf16.msra.mxu1 %v1770_v7 }
  0x75   : > { %1786 = vmatmul.mubr.msk.bf16.vlgmr.msra.gmra.mrb[28].mxu0 %vm809_vm0, %v1886_v36  ;;  %1787 = vmatmul.mubr.msk.bf16.vlgmr.msra.gmra.mrb[28].mxu1 %vm809_vm0, %v1886_v36 }
  0x87   : > { %v2010_v8 = vpop.permute.xlu0 %326 }
  0xf4   : > { %v847_v9 = vpop.f32.mrb[0].mxu0  ;;  %v888_v10 = vpop.f32.mrb[0].mxu1 }
  0xf5   : > { %v848_v0 = vadd.f32 %v847_v9, %v2010_v8  ;;  %v849_v11 = vpop.f32.mrb[1].mxu0  ;;  %v889_v12 = vadd.f32 %v888_v10, %v2010_v8  ;;  %v890_v14 = vpop.f32.mrb[1].mxu1 }
  0xf6   : > { %v850_v13 = vadd.f32 %v849_v11, %v2010_v8  ;;  %v851_v15 = vpop.f32.mrb[2].mxu0  ;;  %v891_v17 = vadd.f32 %v890_v14, %v2010_v8  ;;  %v892_v18 = vpop.f32.mrb[2].mxu1 }
  0xf7   : > { %v1469_v16 = vmul.f32 0.2, %v848_v0  ;;  %v852_v19 = vpop.f32.mrb[3].mxu0  ;;  %v1471_v20 = vmul.f32 0.2, %v889_v12  ;;  %v893_v21 = vpop.f32.mrb[3].mxu1 }
  0xf8   : > { %v1470_v36 = vmul.f32 0.2, %v850_v13  ;;  %v1472_v23 = vmul.f32 0.2, %v891_v17 }
  0xf9   : > { %v1501_v22 = vmax.f32 %v848_v0, %v1469_v16  ;;  %v1503_v24 = vmax.f32 %v889_v12, %v1471_v20 }
  0xfa   : > { %v1502_v25 = vmax.f32 %v850_v13, %v1470_v36  ;;  %v1504_v26 = vmax.f32 %v891_v17, %v1472_v23 }
  0xfc   : > { %v1565_v27 = vcombine.low %v1501_v22, %v1502_v25  ;;  %v1566_v28 = vcombine.low %v1503_v24, %v1504_v26 }
  0xfe   : > { %1597 = vst [vmem:[%s2020_s29] sm:$0xff] %v1565_v27  ;;  %1598 = vst [vmem:[%s2020_s29 + $0x8] sm:$0xff] %v1566_v28 }
 0x100   : > { %v929_v29 = vpop.f32.mrb[4].mxu0  ;;  %v970_v31 = vpop.f32.mrb[4].mxu1 }
 0x101   : > { %v930_v30 = vadd.f32 %v929_v29, %v2010_v8  ;;  %v931_v32 = vpop.f32.mrb[5].mxu0  ;;  %v971_v33 = vadd.f32 %v970_v31, %v2010_v8  ;;  %v972_v35 = vpop.f32.mrb[5].mxu1 }
 0x102   : > { %v932_v34 = vadd.f32 %v931_v32, %v2010_v8  ;;  %v933_v37 = vpop.f32.mrb[6].mxu0  ;;  %v973_v39 = vadd.f32 %v972_v35, %v2010_v8  ;;  %v974_v40 = vpop.f32.mrb[6].mxu1 }
 0x103   : > { %v1473_v38 = vmul.f32 0.2, %v930_v30  ;;  %v934_v41 = vpop.f32.mrb[7].mxu0  ;;  %v1475_v42 = vmul.f32 0.2, %v971_v33  ;;  %v975_v44 = vpop.f32.mrb[7].mxu1 }
 0x104   : > { %v1474_v43 = vmul.f32 0.2, %v932_v34  ;;  %v1476_v46 = vmul.f32 0.2, %v973_v39 }
 0x105   : > { %v1505_v45 = vmax.f32 %v930_v30, %v1473_v38  ;;  %v1507_v47 = vmax.f32 %v971_v33, %v1475_v42 }
 0x106   : > { %v1506_v48 = vmax.f32 %v932_v34, %v1474_v43  ;;  %v1508_v49 = vmax.f32 %v973_v39, %v1476_v46 }
 0x108   : > { %v1567_v50 = vcombine.low %v1505_v45, %v1506_v48  ;;  %v1568_v51 = vcombine.low %v1507_v47, %v1508_v49 }
 0x10a   : > { %1599 = vst [vmem:[%s2020_s29 + $0x10] sm:$0xff] %v1567_v50  ;;  %1600 = vst [vmem:[%s2020_s29 + $0x18] sm:$0xff] %v1568_v51 }
 0x10c   : > { %v1011_v52 = vpop.f32.mrb[8].mxu0  ;;  %v1052_v54 = vpop.f32.mrb[8].mxu1 }
 0x10d   : > { %v1012_v53 = vadd.f32 %v1011_v52, %v2010_v8  ;;  %v1013_v55 = vpop.f32.mrb[9].mxu0  ;;  %v1053_v56 = vadd.f32 %v1052_v54, %v2010_v8  ;;  %v1054_v58 = vpop.f32.mrb[9].mxu1 }
 0x10e   : > { %v1014_v57 = vadd.f32 %v1013_v55, %v2010_v8  ;;  %v1015_v59 = vpop.f32.mrb[10].mxu0  ;;  %v1055_v61 = vadd.f32 %v1054_v58, %v2010_v8  ;;  %v1056_v62 = vpop.f32.mrb[10].mxu1 }
 0x10f   : > { %v1477_v60 = vmul.f32 0.2, %v1012_v53  ;;  %v1016_v63 = vpop.f32.mrb[11].mxu0  ;;  %v1479_v1 = vmul.f32 0.2, %v1053_v56  ;;  %v1057_v3 = vpop.f32.mrb[11].mxu1 }
 0x110   : > { %v1478_v2 = vmul.f32 0.2, %v1014_v57  ;;  %v1480_v5 = vmul.f32 0.2, %v1055_v61 }
 0x111   : > { %v1509_v4 = vmax.f32 %v1012_v53, %v1477_v60  ;;  %v1511_v6 = vmax.f32 %v1053_v56, %v1479_v1 }
 0x112   : > { %v1510_v7 = vmax.f32 %v1014_v57, %v1478_v2  ;;  %v1512_v9 = vmax.f32 %v1055_v61, %v1480_v5 }
 0x114   : > { %v1569_v0 = vcombine.low %v1509_v4, %v1510_v7  ;;  %v1570_v10 = vcombine.low %v1511_v6, %v1512_v9 }
 0x116   : > { %1601 = vst [vmem:[%s2020_s29 + $0x20] sm:$0xff] %v1569_v0  ;;  %1602 = vst [vmem:[%s2020_s29 + $0x28] sm:$0xff] %v1570_v10 }
 0x118   : > { %v1093_v11 = vpop.f32.mrb[12].mxu0  ;;  %v1134_v13 = vpop.f32.mrb[12].mxu1 }
 0x119   : > { %v1094_v12 = vadd.f32 %v1093_v11, %v2010_v8  ;;  %v1095_v14 = vpop.f32.mrb[13].mxu0  ;;  %v1135_v15 = vadd.f32 %v1134_v13, %v2010_v8  ;;  %v1136_v17 = vpop.f32.mrb[13].mxu1 }
 0x11a   : > { %v1096_v16 = vadd.f32 %v1095_v14, %v2010_v8  ;;  %v1097_v18 = vpop.f32.mrb[14].mxu0  ;;  %v1137_v20 = vadd.f32 %v1136_v17, %v2010_v8  ;;  %v1138_v36 = vpop.f32.mrb[14].mxu1 }
 0x11b   : > { %v1481_v19 = vmul.f32 0.2, %v1094_v12  ;;  %v1098_v21 = vpop.f32.mrb[15].mxu0  ;;  %v1483_v22 = vmul.f32 0.2, %v1135_v15  ;;  %v1139_v24 = vpop.f32.mrb[15].mxu1 }
 0x11c   : > { %v1482_v23 = vmul.f32 0.2, %v1096_v16  ;;  %v1484_v26 = vmul.f32 0.2, %v1137_v20 }
 0x11d   : > { %v1513_v25 = vmax.f32 %v1094_v12, %v1481_v19  ;;  %v1515_v27 = vmax.f32 %v1135_v15, %v1483_v22 }
 0x11e   : > { %v1514_v28 = vmax.f32 %v1096_v16, %v1482_v23  ;;  %v1516_v29 = vmax.f32 %v1137_v20, %v1484_v26 }
 0x120   : > { %v1571_v30 = vcombine.low %v1513_v25, %v1514_v28  ;;  %v1572_v31 = vcombine.low %v1515_v27, %v1516_v29 }
 0x122   : > { %1603 = vst [vmem:[%s2020_s29 + $0x30] sm:$0xff] %v1571_v30  ;;  %1604 = vst [vmem:[%s2020_s29 + $0x38] sm:$0xff] %v1572_v31 }
 0x124   : > { %v1175_v32 = vpop.f32.mrb[16].mxu0  ;;  %v1216_v34 = vpop.f32.mrb[16].mxu1 }
 0x125   : > { %v1176_v33 = vadd.f32 %v1175_v32, %v2010_v8  ;;  %v1177_v35 = vpop.f32.mrb[17].mxu0  ;;  %v1217_v37 = vadd.f32 %v1216_v34, %v2010_v8  ;;  %v1218_v39 = vpop.f32.mrb[17].mxu1 }
 0x126   : > { %v1178_v38 = vadd.f32 %v1177_v35, %v2010_v8  ;;  %v1179_v40 = vpop.f32.mrb[18].mxu0  ;;  %v1219_v42 = vadd.f32 %v1218_v39, %v2010_v8  ;;  %v1220_v43 = vpop.f32.mrb[18].mxu1 }
 0x127   : > { %v1485_v41 = vmul.f32 0.2, %v1176_v33  ;;  %v1180_v44 = vpop.f32.mrb[19].mxu0  ;;  %v1487_v45 = vmul.f32 0.2, %v1217_v37  ;;  %v1221_v47 = vpop.f32.mrb[19].mxu1 }
 0x128   : > { %v1486_v46 = vmul.f32 0.2, %v1178_v38  ;;  %v1488_v49 = vmul.f32 0.2, %v1219_v42 }
 0x129   : > { %v1517_v48 = vmax.f32 %v1176_v33, %v1485_v41  ;;  %v1519_v50 = vmax.f32 %v1217_v37, %v1487_v45 }
 0x12a   : > { %v1518_v51 = vmax.f32 %v1178_v38, %v1486_v46  ;;  %v1520_v52 = vmax.f32 %v1219_v42, %v1488_v49 }
 0x12c   : > { %v1573_v53 = vcombine.low %v1517_v48, %v1518_v51  ;;  %v1574_v54 = vcombine.low %v1519_v50, %v1520_v52 }
 0x12e   : > { %1605 = vst [vmem:[%s2020_s29 + $0x40] sm:$0xff] %v1573_v53  ;;  %1606 = vst [vmem:[%s2020_s29 + $0x48] sm:$0xff] %v1574_v54 }
 0x130   : > { %v1257_v55 = vpop.f32.mrb[20].mxu0  ;;  %v1298_v57 = vpop.f32.mrb[20].mxu1 }
 0x131   : > { %v1258_v56 = vadd.f32 %v1257_v55, %v2010_v8  ;;  %v1259_v58 = vpop.f32.mrb[21].mxu0  ;;  %v1299_v59 = vadd.f32 %v1298_v57, %v2010_v8  ;;  %v1300_v61 = vpop.f32.mrb[21].mxu1 }
 0x132   : > { %v1260_v60 = vadd.f32 %v1259_v58, %v2010_v8  ;;  %v1261_v62 = vpop.f32.mrb[22].mxu0  ;;  %v1301_v1 = vadd.f32 %v1300_v61, %v2010_v8  ;;  %v1302_v2 = vpop.f32.mrb[22].mxu1 }
 0x133   : > { %v1489_v63 = vmul.f32 0.2, %v1258_v56  ;;  %v1262_v3 = vpop.f32.mrb[23].mxu0  ;;  %v1491_v4 = vmul.f32 0.2, %v1299_v59  ;;  %v1303_v6 = vpop.f32.mrb[23].mxu1 }
 0x134   : > { %v1490_v5 = vmul.f32 0.2, %v1260_v60  ;;  %v1492_v9 = vmul.f32 0.2, %v1301_v1 }
 0x135   : > { %v1521_v7 = vmax.f32 %v1258_v56, %v1489_v63  ;;  %v1523_v0 = vmax.f32 %v1299_v59, %v1491_v4 }
 0x136   : > { %v1522_v10 = vmax.f32 %v1260_v60, %v1490_v5  ;;  %v1524_v11 = vmax.f32 %v1301_v1, %v1492_v9 }
 0x138   : > { %v1575_v12 = vcombine.low %v1521_v7, %v1522_v10  ;;  %v1576_v13 = vcombine.low %v1523_v0, %v1524_v11 }
 0x13a   : > { %1607 = vst [vmem:[%s2020_s29 + $0x50] sm:$0xff] %v1575_v12  ;;  %1608 = vst [vmem:[%s2020_s29 + $0x58] sm:$0xff] %v1576_v13 }
 0x13c   : > { %v1339_v14 = vpop.f32.mrb[24].mxu0  ;;  %v1380_v16 = vpop.f32.mrb[24].mxu1 }
 0x13d   : > { %v1340_v15 = vadd.f32 %v1339_v14, %v2010_v8  ;;  %v1341_v17 = vpop.f32.mrb[25].mxu0  ;;  %v1381_v18 = vadd.f32 %v1380_v16, %v2010_v8  ;;  %v1382_v20 = vpop.f32.mrb[25].mxu1 }
 0x13e   : > { %v1342_v19 = vadd.f32 %v1341_v17, %v2010_v8  ;;  %v1343_v36 = vpop.f32.mrb[26].mxu0  ;;  %v1383_v22 = vadd.f32 %v1382_v20, %v2010_v8  ;;  %v1384_v23 = vpop.f32.mrb[26].mxu1 }
 0x13f   : > { %v1493_v21 = vmul.f32 0.2, %v1340_v15  ;;  %v1344_v24 = vpop.f32.mrb[27].mxu0  ;;  %v1495_v25 = vmul.f32 0.2, %v1381_v18  ;;  %v1385_v27 = vpop.f32.mrb[27].mxu1 }
 0x140   : > { %v1494_v26 = vmul.f32 0.2, %v1342_v19  ;;  %v1496_v29 = vmul.f32 0.2, %v1383_v22 }
 0x141   : > { %v1525_v28 = vmax.f32 %v1340_v15, %v1493_v21  ;;  %v1527_v30 = vmax.f32 %v1381_v18, %v1495_v25 }
 0x142   : > { %v1526_v31 = vmax.f32 %v1342_v19, %v1494_v26  ;;  %v1528_v32 = vmax.f32 %v1383_v22, %v1496_v29 }
 0x144   : > { %v1577_v33 = vcombine.low %v1525_v28, %v1526_v31  ;;  %v1578_v34 = vcombine.low %v1527_v30, %v1528_v32 }
 0x146   : > { %1609 = vst [vmem:[%s2020_s29 + $0x60] sm:$0xff] %v1577_v33  ;;  %1610 = vst [vmem:[%s2020_s29 + $0x68] sm:$0xff] %v1578_v34 }
 0x148   : > { %v1421_v35 = vpop.f32.mrb[28].mxu0  ;;  %v1462_v38 = vpop.f32.mrb[28].mxu1 }
 0x149   : > { %v1422_v37 = vadd.f32 %v1421_v35, %v2010_v8  ;;  %v1423_v39 = vpop.f32.mrb[29].mxu0  ;;  %v1463_v40 = vadd.f32 %v1462_v38, %v2010_v8  ;;  %v1464_v42 = vpop.f32.mrb[29].mxu1 }
 0x14a   : > { %v1424_v41 = vadd.f32 %v1423_v39, %v2010_v8  ;;  %v1425_v43 = vpop.f32.mrb[30].mxu0  ;;  %v1465_v45 = vadd.f32 %v1464_v42, %v2010_v8  ;;  %v1466_v46 = vpop.f32.mrb[30].mxu1 }
 0x14b   : > { %v1497_v44 = vmul.f32 0.2, %v1422_v37  ;;  %v1426_v47 = vpop.f32.mrb[31].mxu0  ;;  %v1499_v48 = vmul.f32 0.2, %v1463_v40  ;;  %v1467_v50 = vpop.f32.mrb[31].mxu1 }
 0x14c   : > { %v1498_v49 = vmul.f32 0.2, %v1424_v41  ;;  %v1500_v52 = vmul.f32 0.2, %v1465_v45 }
 0x14d   : > { %v1529_v51 = vmax.f32 %v1422_v37, %v1497_v44  ;;  %v1531_v53 = vmax.f32 %v1463_v40, %v1499_v48 }
 0x14e   : > { %v1530_v54 = vmax.f32 %v1424_v41, %v1498_v49  ;;  %v1532_v55 = vmax.f32 %v1465_v45, %v1500_v52 }
 0x150   : > { %v1579_v56 = vcombine.low %v1529_v51, %v1530_v54  ;;  %v1580_v57 = vcombine.low %v1531_v53, %v1532_v55 }
 0x152   : > { %1611 = vst [vmem:[%s2020_s29 + $0x70] sm:$0xff] %v1579_v56  ;;  %1612 = vst [vmem:[%s2020_s29 + $0x78] sm:$0xff] %v1580_v57 }
 0x153 PF: > { %s15_s18 = sadd.s32 1, %s1808_s18  }
 0x154   : > { %p12_p4 = scmp.ge.s32.totalorder %s15_s18, 4  }
 0x156   :  { %14 = sbr.rel (!%p12_p4) target bundleno = 1 (0x1), region = 70 }

// kernel: _lambda_.7
= control target key start
LH: loop header
LB: loop body
LE: loop exit
PB: predicated region body
PF: predicated region fallthrough
CT: control target
= control target key end

     0   :  { %s848_s18 = smov 0   ;;  %s925_s0 = inlined_call_operand.vmem [shape: bf16[2,64,1024], index: 0, kind: input, shape index: {}]   ;;  %s926_s1 = inlined_call_operand.vmem [shape: bf16[8,64], index: 1, kind: input, shape index: {}]   ;;  %s927_s2 = inlined_call_operand.vmem [shape: f32[8,1], index: 2, kind: input, shape index: {}]   ;;  %s928_s3 = inlined_call_operand.vmem [shape: f32[8,1], index: 3, kind: input, shape index: {}]   ;;  %s929_s4 = inlined_call_operand.vmem [shape: f32[8,1], index: 4, kind: input, shape index: {}]   ;;  %s930_s5 = inlined_call_operand.vmem [shape: f32[2,8,1024], index: 5, kind: output, shape index: {}]  }
   0x1 LB: > { %s747_s19 = sadd.s32 4294967295, %s815_s18   ;;  %p751_p0 = scmp.ge.s32.totalorder %s815_s18, 1  ;;  %s815_s18 = sphi %s848_s18, %s15_s18  }
   0x2   : > { %p187_p1 = scmp.lt.s32.totalorder %s815_s18, 3 }
   0x4   : > { %p188_p2 = pnand %p751_p0, %p187_p1 }
   0x5   : > { %p215_p3 = scmp.lt.s32.totalorder (!%p188_p2), %s747_s19, 1  ;;  %v259_v0 = vld [vmem:[%s927_s2] sm:$0xff] (!%p188_p2)  ;;  %v817_v1 = vmov (!%p188_p2), 0   ;;  %vm425_vm0 = vcmask (!%p188_p2), 523264  }
   0x6   : > { %191 = sbr.rel (%p188_p2) target bundleno = 607 (0x25f), region = 40  ;;  %461 = vmatprep.mubr.bf16.mxu0 (!%p188_p2), %v817_v1  ;;  %502 = vmatprep.mubr.bf16.mxu1 (!%p188_p2), %v817_v1  ;;  %v258_v44 = vld [vmem:[%s926_s1] sm:$0xf] (!%p188_p2) }
   0x7   : > { %805 = vset.pattern.permute.xlu0 (!%p188_p2), %v817_v1  ;;  %806 = vset.pattern.permute.xlu1 (!%p188_p2), %v817_v1 }
   0x8   : > { %262 = vperm.xlu0 (!%p188_p2), %805, %v259_v0  }
   0xd   : > { %s932_s19 = smov (!%p215_p3, %s747_s19), 1 }
   0xe   : > { %s794_s22 = sshll.u32 %s932_s19, 8  ;;  %s795_s7 = sshll.u32 %s932_s19, 6 }
   0xf   : > { %s869_s25 = scalar_lea.vmem %s925_s0, %s794_s22  ;;  %s224_s10 = scalar_lea.vmem %s930_s5, %s795_s7 }
  0x10   : > { %v226_v2 = vld [vmem:[%s869_s25] sm:$0xff]  ;;  %v227_v4 = vld [vmem:[%s869_s25 + $0x8] sm:$0xff]  ;;  %v228_v32 = vld [vmem:[%s869_s25 + $0x10] sm:$0xff] }
  0x11   : > { %v230_v3 = vld [vmem:[%s869_s25 + $0x20] sm:$0xff]  ;;  %v231_v6 = vld [vmem:[%s869_s25 + $0x28] sm:$0xff]  ;;  %v232_v33 = vld [vmem:[%s869_s25 + $0x30] sm:$0xff] }
  0x12   : > { %v757_v5 = vcombine.high %v226_v2, %v230_v3  ;;  %v756_v7 = vcombine.low %v226_v2, %v230_v3  ;;  %v234_v8 = vld [vmem:[%s869_s25 + $0x40] sm:$0xff]  ;;  %v759_v10 = vcombine.high %v227_v4, %v231_v6  ;;  %v758_v11 = vcombine.low %v227_v4, %v231_v6  ;;  %v235_v13 = vld [vmem:[%s869_s25 + $0x48] sm:$0xff]  ;;  %v229_v34 = vld [vmem:[%s869_s25 + $0x18] sm:$0xff] }
  0x13   : > { %v238_v9 = vld [vmem:[%s869_s25 + $0x60] sm:$0xff]  ;;  %v239_v14 = vld [vmem:[%s869_s25 + $0x68] sm:$0xff]  ;;  %v233_v35 = vld [vmem:[%s869_s25 + $0x38] sm:$0xff]  ;;  %v761_v38 = vcombine.high %v228_v32, %v232_v33  ;;  %v760_v45 = vcombine.low %v228_v32, %v232_v33 }
  0x14   : > { %v765_v12 = vcombine.high %v234_v8, %v238_v9  ;;  %v242_v15 = vld [vmem:[%s869_s25 + $0x80] sm:$0xff]  ;;  %429 = vmatprep.subr.bf16.mxu0 %v757_v5  ;;  %v767_v16 = vcombine.high %v235_v13, %v239_v14  ;;  %v243_v18 = vld [vmem:[%s869_s25 + $0x88] sm:$0xff]  ;;  %470 = vmatprep.subr.bf16.mxu1 %v759_v10  ;;  %v764_v20 = vcombine.low %v234_v8, %v238_v9  ;;  %v236_v40 = vld [vmem:[%s869_s25 + $0x50] sm:$0xff] }
  0x15   : > { %v246_v17 = vld [vmem:[%s869_s25 + $0xa0] sm:$0xff]  ;;  %v247_v19 = vld [vmem:[%s869_s25 + $0xa8] sm:$0xff]  ;;  %430 = vmatpush1.bf16.msra.mxu0 %v756_v7  ;;  %471 = vmatpush1.bf16.msra.mxu1 %v758_v11  ;;  %v766_v21 = vcombine.low %v235_v13, %v239_v14  ;;  %v763_v39 = vcombine.high %v229_v34, %v233_v35  ;;  %v240_v41 = vld [vmem:[%s869_s25 + $0x70] sm:$0xff]  ;;  %v762_v46 = vcombine.low %v229_v34, %v233_v35 }
  0x16   : > { %431 = vmatprep.subr.bf16.mxu0 %v765_v12  ;;  %v773_v22 = vcombine.high %v242_v15, %v246_v17  ;;  %472 = vmatprep.subr.bf16.mxu1 %v767_v16  ;;  %v775_v23 = vcombine.high %v243_v18, %v247_v19  ;;  %v250_v24 = vld [vmem:[%s869_s25 + $0xc0] sm:$0xff]  ;;  %v251_v26 = vld [vmem:[%s869_s25 + $0xc8] sm:$0xff]  ;;  %v772_v28 = vcombine.low %v242_v15, %v246_v17  ;;  %v237_v42 = vld [vmem:[%s869_s25 + $0x58] sm:$0xff] }
  0x17   : > { %v254_v25 = vld [vmem:[%s869_s25 + $0xe0] sm:$0xff]  ;;  %v255_v27 = vld [vmem:[%s869_s25 + $0xe8] sm:$0xff]  ;;  %v774_v29 = vcombine.low %v243_v18, %v247_v19  ;;  %v241_v43 = vld [vmem:[%s869_s25 + $0x78] sm:$0xff]  ;;  %v769_v47 = vcombine.high %v236_v40, %v240_v41  ;;  %v768_v53 = vcombine.low %v236_v40, %v240_v41 }
  0x18   : > { %v781_v30 = vcombine.high %v250_v24, %v254_v25  ;;  %v783_v31 = vcombine.high %v251_v26, %v255_v27  ;;  %v780_v36 = vcombine.low %v250_v24, %v254_v25  ;;  %v782_v37 = vcombine.low %v251_v26, %v255_v27  ;;  %v244_v49 = vld [vmem:[%s869_s25 + $0x90] sm:$0xff]  ;;  %v245_v51 = vld [vmem:[%s869_s25 + $0x98] sm:$0xff] }
  0x19   : > { %432 = vmatpush1.bf16.msra.mxu0 %v764_v20  ;;  %473 = vmatpush1.bf16.msra.mxu1 %v766_v21  ;;  %v771_v48 = vcombine.high %v237_v42, %v241_v43  ;;  %v248_v50 = vld [vmem:[%s869_s25 + $0xb0] sm:$0xff]  ;;  %v249_v52 = vld [vmem:[%s869_s25 + $0xb8] sm:$0xff]  ;;  %v770_v54 = vcombine.low %v237_v42, %v241_v43 }
  0x1a   : > { %433 = vmatprep.subr.bf16.mxu0 %v773_v22  ;;  %474 = vmatprep.subr.bf16.mxu1 %v775_v23  ;;  %v777_v55 = vcombine.high %v244_v49, %v248_v50  ;;  %v779_v56 = vcombine.high %v245_v51, %v249_v52  ;;  %v252_v57 = vld [vmem:[%s869_s25 + $0xd0] sm:$0xff]  ;;  %v253_v59 = vld [vmem:[%s869_s25 + $0xd8] sm:$0xff]  ;;  %v776_v61 = vcombine.low %v244_v49, %v248_v50 }
  0x1b   : > { %v256_v58 = vld [vmem:[%s869_s25 + $0xf0] sm:$0xff]  ;;  %v257_v60 = vld [vmem:[%s869_s25 + $0xf8] sm:$0xff]  ;;  %v778_v62 = vcombine.low %v245_v51, %v249_v52 }
  0x1c   : > { %v785_v63 = vcombine.high %v252_v57, %v256_v58  ;;  %v787_v0 = vcombine.high %v253_v59, %v257_v60  ;;  %v784_v2 = vcombine.low %v252_v57, %v256_v58  ;;  %v786_v3 = vcombine.low %v253_v59, %v257_v60 }
  0x1d   : > { %434 = vmatpush1.bf16.msra.mxu0 %v772_v28  ;;  %475 = vmatpush1.bf16.msra.mxu1 %v774_v29 }
  0x1e   : > { %435 = vmatprep.subr.bf16.mxu0 %v781_v30  ;;  %476 = vmatprep.subr.bf16.mxu1 %v783_v31 }
  0x21   : > { %436 = vmatpush1.bf16.msra.mxu0 %v780_v36  ;;  %477 = vmatpush1.bf16.msra.mxu1 %v782_v37 }
  0x22   : > { %511 = vmatprep.subr.bf16.mxu0 %v761_v38  ;;  %552 = vmatprep.subr.bf16.mxu1 %v763_v39 }
  0x24   : > { %788 = vmatmul.mubr.msk.bf16.vlgmr.msra.gmra.mrb[0].mxu0 %vm425_vm0, %v258_v44  ;;  %789 = vmatmul.mubr.msk.bf16.vlgmr.msra.gmra.mrb[0].mxu1 %vm425_vm0, %v258_v44 }
  0x25   : > { %512 = vmatpush1.bf16.msra.mxu0 %v760_v45  ;;  %553 = vmatpush1.bf16.msra.mxu1 %v762_v46 }
  0x26   : > { %513 = vmatprep.subr.bf16.mxu0 %v769_v47  ;;  %554 = vmatprep.subr.bf16.mxu1 %v771_v48 }
  0x27   : > { %543 = vmatprep.mubr.bf16.mxu0 %v817_v1  ;;  %584 = vmatprep.mubr.bf16.mxu1 %v817_v1  ;;  %v640_v1 = vld [vmem:[%s928_s3] sm:$0xff] }
  0x28   : > { %643 = vperm.xlu1 %806, %v640_v1  }
  0x29   : > { %514 = vmatpush1.bf16.msra.mxu0 %v768_v53  ;;  %555 = vmatpush1.bf16.msra.mxu1 %v770_v54 }
  0x2a   : > { %515 = vmatprep.subr.bf16.mxu0 %v777_v55  ;;  %556 = vmatprep.subr.bf16.mxu1 %v779_v56 }
  0x2d   : > { %516 = vmatpush1.bf16.msra.mxu0 %v776_v61  ;;  %557 = vmatpush1.bf16.msra.mxu1 %v778_v62  ;;  %v654_v61 = vld [vmem:[%s929_s4] sm:$0xff] }
  0x2e   : > { %517 = vmatprep.subr.bf16.mxu0 %v785_v63  ;;  %558 = vmatprep.subr.bf16.mxu1 %v787_v0 }
  0x31   : > { %518 = vmatpush1.bf16.msra.mxu0 %v784_v2  ;;  %559 = vmatpush1.bf16.msra.mxu1 %v786_v3 }
  0x34   : > { %790 = vmatmul.mubr.msk.bf16.vlgmr.msra.gmra.mrb[4].mxu0 %vm425_vm0, %v258_v44  ;;  %791 = vmatmul.mubr.msk.bf16.vlgmr.msra.gmra.mrb[4].mxu1 %vm425_vm0, %v258_v44 }
  0x87   : > { %v263_v5 = vpop.permute.xlu0 %262 }
  0xa7   : > { %v644_v62 = vpop.permute.xlu1 %643 }
  0xf7   : > { %v463_v4 = vpop.f32.mrb[0].mxu0  ;;  %v504_v7 = vpop.f32.mrb[0].mxu1 }
  0xf8   : > { %v465_v6 = vpop.f32.mrb[1].mxu0  ;;  %v506_v9 = vpop.f32.mrb[1].mxu1  ;;  %v464_v13 = vadd.f32 %v463_v4, %v263_v5  ;;  %v505_v16 = vadd.f32 %v504_v7, %v263_v5 }
  0xf9   : > { %v467_v8 = vpop.f32.mrb[2].mxu0  ;;  %v508_v11 = vpop.f32.mrb[2].mxu1  ;;  %v466_v14 = vadd.f32 %v465_v6, %v263_v5  ;;  %v507_v18 = vadd.f32 %v506_v9, %v263_v5 }
  0xfa   : > { %v468_v10 = vpop.f32.mrb[3].mxu0  ;;  %v509_v12 = vpop.f32.mrb[3].mxu1 }
  0xfb   : > { %v593_v15 = vadd.f32 %v466_v14, %v464_v13 }
  0xfd   : > { %v594_v17 = vadd.f32 %v593_v15, %v505_v16 }
  0xff   : > { %v595_v20 = vadd.f32 %v594_v17, %v507_v18 }
 0x107   : > { %v545_v19 = vpop.f32.mrb[4].mxu0  ;;  %v586_v22 = vpop.f32.mrb[4].mxu1 }
 0x108   : > { %v546_v21 = vadd.f32 %v545_v19, %v263_v5  ;;  %v547_v23 = vpop.f32.mrb[5].mxu0  ;;  %v588_v25 = vpop.f32.mrb[5].mxu1  ;;  %v587_v31 = vadd.f32 %v586_v22, %v263_v5 }
 0x109   : > { %v548_v24 = vadd.f32 %v547_v23, %v263_v5  ;;  %v549_v26 = vpop.f32.mrb[6].mxu0  ;;  %v590_v29 = vpop.f32.mrb[6].mxu1  ;;  %v589_v33 = vadd.f32 %v588_v25, %v263_v5 }
 0x10a   : > { %v596_v27 = vadd.f32 %v595_v20, %v546_v21  ;;  %v550_v28 = vpop.f32.mrb[7].mxu0  ;;  %v591_v30 = vpop.f32.mrb[7].mxu1 }
 0x10c   : > { %v597_v32 = vadd.f32 %v596_v27, %v548_v24 }
 0x10e   : > { %v598_v34 = vadd.f32 %v597_v32, %v587_v31 }
 0x110   : > { %v599_v35 = vadd.f32 %v598_v34, %v589_v33 }
 0x112   : > { %600 = vadd.xlane.f32.xlu0 %v599_v35 }
 0x19f   : > { %v601_v36 = vpop.xlane.xlu0 %600 }
 0x1a0   : > { %v603_v37 = vmul.f32 0.0009765625, %v601_v36 }
 0x1a2   : > { %v604_v38 = vsub.f32 %v464_v13, %v603_v37  ;;  %v605_v39 = vsub.f32 %v466_v14, %v603_v37  ;;  %v606_v40 = vsub.f32 %v505_v16, %v603_v37  ;;  %v607_v41 = vsub.f32 %v507_v18, %v603_v37 }
 0x1a3   : > { %v608_v44 = vsub.f32 %v546_v21, %v603_v37  ;;  %v609_v47 = vsub.f32 %v548_v24, %v603_v37  ;;  %v610_v50 = vsub.f32 %v587_v31, %v603_v37  ;;  %v611_v53 = vsub.f32 %v589_v33, %v603_v37 }
 0x1a4   : > { %v612_v42 = vmul.f32 %v604_v38, %v604_v38  ;;  %v613_v43 = vmul.f32 %v605_v39, %v605_v39  ;;  %v614_v45 = vmul.f32 %v606_v40, %v606_v40  ;;  %v615_v48 = vmul.f32 %v607_v41, %v607_v41 }
 0x1a5   : > { %v616_v51 = vmul.f32 %v608_v44, %v608_v44  ;;  %v617_v54 = vmul.f32 %v609_v47, %v609_v47  ;;  %v618_v56 = vmul.f32 %v610_v50, %v610_v50  ;;  %v619_v58 = vmul.f32 %v611_v53, %v611_v53 }
 0x1a6   : > { %v620_v46 = vadd.f32 %v613_v43, %v612_v42 }
 0x1a8   : > { %v621_v49 = vadd.f32 %v620_v46, %v614_v45 }
 0x1aa   : > { %v622_v52 = vadd.f32 %v621_v49, %v615_v48 }
 0x1ac   : > { %v623_v55 = vadd.f32 %v622_v52, %v616_v51 }
 0x1ae   : > { %v624_v57 = vadd.f32 %v623_v55, %v617_v54 }
 0x1b0   : > { %v625_v59 = vadd.f32 %v624_v57, %v618_v56 }
 0x1b2   : > { %v626_v60 = vadd.f32 %v625_v59, %v619_v58 }
 0x1b4   : > { %627 = vadd.xlane.f32.xlu1 %v626_v60 }
 0x1c5   : > { %657 = vperm.xlu1 %806, %v654_v61  }
 0x241   : > { %v628_v63 = vpop.xlane.xlu1 %627 }
 0x242   : > { %v629_v0 = vmul.f32 0.0009765625, %v628_v63 }
 0x244   : > { %v630_v2 = vadd.f32 1e-05, %v629_v0 }
 0x245   : > { %v658_v19 = vpop.permute.xlu1 %657 }
 0x246   : > { %807 = vrsqrt.f32 %v630_v2 }
 0x250   : > { %v808_v3 = vpop.eup %807 }
 0x251   : > { %v632_v1 = vmul.f32 %v808_v3, %v604_v38  ;;  %v633_v4 = vmul.f32 %v808_v3, %v605_v39  ;;  %v634_v5 = vmul.f32 %v808_v3, %v606_v40  ;;  %v635_v6 = vmul.f32 %v808_v3, %v607_v41 }
 0x252   : > { %v636_v7 = vmul.f32 %v808_v3, %v608_v44  ;;  %v637_v8 = vmul.f32 %v808_v3, %v609_v47  ;;  %v638_v9 = vmul.f32 %v808_v3, %v610_v50  ;;  %v639_v10 = vmul.f32 %v808_v3, %v611_v53 }
 0x253   : > { %v646_v11 = vmul.f32 %v644_v62, %v632_v1  ;;  %v647_v12 = vmul.f32 %v644_v62, %v633_v4  ;;  %v648_v13 = vmul.f32 %v644_v62, %v634_v5  ;;  %v649_v14 = vmul.f32 %v644_v62, %v635_v6 }
 0x254   : > { %v650_v15 = vmul.f32 %v644_v62, %v636_v7  ;;  %v651_v16 = vmul.f32 %v644_v62, %v637_v8  ;;  %v652_v17 = vmul.f32 %v644_v62, %v638_v9  ;;  %v653_v18 = vmul.f32 %v644_v62, %v639_v10 }
 0x255   : > { %v660_v20 = vadd.f32 %v658_v19, %v646_v11  ;;  %v661_v21 = vadd.f32 %v658_v19, %v647_v12  ;;  %v662_v22 = vadd.f32 %v658_v19, %v648_v13  ;;  %v663_v23 = vadd.f32 %v658_v19, %v649_v14 }
 0x256   : > { %v664_v24 = vadd.f32 %v658_v19, %v650_v15  ;;  %v665_v25 = vadd.f32 %v658_v19, %v651_v16  ;;  %v666_v26 = vadd.f32 %v658_v19, %v652_v17  ;;  %v667_v27 = vadd.f32 %v658_v19, %v653_v18 }
 0x257   : > { %v668_v28 = vmul.f32 0.2, %v660_v20  ;;  %v669_v29 = vmul.f32 0.2, %v661_v21  ;;  %v670_v30 = vmul.f32 0.2, %v662_v22 }
 0x258   : > { %v671_v31 = vmul.f32 0.2, %v663_v23  ;;  %v672_v32 = vmul.f32 0.2, %v664_v24  ;;  %v673_v33 = vmul.f32 0.2, %v665_v25 }
 0x259   : > { %v674_v34 = vmul.f32 0.2, %v666_v26  ;;  %v675_v35 = vmul.f32 0.2, %v667_v27  ;;  %v676_v36 = vmax.f32 %v660_v20, %v668_v28  ;;  %v677_v37 = vmax.f32 %v661_v21, %v669_v29 }
 0x25a   : > { %v678_v38 = vmax.f32 %v662_v22, %v670_v30  ;;  %v679_v39 = vmax.f32 %v663_v23, %v671_v31  ;;  %v680_v40 = vmax.f32 %v664_v24, %v672_v32  ;;  %v681_v41 = vmax.f32 %v665_v25, %v673_v33 }
 0x25b   : > { %v682_v42 = vmax.f32 %v666_v26, %v674_v34  ;;  %v683_v43 = vmax.f32 %v667_v27, %v675_v35  ;;  %684 = vst [vmem:[%s224_s10] sm:$0xff] %v676_v36  ;;  %685 = vst [vmem:[%s224_s10 + $0x8] sm:$0xff] %v677_v37 }
 0x25c   : > { %686 = vst [vmem:[%s224_s10 + $0x10] sm:$0xff] %v678_v38  ;;  %687 = vst [vmem:[%s224_s10 + $0x18] sm:$0xff] %v679_v39 }
 0x25d   : > { %688 = vst [vmem:[%s224_s10 + $0x20] sm:$0xff] %v680_v40  ;;  %689 = vst [vmem:[%s224_s10 + $0x28] sm:$0xff] %v681_v41 }
 0x25e   : > { %690 = vst [vmem:[%s224_s10 + $0x30] sm:$0xff] %v682_v42  ;;  %691 = vst [vmem:[%s224_s10 + $0x38] sm:$0xff] %v683_v43 }
 0x25f PF: > { %s15_s18 = sadd.s32 1, %s815_s18  }
 0x260   : > { %p12_p4 = scmp.ge.s32.totalorder %s15_s18, 4  }
 0x262   :  { %14 = sbr.rel (!%p12_p4) target bundleno = 1 (0x1), region = 70 }

// kernel: _lambda_.8
= control target key start
LH: loop header
LB: loop body
LE: loop exit
PB: predicated region body
PF: predicated region fallthrough
CT: control target
= control target key end

     0   :  { %s626_s18 = smov 0   ;;  %s686_s0 = inlined_call_operand.vmem [shape: bf16[2,128,256], index: 0, kind: input, shape index: {}]   ;;  %s687_s1 = inlined_call_operand.vmem [shape: bf16[16,128], index: 1, kind: input, shape index: {}]   ;;  %s688_s2 = inlined_call_operand.vmem [shape: f32[16,1], index: 2, kind: input, shape index: {}]   ;;  %s689_s3 = inlined_call_operand.vmem [shape: f32[16,1], index: 3, kind: input, shape index: {}]   ;;  %s690_s4 = inlined_call_operand.vmem [shape: f32[16,1], index: 4, kind: input, shape index: {}]   ;;  %s691_s5 = inlined_call_operand.vmem [shape: f32[2,16,256], index: 5, kind: output, shape index: {}]  }
   0x1 LB: > { %s517_s19 = sadd.s32 4294967295, %s593_s18   ;;  %p521_p0 = scmp.ge.s32.totalorder %s593_s18, 1  ;;  %s593_s18 = sphi %s626_s18, %s15_s18  }
   0x2   : > { %p187_p1 = scmp.lt.s32.totalorder %s593_s18, 3 }
   0x4   : > { %p188_p2 = pnand %p521_p0, %p187_p1 }
   0x5   : > { %p215_p3 = scmp.lt.s32.totalorder (!%p188_p2), %s517_s19, 1  ;;  %v595_v0 = vmov (!%p188_p2), 0   ;;  %v244_v1 = vld [vmem:[%s688_s2] sm:$0xff] (!%p188_p2)  ;;  %v245_v2 = vld [vmem:[%s688_s2 + $0x8] sm:$0xff] (!%p188_p2) }
   0x6   : > { %191 = sbr.rel (%p188_p2) target bundleno = 588 (0x24c), region = 40  ;;  %374 = vmatprep.mubr.bf16.mxu0 (!%p188_p2), %v595_v0  ;;  %556 = vset.pattern.permute.xlu0 (!%p188_p2), %v595_v0  ;;  %v582_v19 = vld [vmem:[%s687_s1] sm:$0xff] (!%p188_p2)   ;;  %v419_v33 = vld [vmem:[%s689_s3 + $0x8] sm:$0xff] (!%p188_p2) }
   0x7   : > { %248 = vperm.xlu0 (!%p188_p2), %556, %v244_v1   ;;  %557 = vset.pattern.permute.xlu1 (!%p188_p2), %v595_v0  ;;  %v418_v32 = vld [vmem:[%s689_s3] sm:$0xff] (!%p188_p2)  ;;  %v435_v49 = vld [vmem:[%s690_s4 + $0x8] sm:$0xff] (!%p188_p2) }
   0x8   : > { %v434_v34 = vld [vmem:[%s690_s4] sm:$0xff] (!%p188_p2) }
   0xb   : > { %253 = vperm.xlu0 (!%p188_p2), %556, %v245_v2  }
   0xd   : > { %s693_s19 = smov (!%p215_p3, %s517_s19), 1 }
   0xe   : > { %s545_s24 = sshll.u32 %s693_s19, 7  ;;  %s546_s13 = sshll.u32 %s693_s19, 5 }
   0xf   : > { %s646_s27 = scalar_lea.vmem %s686_s0, %s545_s24  ;;  %s224_s16 = scalar_lea.vmem %s691_s5, %s546_s13 }
  0x10   : > { %v558_v3 = vld [vmem:[%s646_s27 + $0x4] ss:$8 sps:$4 sm:$0xff]   ;;  %v560_v4 = vld [vmem:[%s646_s27] ss:$8 sps:$4 sm:$0xff]   ;;  %v561_v5 = vld [vmem:[%s646_s27 + $0x14] ss:$8 sps:$4 sm:$0xff]  }
  0x11   : > { %342 = vmatprep.subr.bf16.mxu0 %v558_v3  ;;  %v563_v6 = vld [vmem:[%s646_s27 + $0x10] ss:$8 sps:$4 sm:$0xff]   ;;  %v564_v7 = vld [vmem:[%s646_s27 + $0x24] ss:$8 sps:$4 sm:$0xff]   ;;  %v566_v8 = vld [vmem:[%s646_s27 + $0x20] ss:$8 sps:$4 sm:$0xff]  }
  0x12   : > { %343 = vmatpush1.bf16.msra.mxu0 %v560_v4  ;;  %v567_v9 = vld [vmem:[%s646_s27 + $0x34] ss:$8 sps:$4 sm:$0xff]   ;;  %v569_v10 = vld [vmem:[%s646_s27 + $0x30] ss:$8 sps:$4 sm:$0xff]   ;;  %v570_v11 = vld [vmem:[%s646_s27 + $0x44] ss:$8 sps:$4 sm:$0xff]  }
  0x13   : > { %344 = vmatprep.subr.bf16.mxu0 %v561_v5  ;;  %v572_v12 = vld [vmem:[%s646_s27 + $0x40] ss:$8 sps:$4 sm:$0xff]   ;;  %v573_v13 = vld [vmem:[%s646_s27 + $0x54] ss:$8 sps:$4 sm:$0xff]   ;;  %v575_v14 = vld [vmem:[%s646_s27 + $0x50] ss:$8 sps:$4 sm:$0xff]  }
  0x14   : > { %v576_v15 = vld [vmem:[%s646_s27 + $0x64] ss:$8 sps:$4 sm:$0xff]   ;;  %v578_v16 = vld [vmem:[%s646_s27 + $0x60] ss:$8 sps:$4 sm:$0xff]   ;;  %v579_v17 = vld [vmem:[%s646_s27 + $0x74] ss:$8 sps:$4 sm:$0xff]  }
  0x15   : > { %v581_v18 = vld [vmem:[%s646_s27 + $0x70] ss:$8 sps:$4 sm:$0xff]  }
  0x16   : > { %345 = vmatpush1.bf16.msra.mxu0 %v563_v6 }
  0x17   : > { %346 = vmatprep.subr.bf16.mxu0 %v564_v7 }
  0x1a   : > { %347 = vmatpush1.bf16.msra.mxu0 %v566_v8 }
  0x1b   : > { %348 = vmatprep.subr.bf16.mxu0 %v567_v9 }
  0x1e   : > { %349 = vmatpush1.bf16.msra.mxu0 %v569_v10 }
  0x1f   : > { %350 = vmatprep.subr.bf16.mxu0 %v570_v11 }
  0x22   : > { %351 = vmatpush1.bf16.msra.mxu0 %v572_v12 }
  0x23   : > { %352 = vmatprep.subr.bf16.mxu0 %v573_v13 }
  0x26   : > { %353 = vmatpush1.bf16.msra.mxu0 %v575_v14 }
  0x27   : > { %354 = vmatprep.subr.bf16.mxu0 %v576_v15 }
  0x2a   : > { %355 = vmatpush1.bf16.msra.mxu0 %v578_v16 }
  0x2b   : > { %356 = vmatprep.subr.bf16.mxu0 %v579_v17 }
  0x2e   : > { %357 = vmatpush1.bf16.msra.mxu0 %v581_v18 }
  0x31   : > { %375 = vmatmul.mubr.bf16.vlgmr.msra.gmra.mrb[0].mxu0 %v582_v19 }
  0x86   : > { %v249_v20 = vpop.permute.xlu0 %248 }
  0x8a   : > { %v254_v23 = vpop.permute.xlu0 %253 }
 0x104   : > { %v376_v21 = vpop.f32.mrb[0].mxu0 }
 0x105   : > { %v377_v22 = vadd.f32 %v376_v21, %v249_v20  ;;  %v378_v24 = vpop.f32.mrb[1].mxu0 }
 0x106   : > { %v379_v25 = vadd.f32 %v378_v24, %v249_v20  ;;  %v380_v26 = vpop.f32.mrb[2].mxu0 }
 0x107   : > { %v382_v27 = vpop.f32.mrb[3].mxu0  ;;  %v381_v28 = vadd.f32 %v380_v26, %v254_v23 }
 0x108   : > { %v383_v29 = vadd.f32 %v382_v27, %v254_v23  ;;  %v385_v30 = vadd.f32 %v379_v25, %v377_v22 }
 0x10a   : > { %386 = vadd.xlane.f32.xlu1 %v385_v30  ;;  %v388_v31 = vadd.f32 %v383_v29, %v381_v28 }
 0x10e   : > { %389 = vadd.xlane.f32.xlu1 %v388_v31 }
 0x11f   : > { %422 = vperm.xlu1 %557, %v418_v32  }
 0x123   : > { %427 = vperm.xlu1 %557, %v419_v33  }
 0x127   : > { %438 = vperm.xlu1 %557, %v434_v34  }
 0x197   : > { %v387_v35 = vpop.xlane.xlu1 %386 }
 0x198   : > { %v392_v36 = vmul.f32 0.00390625, %v387_v35 }
 0x19a   : > { %v394_v37 = vsub.f32 %v377_v22, %v392_v36  ;;  %v395_v38 = vsub.f32 %v379_v25, %v392_v36 }
 0x19b   : > { %v390_v39 = vpop.xlane.xlu1 %389 }
 0x19c   : > { %v393_v40 = vmul.f32 0.00390625, %v390_v39  ;;  %v398_v41 = vmul.f32 %v394_v37, %v394_v37  ;;  %v399_v42 = vmul.f32 %v395_v38, %v395_v38 }
 0x19e   : > { %v396_v43 = vsub.f32 %v381_v28, %v393_v40  ;;  %v397_v44 = vsub.f32 %v383_v29, %v393_v40  ;;  %v402_v45 = vadd.f32 %v399_v42, %v398_v41 }
 0x19f   : > { %v423_v50 = vpop.permute.xlu1 %422 }
 0x1a0   : > { %403 = vadd.xlane.f32.xlu0 %v402_v45  ;;  %v400_v46 = vmul.f32 %v396_v43, %v396_v43  ;;  %v401_v47 = vmul.f32 %v397_v44, %v397_v44 }
 0x1a2   : > { %v405_v48 = vadd.f32 %v401_v47, %v400_v46 }
 0x1a3   : > { %v428_v51 = vpop.permute.xlu1 %427 }
 0x1a4   : > { %406 = vadd.xlane.f32.xlu1 %v405_v48 }
 0x1a7   : > { %v439_v52 = vpop.permute.xlu1 %438 }
 0x1b5   : > { %443 = vperm.xlu1 %557, %v435_v49  }
 0x22d   : > { %v404_v53 = vpop.xlane.xlu0 %403 }
 0x22e   : > { %v408_v54 = vmul.f32 0.00390625, %v404_v53 }
 0x230   : > { %v410_v55 = vadd.f32 1e-05, %v408_v54 }
 0x231   : > { %v407_v56 = vpop.xlane.xlu1 %406 }
 0x232   : > { %583 = vrsqrt.f32 %v410_v55  ;;  %v409_v57 = vmul.f32 0.00390625, %v407_v56 }
 0x234   : > { %v411_v58 = vadd.f32 1e-05, %v409_v57 }
 0x235   : > { %v444_v9 = vpop.permute.xlu1 %443 }
 0x236   : > { %585 = vrsqrt.f32 %v411_v58 }
 0x23c   : > { %v584_v59 = vpop.eup %583 }
 0x23d   : > { %v414_v60 = vmul.f32 %v584_v59, %v394_v37  ;;  %v415_v61 = vmul.f32 %v584_v59, %v395_v38 }
 0x23f   : > { %v430_v62 = vmul.f32 %v423_v50, %v414_v60  ;;  %v431_v63 = vmul.f32 %v423_v50, %v415_v61 }
 0x240   : > { %v586_v0 = vpop.eup %585 }
 0x241   : > { %v446_v1 = vadd.f32 %v439_v52, %v430_v62  ;;  %v447_v2 = vadd.f32 %v439_v52, %v431_v63  ;;  %v416_v3 = vmul.f32 %v586_v0, %v396_v43  ;;  %v417_v4 = vmul.f32 %v586_v0, %v397_v44 }
 0x243   : > { %v432_v5 = vmul.f32 %v428_v51, %v416_v3  ;;  %v433_v6 = vmul.f32 %v428_v51, %v417_v4  ;;  %v450_v7 = vmul.f32 0.2, %v446_v1  ;;  %v451_v8 = vmul.f32 0.2, %v447_v2 }
 0x245   : > { %v454_v10 = vmax.f32 %v446_v1, %v450_v7  ;;  %v455_v11 = vmax.f32 %v447_v2, %v451_v8  ;;  %v448_v12 = vadd.f32 %v444_v9, %v432_v5  ;;  %v449_v13 = vadd.f32 %v444_v9, %v433_v6 }
 0x247   : > { %458 = vst [vmem:[%s224_s16] sm:$0xff] %v454_v10  ;;  %459 = vst [vmem:[%s224_s16 + $0x8] sm:$0xff] %v455_v11  ;;  %v452_v14 = vmul.f32 0.2, %v448_v12  ;;  %v453_v15 = vmul.f32 0.2, %v449_v13 }
 0x249   : > { %v456_v16 = vmax.f32 %v448_v12, %v452_v14  ;;  %v457_v17 = vmax.f32 %v449_v13, %v453_v15 }
 0x24b   : > { %460 = vst [vmem:[%s224_s16 + $0x10] sm:$0xff] %v456_v16  ;;  %461 = vst [vmem:[%s224_s16 + $0x18] sm:$0xff] %v457_v17 }
 0x24c PF: > { %s15_s18 = sadd.s32 1, %s593_s18  }
 0x24d   : > { %p12_p4 = scmp.ge.s32.totalorder %s15_s18, 4  }
 0x24f   :  { %14 = sbr.rel (!%p12_p4) target bundleno = 1 (0x1), region = 70 }

// kernel: _lambda_.9
= control target key start
LH: loop header
LB: loop body
LE: loop exit
PB: predicated region body
PF: predicated region fallthrough
CT: control target
= control target key end

     0   :  { %s785_s18 = smov 0   ;;  %s884_s0 = inlined_call_operand.vmem [shape: bf16[2,256,64], index: 0, kind: input, shape index: {}]   ;;  %s885_s1 = inlined_call_operand.vmem [shape: bf16[32,256], index: 1, kind: input, shape index: {}]   ;;  %s886_s2 = inlined_call_operand.vmem [shape: f32[32,1], index: 2, kind: input, shape index: {}]   ;;  %s887_s3 = inlined_call_operand.vmem [shape: f32[32,1], index: 3, kind: input, shape index: {}]   ;;  %s888_s4 = inlined_call_operand.vmem [shape: f32[32,1], index: 4, kind: input, shape index: {}]   ;;  %s889_s5 = inlined_call_operand.vmem [shape: f32[2,32,64], index: 5, kind: output, shape index: {}]  }
   0x1 LB: > { %s628_s19 = sadd.s32 4294967295, %s752_s18   ;;  %p632_p0 = scmp.ge.s32.totalorder %s752_s18, 1  ;;  %s752_s18 = sphi %s785_s18, %s15_s18  }
   0x2   : > { %p187_p1 = scmp.lt.s32.totalorder %s752_s18, 3 }
   0x4   : > { %p188_p2 = pnand %p632_p0, %p187_p1 }
   0x5   : > { %p215_p3 = scmp.lt.s32.totalorder (!%p188_p2), %s628_s19, 1  ;;  %v734_v0 = vld [vmem:[%s885_s1 + $0x4] ss:$8 sps:$4 sm:$0xff] (!%p188_p2)   ;;  %v754_v1 = vmov (!%p188_p2), 0   ;;  %v737_v2 = vld [vmem:[%s885_s1 + $0x14] ss:$8 sps:$4 sm:$0xff] (!%p188_p2)  }
   0x6   : > { %191 = sbr.rel (%p188_p2) target bundleno = 592 (0x250), region = 40  ;;  %714 = vset.pattern.permute.xlu0 (!%p188_p2), %v754_v1  ;;  %715 = vset.pattern.permute.xlu1 (!%p188_p2), %v754_v1  ;;  %v262_v3 = vld [vmem:[%s886_s2] sm:$0xff] (!%p188_p2)  ;;  %v264_v4 = vld [vmem:[%s886_s2 + $0x10] sm:$0xff] (!%p188_p2)  ;;  %v263_v5 = vld [vmem:[%s886_s2 + $0x8] sm:$0xff] (!%p188_p2)  ;;  %vm451_vm0 = vcmask (!%p188_p2), 523264  }
   0x7   : > { %434 = vmatprep.mubr.bf16.mxu0 (!%p188_p2), %v734_v0  ;;  %268 = vperm.xlu0 (!%p188_p2), %714, %v262_v3   ;;  %v265_v7 = vld [vmem:[%s886_s2 + $0x18] sm:$0xff] (!%p188_p2)  ;;  %v732_v23 = vld [vmem:[%s885_s1] ss:$8 sps:$4 sm:$0xff] (!%p188_p2)   ;;  %v507_v50 = vld [vmem:[%s887_s3 + $0x10] sm:$0xff] (!%p188_p2) }
   0x8   : > { %442 = vmatprep.mubr.bf16.mxu1 (!%p188_p2), %v737_v2  ;;  %278 = vperm.xlu1 (!%p188_p2), %715, %v264_v4   ;;  %v735_v24 = vld [vmem:[%s885_s1 + $0x10] ss:$8 sps:$4 sm:$0xff] (!%p188_p2)   ;;  %v505_v49 = vld [vmem:[%s887_s3] sm:$0xff] (!%p188_p2)  ;;  %v506_v52 = vld [vmem:[%s887_s3 + $0x8] sm:$0xff] (!%p188_p2) }
   0x9   : > { %v508_v51 = vld [vmem:[%s887_s3 + $0x18] sm:$0xff] (!%p188_p2)  ;;  %v534_v53 = vld [vmem:[%s888_s4 + $0x8] sm:$0xff] (!%p188_p2)  ;;  %v533_v54 = vld [vmem:[%s888_s4] sm:$0xff] (!%p188_p2) }
   0xb   : > { %273 = vperm.xlu0 (!%p188_p2), %714, %v263_v5  }
   0xc   : > { %283 = vperm.xlu1 (!%p188_p2), %715, %v265_v7  }
   0xd   : > { %s891_s19 = smov (!%p215_p3, %s628_s19), 1 }
   0xe   : > { %s659_s28 = sshll.u32 %s891_s19, 7 }
   0xf   : > { %s814_s8 = scalar_lea.vmem %s884_s0, %s659_s28 }
  0x10   : > { %v716_v6 = vld [vmem:[%s814_s8 + $0x40] sm:$0xff]   ;;  %v718_v9 = vld [vmem:[%s814_s8 + $0x48] sm:$0xff]   ;;  %v720_v11 = vld [vmem:[%s814_s8 + $0x50] sm:$0xff]  }
  0x11   : > { %v717_v8 = vld [vmem:[%s814_s8] sm:$0xff]   ;;  %661 = vmatprep.subr.bf16.mxu0 %v716_v6  ;;  %689 = vmatprep.subr.bf16.mxu1 %v716_v6  ;;  %v719_v10 = vld [vmem:[%s814_s8 + $0x8] sm:$0xff]   ;;  %v721_v12 = vld [vmem:[%s814_s8 + $0x10] sm:$0xff]  }
  0x12   : > { %662 = vmatpush3.bf16.msra.mxu0 %v717_v8  ;;  %697 = vmatpush3.bf16.msra.mxu1 %v717_v8  ;;  %v722_v13 = vld [vmem:[%s814_s8 + $0x58] sm:$0xff]   ;;  %v724_v15 = vld [vmem:[%s814_s8 + $0x60] sm:$0xff]   ;;  %v726_v17 = vld [vmem:[%s814_s8 + $0x68] sm:$0xff]  }
  0x13   : > { %663 = vmatprep.subr.bf16.mxu0 %v718_v9  ;;  %690 = vmatprep.subr.bf16.mxu1 %v718_v9  ;;  %v723_v14 = vld [vmem:[%s814_s8 + $0x18] sm:$0xff]   ;;  %v725_v16 = vld [vmem:[%s814_s8 + $0x20] sm:$0xff]   ;;  %v727_v18 = vld [vmem:[%s814_s8 + $0x28] sm:$0xff]  }
  0x14   : > { %v728_v19 = vld [vmem:[%s814_s8 + $0x70] sm:$0xff]   ;;  %v730_v21 = vld [vmem:[%s814_s8 + $0x78] sm:$0xff]  }
  0x15   : > { %v729_v20 = vld [vmem:[%s814_s8 + $0x30] sm:$0xff]   ;;  %v731_v22 = vld [vmem:[%s814_s8 + $0x38] sm:$0xff]   ;;  %s660_s8 = sshll.u32 %s891_s19, 5 }
  0x16   : > { %664 = vmatpush3.bf16.msra.mxu0 %v719_v10  ;;  %698 = vmatpush3.bf16.msra.mxu1 %v719_v10  ;;  %s224_s11 = scalar_lea.vmem %s889_s5, %s660_s8 }
  0x17   : > { %665 = vmatprep.subr.bf16.mxu0 %v720_v11  ;;  %691 = vmatprep.subr.bf16.mxu1 %v720_v11  ;;  %v536_v11 = vld [vmem:[%s888_s4 + $0x18] sm:$0xff] }
  0x1a   : > { %666 = vmatpush3.bf16.msra.mxu0 %v721_v12  ;;  %699 = vmatpush3.bf16.msra.mxu1 %v721_v12  ;;  %v535_v12 = vld [vmem:[%s888_s4 + $0x10] sm:$0xff] }
  0x1b   : > { %667 = vmatprep.subr.bf16.mxu0 %v722_v13  ;;  %692 = vmatprep.subr.bf16.mxu1 %v722_v13 }
  0x1e   : > { %668 = vmatpush3.bf16.msra.mxu0 %v723_v14  ;;  %700 = vmatpush3.bf16.msra.mxu1 %v723_v14 }
  0x1f   : > { %669 = vmatprep.subr.bf16.mxu0 %v724_v15  ;;  %693 = vmatprep.subr.bf16.mxu1 %v724_v15 }
  0x22   : > { %670 = vmatpush3.bf16.msra.mxu0 %v725_v16  ;;  %701 = vmatpush3.bf16.msra.mxu1 %v725_v16 }
  0x23   : > { %671 = vmatprep.subr.bf16.mxu0 %v726_v17  ;;  %694 = vmatprep.subr.bf16.mxu1 %v726_v17 }
  0x26   : > { %672 = vmatpush3.bf16.msra.mxu0 %v727_v18  ;;  %702 = vmatpush3.bf16.msra.mxu1 %v727_v18 }
  0x27   : > { %673 = vmatprep.subr.bf16.mxu0 %v728_v19  ;;  %695 = vmatprep.subr.bf16.mxu1 %v728_v19 }
  0x2a   : > { %674 = vmatpush3.bf16.msra.mxu0 %v729_v20  ;;  %703 = vmatpush3.bf16.msra.mxu1 %v729_v20 }
  0x2b   : > { %675 = vmatprep.subr.bf16.mxu0 %v730_v21  ;;  %696 = vmatprep.subr.bf16.mxu1 %v730_v21 }
  0x2e   : > { %676 = vmatpush3.bf16.msra.mxu0 %v731_v22  ;;  %704 = vmatpush3.bf16.msra.mxu1 %v731_v22 }
  0x31   : > { %435 = vmatmul.mubr.bf16.vlgmr.msra.gmra.mrb[0].mxu0 %v732_v23  ;;  %443 = vmatmul.mubr.bf16.vlgmr.msra.gmra.mrb[0].mxu1 %v735_v24 }
  0x86   : > { %v269_v25 = vpop.permute.xlu0 %268 }
  0x87   : > { %v279_v26 = vpop.permute.xlu1 %278 }
  0x8a   : > { %v274_v41 = vpop.permute.xlu0 %273 }
  0x8b   : > { %v284_v44 = vpop.permute.xlu1 %283 }
 0x104   : > { %v677_v27 = vpop.f32.mrb[0].mxu0  ;;  %v683_v28 = vpop.f32.mrb[0].mxu1 }
 0x105   : > { %v678_v29 = vpop.f32.mrb[1].mxu0  ;;  %v684_v30 = vpop.f32.mrb[1].mxu1 }
 0x106   : > { %v679_v31 = vadd.f32 %v678_v29, %v677_v27  ;;  %v680_v32 = vpop.f32.mrb[2].mxu0  ;;  %v685_v33 = vadd.f32 %v684_v30, %v683_v28  ;;  %v686_v34 = vpop.f32.mrb[2].mxu1 }
 0x107   : > { %v681_v35 = vpop.f32.mrb[3].mxu0  ;;  %v687_v36 = vpop.f32.mrb[3].mxu1 }
 0x108   : > { %v682_v37 = vadd.f32 %v681_v35, %v680_v32  ;;  %v688_v38 = vadd.f32 %v687_v36, %v686_v34  ;;  %v437_v39 = vadd.f32 %v679_v31, %v269_v25  ;;  %v445_v40 = vadd.f32 %v685_v33, %v279_v26 }
 0x10a   : > { %v452_v42 = vsel %vm451_vm0, %v437_v39, 0.0  ;;  %v440_v43 = vadd.f32 %v682_v37, %v274_v41  ;;  %v458_v46 = vsel %vm451_vm0, %v445_v40, 0.0  ;;  %v448_v47 = vadd.f32 %v688_v38, %v284_v44 }
 0x10b   : > { %453 = vadd.xlane.f32.xlu0 %v452_v42 }
 0x10c   : > { %v455_v45 = vsel %vm451_vm0, %v440_v43, 0.0  ;;  %v461_v48 = vsel %vm451_vm0, %v448_v47, 0.0 }
 0x10d   : > { %456 = vadd.xlane.f32.xlu1 %v455_v45 }
 0x10f   : > { %459 = vadd.xlane.f32.xlu0 %v458_v46 }
 0x113   : > { %462 = vadd.xlane.f32.xlu0 %v461_v48 }
 0x11e   : > { %511 = vperm.xlu1 %715, %v505_v49  }
 0x122   : > { %521 = vperm.xlu1 %715, %v507_v50  }
 0x126   : > { %526 = vperm.xlu1 %715, %v508_v51  }
 0x129   : > { %516 = vperm.xlu0 %714, %v506_v52  }
 0x12a   : > { %544 = vperm.xlu1 %715, %v534_v53  }
 0x12d   : > { %539 = vperm.xlu0 %714, %v533_v54  }
 0x198   : > { %v454_v55 = vpop.xlane.xlu0 %453 }
 0x199   : > { %v465_v56 = vmul.f32 0.015625, %v454_v55 }
 0x19a   : > { %v457_v57 = vpop.xlane.xlu1 %456 }
 0x19b   : > { %v469_v58 = vsub.f32 %v437_v39, %v465_v56  ;;  %v466_v59 = vmul.f32 0.015625, %v457_v57 }
 0x19c   : > { %v460_v60 = vpop.xlane.xlu0 %459 }
 0x19d   : > { %v470_v61 = vsub.f32 %v440_v43, %v466_v59  ;;  %v467_v62 = vmul.f32 0.015625, %v460_v60  ;;  %v473_v63 = vmul.f32 %v469_v58, %v469_v58 }
 0x19e   : > { %v512_v13 = vpop.permute.xlu1 %511 }
 0x19f   : > { %v471_v0 = vsub.f32 %v445_v40, %v467_v62  ;;  %v477_v1 = vsel %vm451_vm0, %v473_v63, 0.0  ;;  %v474_v2 = vmul.f32 %v470_v61, %v470_v61 }
 0x1a0   : > { %478 = vadd.xlane.f32.xlu1 %v477_v1  ;;  %v463_v3 = vpop.xlane.xlu0 %462 }
 0x1a1   : > { %v468_v4 = vmul.f32 0.015625, %v463_v3  ;;  %v480_v5 = vsel %vm451_vm0, %v474_v2, 0.0  ;;  %v475_v6 = vmul.f32 %v471_v0, %v471_v0 }
 0x1a2   : > { %481 = vadd.xlane.f32.xlu0 %v480_v5  ;;  %v522_v14 = vpop.permute.xlu1 %521 }
 0x1a3   : > { %v472_v7 = vsub.f32 %v448_v47, %v468_v4  ;;  %v483_v8 = vsel %vm451_vm0, %v475_v6, 0.0 }
 0x1a4   : > { %484 = vadd.xlane.f32.xlu1 %v483_v8 }
 0x1a5   : > { %v476_v9 = vmul.f32 %v472_v7, %v472_v7 }
 0x1a6   : > { %v527_v15 = vpop.permute.xlu1 %526 }
 0x1a7   : > { %v486_v10 = vsel %vm451_vm0, %v476_v9, 0.0 }
 0x1a8   : > { %487 = vadd.xlane.f32.xlu0 %v486_v10  ;;  %v517_v16 = vpop.permute.xlu0 %516 }
 0x1aa   : > { %v545_v17 = vpop.permute.xlu1 %544 }
 0x1ac   : > { %v540_v18 = vpop.permute.xlu0 %539 }
 0x1b5   : > { %554 = vperm.xlu1 %715, %v536_v11  }
 0x1be   : > { %549 = vperm.xlu0 %714, %v535_v12  }
 0x22d   : > { %v479_v19 = vpop.xlane.xlu1 %478 }
 0x22e   : > { %v489_v20 = vmul.f32 0.015625, %v479_v19 }
 0x22f   : > { %v482_v21 = vpop.xlane.xlu0 %481 }
 0x230   : > { %v493_v22 = vadd.f32 1e-05, %v489_v20  ;;  %v490_v23 = vmul.f32 0.015625, %v482_v21 }
 0x231   : > { %v485_v24 = vpop.xlane.xlu1 %484 }
 0x232   : > { %738 = vrsqrt.f32 %v493_v22  ;;  %v494_v25 = vadd.f32 1e-05, %v490_v23  ;;  %v491_v26 = vmul.f32 0.015625, %v485_v24 }
 0x234   : > { %740 = vrsqrt.f32 %v494_v25  ;;  %v495_v27 = vadd.f32 1e-05, %v491_v26 }
 0x235   : > { %v488_v28 = vpop.xlane.xlu0 %487  ;;  %v555_v52 = vpop.permute.xlu1 %554 }
 0x236   : > { %742 = vrsqrt.f32 %v495_v27  ;;  %v492_v29 = vmul.f32 0.015625, %v488_v28 }
 0x238   : > { %v496_v30 = vadd.f32 1e-05, %v492_v29 }
 0x23a   : > { %744 = vrsqrt.f32 %v496_v30 }
 0x23c   : > { %v739_v31 = vpop.eup %738 }
 0x23d   : > { %v501_v32 = vmul.f32 %v739_v31, %v469_v58  ;;  %v550_v44 = vpop.permute.xlu0 %549 }
 0x23e   : > { %v741_v33 = vpop.eup %740 }
 0x23f   : > { %v529_v34 = vmul.f32 %v512_v13, %v501_v32  ;;  %v502_v35 = vmul.f32 %v741_v33, %v470_v61 }
 0x240   : > { %v743_v36 = vpop.eup %742 }
 0x241   : > { %v557_v37 = vadd.f32 %v540_v18, %v529_v34  ;;  %v530_v38 = vmul.f32 %v517_v16, %v502_v35  ;;  %v503_v39 = vmul.f32 %v743_v36, %v471_v0 }
 0x243   : > { %v561_v40 = vmul.f32 0.2, %v557_v37  ;;  %v558_v41 = vadd.f32 %v545_v17, %v530_v38  ;;  %v531_v42 = vmul.f32 %v522_v14, %v503_v39 }
 0x244   : > { %v745_v43 = vpop.eup %744 }
 0x245   : > { %v565_v45 = vmax.f32 %v557_v37, %v561_v40  ;;  %v562_v46 = vmul.f32 0.2, %v558_v41  ;;  %v504_v47 = vmul.f32 %v745_v43, %v472_v7  ;;  %v559_v48 = vadd.f32 %v550_v44, %v531_v42 }
 0x247   : > { %v566_v49 = vmax.f32 %v558_v41, %v562_v46  ;;  %v532_v50 = vmul.f32 %v527_v15, %v504_v47  ;;  %569 = vst.msk [vmem:[%s224_s11] sm:$0xff] %vm451_vm0, %v565_v45  ;;  %v563_v51 = vmul.f32 0.2, %v559_v48 }
 0x249   : > { %v560_v53 = vadd.f32 %v555_v52, %v532_v50  ;;  %570 = vst.msk [vmem:[%s224_s11 + $0x8] sm:$0xff] %vm451_vm0, %v566_v49  ;;  %v567_v54 = vmax.f32 %v559_v48, %v563_v51 }
 0x24b   : > { %v564_v55 = vmul.f32 0.2, %v560_v53  ;;  %571 = vst.msk [vmem:[%s224_s11 + $0x10] sm:$0xff] %vm451_vm0, %v567_v54 }
 0x24d   : > { %v568_v56 = vmax.f32 %v560_v53, %v564_v55 }
 0x24f   : > { %572 = vst.msk [vmem:[%s224_s11 + $0x18] sm:$0xff] %vm451_vm0, %v568_v56 }
 0x250 PF: > { %s15_s18 = sadd.s32 1, %s752_s18  }
 0x251   : > { %p12_p4 = scmp.ge.s32.totalorder %s15_s18, 4  }
 0x253   :  { %14 = sbr.rel (!%p12_p4) target bundleno = 1 (0x1), region = 70 }

// kernel: _lambda_.10
= control target key start
LH: loop header
LB: loop body
LE: loop exit
PB: predicated region body
PF: predicated region fallthrough
CT: control target
= control target key end

     0   :  { %s1316_s18 = smov 0   ;;  %s1627_s0 = inlined_call_operand.vmem [shape: bf16[2,512,16], index: 0, kind: input, shape index: {}]   ;;  %s1628_s1 = inlined_call_operand.vmem [shape: bf16[64,512], index: 1, kind: input, shape index: {}]   ;;  %s1629_s2 = inlined_call_operand.vmem [shape: f32[64,1], index: 2, kind: input, shape index: {}]   ;;  %s1630_s3 = inlined_call_operand.vmem [shape: f32[64,1], index: 3, kind: input, shape index: {}]   ;;  %s1631_s4 = inlined_call_operand.vmem [shape: f32[64,1], index: 4, kind: input, shape index: {}]   ;;  %s1632_s5 = inlined_call_operand.vmem [shape: f32[2,64,16], index: 5, kind: output, shape index: {}]  }
   0x1 LB: > { %s1053_s19 = sadd.s32 4294967295, %s1283_s18   ;;  %p1057_p0 = scmp.ge.s32.totalorder %s1283_s18, 1  ;;  %s1283_s18 = sphi %s1316_s18, %s15_s18  }
   0x2   : > { %p187_p1 = scmp.lt.s32.totalorder %s1283_s18, 3 }
   0x4   : > { %p188_p2 = pnand %p1057_p0, %p187_p1 }
   0x5   : > { %p215_p3 = scmp.lt.s32.totalorder (!%p188_p2), %s1053_s19, 1  ;;  %v1239_v0 = vld [vmem:[%s1628_s1 + $0x4] ss:$16 sps:$4 sm:$0xff] (!%p188_p2)   ;;  %v1285_v1 = vmov (!%p188_p2), 0   ;;  %v1242_v2 = vld [vmem:[%s1628_s1 + $0xc] ss:$16 sps:$4 sm:$0xff] (!%p188_p2)  }
   0x6   : > { %191 = sbr.rel (%p188_p2) target bundleno = 613 (0x265), region = 40  ;;  %1204 = vset.pattern.permute.xlu1 (!%p188_p2), %v1285_v1  ;;  %1203 = vset.pattern.permute.xlu0 (!%p188_p2), %v1285_v1  ;;  %v1237_v33 = vld [vmem:[%s1628_s1] ss:$16 sps:$4 sm:$0xff] (!%p188_p2)   ;;  %v1240_v35 = vld [vmem:[%s1628_s1 + $0x8] ss:$16 sps:$4 sm:$0xff] (!%p188_p2)   ;;  %vm756_vm0 = vcmask (!%p188_p2), 130048  }
   0x7   : > { %658 = vmatprep.mubr.bf16.mxu0 (!%p188_p2), %v1239_v0  ;;  %723 = vmatprep.mubr.bf16.mxu1 (!%p188_p2), %v1242_v2  ;;  %v1243_v37 = vld [vmem:[%s1628_s1 + $0x24] ss:$16 sps:$4 sm:$0xff] (!%p188_p2)   ;;  %v1245_v38 = vld [vmem:[%s1628_s1 + $0x2c] ss:$16 sps:$4 sm:$0xff] (!%p188_p2)   ;;  %v1247_v42 = vld [vmem:[%s1628_s1 + $0x20] ss:$16 sps:$4 sm:$0xff] (!%p188_p2)  }
   0x8   : > { %v308_v39 = vld [vmem:[%s1629_s2 + $0x10] sm:$0xff] (!%p188_p2)  ;;  %v306_v40 = vld [vmem:[%s1629_s2] sm:$0xff] (!%p188_p2)  ;;  %v309_v41 = vld [vmem:[%s1629_s2 + $0x18] sm:$0xff] (!%p188_p2) }
   0x9   : > { %326 = vperm.xlu1 (!%p188_p2), %1204, %v308_v39   ;;  %316 = vperm.xlu0 (!%p188_p2), %1203, %v306_v40   ;;  %v307_v43 = vld [vmem:[%s1629_s2 + $0x8] sm:$0xff] (!%p188_p2)  ;;  %v1249_v45 = vld [vmem:[%s1628_s1 + $0x44] ss:$16 sps:$4 sm:$0xff] (!%p188_p2)   ;;  %v313_v49 = vld [vmem:[%s1629_s2 + $0x38] sm:$0xff] (!%p188_p2) }
   0xa   : > { %v1248_v44 = vld [vmem:[%s1628_s1 + $0x28] ss:$16 sps:$4 sm:$0xff] (!%p188_p2)   ;;  %v1251_v46 = vld [vmem:[%s1628_s1 + $0x4c] ss:$16 sps:$4 sm:$0xff] (!%p188_p2)   ;;  %v310_v48 = vld [vmem:[%s1629_s2 + $0x20] sm:$0xff] (!%p188_p2) }
   0xb   : > { %v311_v47 = vld [vmem:[%s1629_s2 + $0x28] sm:$0xff] (!%p188_p2)  ;;  %v1253_v50 = vld [vmem:[%s1628_s1 + $0x40] ss:$16 sps:$4 sm:$0xff] (!%p188_p2)   ;;  %v1255_v53 = vld [vmem:[%s1628_s1 + $0x64] ss:$16 sps:$4 sm:$0xff] (!%p188_p2)  }
   0xc   : > { %v312_v51 = vld [vmem:[%s1629_s2 + $0x30] sm:$0xff] (!%p188_p2)  ;;  %v1254_v52 = vld [vmem:[%s1628_s1 + $0x48] ss:$16 sps:$4 sm:$0xff] (!%p188_p2)   ;;  %v1257_v54 = vld [vmem:[%s1628_s1 + $0x6c] ss:$16 sps:$4 sm:$0xff] (!%p188_p2)  }
   0xd   : > { %s1634_s19 = smov (!%p215_p3, %s1053_s19), 1  ;;  %331 = vperm.xlu1 %1204, %v309_v41   ;;  %321 = vperm.xlu0 %1203, %v307_v43   ;;  %v862_v55 = vld [vmem:[%s1630_s3] sm:$0xff]  ;;  %v863_v56 = vld [vmem:[%s1630_s3 + $0x8] sm:$0xff]  ;;  %v864_v57 = vld [vmem:[%s1630_s3 + $0x10] sm:$0xff] }
   0xe   : > { %s1112_s24 = sshll.u32 %s1634_s19, 8  ;;  %v1259_v58 = vld [vmem:[%s1628_s1 + $0x60] ss:$16 sps:$4 sm:$0xff]   ;;  %v1260_v60 = vld [vmem:[%s1628_s1 + $0x68] ss:$16 sps:$4 sm:$0xff]   ;;  %s1113_s10 = sshll.u32 %s1634_s19, 6 }
   0xf   : > { %s1336_s27 = scalar_lea.vmem %s1627_s0, %s1112_s24  ;;  %v866_v59 = vld [vmem:[%s1630_s3 + $0x20] sm:$0xff]  ;;  %v865_v61 = vld [vmem:[%s1630_s3 + $0x18] sm:$0xff]  ;;  %v867_v62 = vld [vmem:[%s1630_s3 + $0x28] sm:$0xff]  ;;  %s1592_s13 = scalar_lea.vmem %s1632_s5, %s1113_s10 }
  0x10   : > { %v1205_v3 = vld [vmem:[%s1336_s27 + $0x40] sm:$0xff]   ;;  %v1209_v7 = vld [vmem:[%s1336_s27 + $0x48] sm:$0xff]   ;;  %v1213_v11 = vld [vmem:[%s1336_s27 + $0x50] sm:$0xff]  }
  0x11   : > { %v1206_v4 = vld [vmem:[%s1336_s27 + $0xc0] sm:$0xff]   ;;  %1114 = vmatprep.subr.bf16.mxu0 %v1205_v3  ;;  %v1210_v8 = vld [vmem:[%s1336_s27 + $0xc8] sm:$0xff]   ;;  %v1214_v12 = vld [vmem:[%s1336_s27 + $0xd0] sm:$0xff]   ;;  %341 = vperm.xlu1 %1204, %v311_v47  }
  0x12   : > { %v1207_v5 = vld [vmem:[%s1336_s27] sm:$0xff]   ;;  %1154 = vmatprep.subr.bf16.mxu1 %v1206_v4  ;;  %v1211_v9 = vld [vmem:[%s1336_s27 + $0x8] sm:$0xff]   ;;  %v1215_v13 = vld [vmem:[%s1336_s27 + $0x10] sm:$0xff]   ;;  %336 = vperm.xlu0 %1203, %v310_v48  }
  0x13   : > { %v1208_v6 = vld [vmem:[%s1336_s27 + $0x80] sm:$0xff]   ;;  %1115 = vmatpush3.bf16.msra.mxu0 %v1207_v5  ;;  %v1212_v10 = vld [vmem:[%s1336_s27 + $0x88] sm:$0xff]   ;;  %v1216_v14 = vld [vmem:[%s1336_s27 + $0x90] sm:$0xff]  }
  0x14   : > { %1155 = vmatpush3.bf16.msra.mxu1 %v1208_v6  ;;  %1116 = vmatprep.subr.bf16.mxu0 %v1209_v7  ;;  %v1217_v15 = vld [vmem:[%s1336_s27 + $0x58] sm:$0xff]   ;;  %v1221_v19 = vld [vmem:[%s1336_s27 + $0x60] sm:$0xff]   ;;  %v1225_v23 = vld [vmem:[%s1336_s27 + $0x68] sm:$0xff]  }
  0x15   : > { %1156 = vmatprep.subr.bf16.mxu1 %v1210_v8  ;;  %v1218_v16 = vld [vmem:[%s1336_s27 + $0xd8] sm:$0xff]   ;;  %v1222_v20 = vld [vmem:[%s1336_s27 + $0xe0] sm:$0xff]   ;;  %v1226_v24 = vld [vmem:[%s1336_s27 + $0xe8] sm:$0xff]   ;;  %351 = vperm.xlu1 %1204, %v313_v49  }
  0x16   : > { %v1219_v17 = vld [vmem:[%s1336_s27 + $0x18] sm:$0xff]   ;;  %v1223_v21 = vld [vmem:[%s1336_s27 + $0x20] sm:$0xff]   ;;  %v1227_v25 = vld [vmem:[%s1336_s27 + $0x28] sm:$0xff]   ;;  %346 = vperm.xlu0 %1203, %v312_v51  }
  0x17   : > { %1117 = vmatpush3.bf16.msra.mxu0 %v1211_v9  ;;  %v1220_v18 = vld [vmem:[%s1336_s27 + $0x98] sm:$0xff]   ;;  %v1224_v22 = vld [vmem:[%s1336_s27 + $0xa0] sm:$0xff]   ;;  %v1228_v26 = vld [vmem:[%s1336_s27 + $0xa8] sm:$0xff]  }
  0x18   : > { %1157 = vmatpush3.bf16.msra.mxu1 %v1212_v10  ;;  %1118 = vmatprep.subr.bf16.mxu0 %v1213_v11  ;;  %v1229_v27 = vld [vmem:[%s1336_s27 + $0x70] sm:$0xff]   ;;  %v1233_v31 = vld [vmem:[%s1336_s27 + $0x78] sm:$0xff]  }
  0x19   : > { %1158 = vmatprep.subr.bf16.mxu1 %v1214_v12  ;;  %v1230_v28 = vld [vmem:[%s1336_s27 + $0xf0] sm:$0xff]   ;;  %v1234_v32 = vld [vmem:[%s1336_s27 + $0xf8] sm:$0xff]   ;;  %872 = vperm.xlu1 %1204, %v862_v55  }
  0x1a   : > { %v1231_v29 = vld [vmem:[%s1336_s27 + $0x30] sm:$0xff]   ;;  %v1235_v34 = vld [vmem:[%s1336_s27 + $0x38] sm:$0xff]   ;;  %877 = vperm.xlu0 %1203, %v863_v56  }
  0x1b   : > { %1119 = vmatpush3.bf16.msra.mxu0 %v1215_v13  ;;  %v1232_v30 = vld [vmem:[%s1336_s27 + $0xb0] sm:$0xff]   ;;  %v1236_v36 = vld [vmem:[%s1336_s27 + $0xb8] sm:$0xff]  }
  0x1c   : > { %1159 = vmatpush3.bf16.msra.mxu1 %v1216_v14  ;;  %1120 = vmatprep.subr.bf16.mxu0 %v1217_v15 }
  0x1d   : > { %1160 = vmatprep.subr.bf16.mxu1 %v1218_v16  ;;  %882 = vperm.xlu1 %1204, %v864_v57  }
  0x1e   : > { %892 = vperm.xlu0 %1203, %v866_v59  }
  0x1f   : > { %1121 = vmatpush3.bf16.msra.mxu0 %v1219_v17 }
  0x20   : > { %1161 = vmatpush3.bf16.msra.mxu1 %v1220_v18  ;;  %1122 = vmatprep.subr.bf16.mxu0 %v1221_v19 }
  0x21   : > { %1162 = vmatprep.subr.bf16.mxu1 %v1222_v20  ;;  %887 = vperm.xlu1 %1204, %v865_v61  }
  0x23   : > { %1123 = vmatpush3.bf16.msra.mxu0 %v1223_v21 }
  0x24   : > { %1163 = vmatpush3.bf16.msra.mxu1 %v1224_v22  ;;  %1124 = vmatprep.subr.bf16.mxu0 %v1225_v23 }
  0x25   : > { %1164 = vmatprep.subr.bf16.mxu1 %v1226_v24  ;;  %897 = vperm.xlu1 %1204, %v867_v62  }
  0x27   : > { %1125 = vmatpush3.bf16.msra.mxu0 %v1227_v25 }
  0x28   : > { %1165 = vmatpush3.bf16.msra.mxu1 %v1228_v26  ;;  %1126 = vmatprep.subr.bf16.mxu0 %v1229_v27 }
  0x29   : > { %1166 = vmatprep.subr.bf16.mxu1 %v1230_v28 }
  0x2b   : > { %1127 = vmatpush3.bf16.msra.mxu0 %v1231_v29 }
  0x2c   : > { %1167 = vmatpush3.bf16.msra.mxu1 %v1232_v30  ;;  %1128 = vmatprep.subr.bf16.mxu0 %v1233_v31 }
  0x2d   : > { %1168 = vmatprep.subr.bf16.mxu1 %v1234_v32 }
  0x2f   : > { %1129 = vmatpush3.bf16.msra.mxu0 %v1235_v34 }
  0x30   : > { %1169 = vmatpush3.bf16.msra.mxu1 %v1236_v36 }
  0x32   : > { %659 = vmatmul.mubr.bf16.vlgmr.msra.gmra.mrb[0].mxu0 %v1237_v33 }
  0x33   : > { %724 = vmatmul.mubr.bf16.vlgmr.msra.gmra.mrb[0].mxu1 %v1240_v35  ;;  %666 = vmatprep.mubr.bf16.mxu0 %v1243_v37 }
  0x34   : > { %731 = vmatprep.mubr.bf16.mxu1 %v1245_v38 }
  0x3a   : > { %667 = vmatmul.mubr.bf16.gmra.mrb[4].mxu0 %v1247_v42 }
  0x3b   : > { %732 = vmatmul.mubr.bf16.gmra.mrb[4].mxu1 %v1248_v44  ;;  %674 = vmatprep.mubr.bf16.mxu0 %v1249_v45 }
  0x3c   : > { %739 = vmatprep.mubr.bf16.mxu1 %v1251_v46 }
  0x42   : > { %675 = vmatmul.mubr.bf16.gmra.mrb[8].mxu0 %v1253_v50 }
  0x43   : > { %740 = vmatmul.mubr.bf16.gmra.mrb[8].mxu1 %v1254_v52  ;;  %682 = vmatprep.mubr.bf16.mxu0 %v1255_v53 }
  0x44   : > { %747 = vmatprep.mubr.bf16.mxu1 %v1257_v54 }
  0x4a   : > { %683 = vmatmul.mubr.bf16.gmra.mrb[12].mxu0 %v1259_v58 }
  0x4b   : > { %748 = vmatmul.mubr.bf16.gmra.mrb[12].mxu1 %v1260_v60 }
  0x88   : > { %v317_v63 = vpop.permute.xlu0 %316  ;;  %v327_v16 = vpop.permute.xlu1 %326 }
  0x8c   : > { %v322_v12 = vpop.permute.xlu0 %321  ;;  %v332_v32 = vpop.permute.xlu1 %331 }
  0x90   : > { %v342_v52 = vpop.permute.xlu1 %341 }
  0x91   : > { %v337_v36 = vpop.permute.xlu0 %336 }
  0x95   : > { %v347_v56 = vpop.permute.xlu0 %346 }
 0x105   : > { %v1130_v0 = vpop.f32.mrb[0].mxu0 }
 0x106   : > { %v1170_v1 = vpop.f32.mrb[0].mxu1  ;;  %v1131_v2 = vpop.f32.mrb[1].mxu0 }
 0x107   : > { %v1132_v3 = vadd.f32 %v1131_v2, %v1130_v0  ;;  %v1171_v4 = vpop.f32.mrb[1].mxu1  ;;  %v1133_v5 = vpop.f32.mrb[2].mxu0 }
 0x108   : > { %v1172_v6 = vadd.f32 %v1171_v4, %v1170_v1  ;;  %v1173_v7 = vpop.f32.mrb[2].mxu1  ;;  %v1134_v8 = vpop.f32.mrb[3].mxu0 }
 0x109   : > { %v661_v9 = vadd.f32 %v1132_v3, %v317_v63  ;;  %v1135_v10 = vadd.f32 %v1134_v8, %v1133_v5  ;;  %v1174_v11 = vpop.f32.mrb[3].mxu1  ;;  %v352_v8 = vpop.permute.xlu1 %351 }
 0x10a   : > { %v1175_v13 = vadd.f32 %v1174_v11, %v1173_v7 }
 0x10b   : > { %v664_v14 = vadd.f32 %v1135_v10, %v322_v12  ;;  %v1454_v15 = vadd.f32 %v1172_v6, %v661_v9 }
 0x10d   : > { %v1136_v17 = vpop.f32.mrb[4].mxu0  ;;  %v757_v18 = vsel %vm756_vm0, %v1454_v15, 0.0  ;;  %v1458_v19 = vadd.f32 %v1175_v13, %v664_v14 }
 0x10e   : > { %v1176_v20 = vpop.f32.mrb[4].mxu1  ;;  %v1137_v21 = vpop.f32.mrb[5].mxu0  ;;  %758 = vadd.xlane.f32.xlu0 %v757_v18  ;;  %v868_v18 = vld [vmem:[%s1630_s3 + $0x30] sm:$0xff] }
 0x10f   : > { %v1138_v22 = vadd.f32 %v1137_v21, %v1136_v17  ;;  %v1177_v23 = vpop.f32.mrb[5].mxu1  ;;  %v1139_v24 = vpop.f32.mrb[6].mxu0  ;;  %v760_v25 = vsel %vm756_vm0, %v1458_v19, 0.0  ;;  %v919_v17 = vld [vmem:[%s1631_s4 + $0x8] sm:$0xff]  ;;  %v918_v21 = vld [vmem:[%s1631_s4] sm:$0xff] }
 0x110   : > { %v1178_v26 = vadd.f32 %v1177_v23, %v1176_v20  ;;  %v1179_v27 = vpop.f32.mrb[6].mxu1  ;;  %v1140_v28 = vpop.f32.mrb[7].mxu0  ;;  %761 = vadd.xlane.f32.xlu1 %v760_v25  ;;  %v921_v20 = vld [vmem:[%s1631_s4 + $0x18] sm:$0xff]  ;;  %v920_v23 = vld [vmem:[%s1631_s4 + $0x10] sm:$0xff] }
 0x111   : > { %v669_v29 = vadd.f32 %v1138_v22, %v327_v16  ;;  %v1141_v30 = vadd.f32 %v1140_v28, %v1139_v24  ;;  %v1180_v31 = vpop.f32.mrb[7].mxu1  ;;  %v869_v16 = vld [vmem:[%s1630_s3 + $0x38] sm:$0xff]  ;;  %v923_v22 = vld [vmem:[%s1631_s4 + $0x28] sm:$0xff]  ;;  %v922_v24 = vld [vmem:[%s1631_s4 + $0x20] sm:$0xff]  ;;  %v1510_v25 = vpop.permute.xlu1 %872 }
 0x112   : > { %v1181_v33 = vadd.f32 %v1180_v31, %v1179_v27  ;;  %v1514_v27 = vpop.permute.xlu0 %877 }
 0x113   : > { %v672_v34 = vadd.f32 %v1141_v30, %v332_v32  ;;  %v1462_v35 = vadd.f32 %v1178_v26, %v669_v29 }
 0x115   : > { %v1142_v37 = vpop.f32.mrb[8].mxu0  ;;  %v763_v38 = vsel %vm756_vm0, %v1462_v35, 0.0  ;;  %v1466_v39 = vadd.f32 %v1181_v33, %v672_v34  ;;  %v1512_v26 = vpop.permute.xlu1 %882 }
 0x116   : > { %v1182_v40 = vpop.f32.mrb[8].mxu1  ;;  %v1143_v41 = vpop.f32.mrb[9].mxu0  ;;  %764 = vadd.xlane.f32.xlu0 %v763_v38 }
 0x117   : > { %v1144_v42 = vadd.f32 %v1143_v41, %v1142_v37  ;;  %v1183_v43 = vpop.f32.mrb[9].mxu1  ;;  %v1145_v44 = vpop.f32.mrb[10].mxu0  ;;  %v766_v51 = vsel %vm756_vm0, %v1466_v39, 0.0 }
 0x118   : > { %v1184_v45 = vadd.f32 %v1183_v43, %v1182_v40  ;;  %v1185_v46 = vpop.f32.mrb[10].mxu1  ;;  %v1146_v47 = vpop.f32.mrb[11].mxu0 }
 0x119   : > { %v677_v48 = vadd.f32 %v1144_v42, %v337_v36  ;;  %v1147_v49 = vadd.f32 %v1146_v47, %v1145_v44  ;;  %v1186_v50 = vpop.f32.mrb[11].mxu1  ;;  %v1516_v28 = vpop.permute.xlu1 %887 }
 0x11a   : > { %v1187_v53 = vadd.f32 %v1186_v50, %v1185_v46  ;;  %767 = vadd.xlane.f32.xlu0 %v766_v51  ;;  %v1518_v29 = vpop.permute.xlu0 %892 }
 0x11b   : > { %v680_v54 = vadd.f32 %v1147_v49, %v342_v52  ;;  %v1470_v55 = vadd.f32 %v1184_v45, %v677_v48 }
 0x11d   : > { %v1148_v57 = vpop.f32.mrb[12].mxu0  ;;  %v769_v58 = vsel %vm756_vm0, %v1470_v55, 0.0  ;;  %v1474_v59 = vadd.f32 %v1187_v53, %v680_v54  ;;  %v1520_v30 = vpop.permute.xlu1 %897 }
 0x11e   : > { %v1188_v60 = vpop.f32.mrb[12].mxu1  ;;  %v1149_v61 = vpop.f32.mrb[13].mxu0  ;;  %770 = vadd.xlane.f32.xlu1 %v769_v58 }
 0x11f   : > { %v1150_v62 = vadd.f32 %v1149_v61, %v1148_v57  ;;  %v1189_v63 = vpop.f32.mrb[13].mxu1  ;;  %v1151_v0 = vpop.f32.mrb[14].mxu0  ;;  %v772_v1 = vsel %vm756_vm0, %v1474_v59, 0.0 }
 0x120   : > { %v1190_v2 = vadd.f32 %v1189_v63, %v1188_v60  ;;  %v1191_v3 = vpop.f32.mrb[14].mxu1  ;;  %v1152_v4 = vpop.f32.mrb[15].mxu0  ;;  %773 = vadd.xlane.f32.xlu0 %v772_v1 }
 0x121   : > { %v685_v5 = vadd.f32 %v1150_v62, %v347_v56  ;;  %v1153_v6 = vadd.f32 %v1152_v4, %v1151_v0  ;;  %v1192_v7 = vpop.f32.mrb[15].mxu1 }
 0x122   : > { %v1193_v9 = vadd.f32 %v1192_v7, %v1191_v3 }
 0x123   : > { %v688_v10 = vadd.f32 %v1153_v6, %v352_v8  ;;  %v1478_v11 = vadd.f32 %v1190_v2, %v685_v5  ;;  %v925_v5 = vld [vmem:[%s1631_s4 + $0x38] sm:$0xff]  ;;  %v924_v6 = vld [vmem:[%s1631_s4 + $0x30] sm:$0xff] }
 0x125   : > { %v775_v12 = vsel %vm756_vm0, %v1478_v11, 0.0  ;;  %v1482_v13 = vadd.f32 %v1193_v9, %v688_v10 }
 0x126   : > { %776 = vadd.xlane.f32.xlu1 %v775_v12 }
 0x127   : > { %v778_v14 = vsel %vm756_vm0, %v1482_v13, 0.0 }
 0x128   : > { %779 = vadd.xlane.f32.xlu0 %v778_v14 }
 0x137   : > { %907 = vperm.xlu1 %1204, %v869_v16  }
 0x13b   : > { %933 = vperm.xlu1 %1204, %v919_v17  }
 0x13e   : > { %902 = vperm.xlu0 %1203, %v868_v18  }
 0x13f   : > { %943 = vperm.xlu1 %1204, %v921_v20  }
 0x142   : > { %928 = vperm.xlu0 %1203, %v918_v21  }
 0x143   : > { %953 = vperm.xlu1 %1204, %v923_v22  }
 0x146   : > { %938 = vperm.xlu0 %1203, %v920_v23  }
 0x14a   : > { %948 = vperm.xlu0 %1203, %v922_v24  }
 0x19b   : > { %v759_v31 = vpop.xlane.xlu0 %758 }
 0x19c   : > { %v782_v32 = vmul.f32 0.0625, %v759_v31 }
 0x19d   : > { %v762_v33 = vpop.xlane.xlu1 %761 }
 0x19e   : > { %v1523_v34 = vsub.f32 %v1454_v15, %v782_v32  ;;  %v783_v36 = vmul.f32 0.0625, %v762_v33 }
 0x1a0   : > { %v1526_v37 = vsub.f32 %v1458_v19, %v783_v36  ;;  %v798_v38 = vmul.f32 %v1523_v34, %v1523_v34 }
 0x1a2   : > { %v806_v40 = vsel %vm756_vm0, %v798_v38, 0.0  ;;  %v799_v41 = vmul.f32 %v1526_v37, %v1526_v37 }
 0x1a3   : > { %807 = vadd.xlane.f32.xlu1 %v806_v40  ;;  %v765_v42 = vpop.xlane.xlu0 %764 }
 0x1a4   : > { %v784_v43 = vmul.f32 0.0625, %v765_v42  ;;  %v809_v44 = vsel %vm756_vm0, %v799_v41, 0.0 }
 0x1a5   : > { %810 = vadd.xlane.f32.xlu0 %v809_v44 }
 0x1a6   : > { %v1535_v15 = vsub.f32 %v1462_v35, %v784_v43 }
 0x1a7   : > { %v768_v45 = vpop.xlane.xlu0 %767 }
 0x1a8   : > { %v785_v19 = vmul.f32 0.0625, %v768_v45  ;;  %v800_v46 = vmul.f32 %v1535_v15, %v1535_v15 }
 0x1aa   : > { %v1540_v47 = vsub.f32 %v1466_v39, %v785_v19  ;;  %v812_v48 = vsel %vm756_vm0, %v800_v46, 0.0 }
 0x1ab   : > { %v771_v49 = vpop.xlane.xlu1 %770  ;;  %813 = vadd.xlane.f32.xlu1 %v812_v48 }
 0x1ac   : > { %v786_v50 = vmul.f32 0.0625, %v771_v49  ;;  %v801_v51 = vmul.f32 %v1540_v47, %v1540_v47 }
 0x1ad   : > { %v774_v52 = vpop.xlane.xlu0 %773 }
 0x1ae   : > { %v1546_v35 = vsub.f32 %v1470_v55, %v786_v50  ;;  %v787_v53 = vmul.f32 0.0625, %v774_v52  ;;  %v815_v54 = vsel %vm756_vm0, %v801_v51, 0.0 }
 0x1af   : > { %816 = vadd.xlane.f32.xlu0 %v815_v54 }
 0x1b0   : > { %v1550_v56 = vsub.f32 %v1474_v59, %v787_v53  ;;  %v802_v39 = vmul.f32 %v1546_v35, %v1546_v35 }
 0x1b2   : > { %v818_v57 = vsel %vm756_vm0, %v802_v39, 0.0  ;;  %v803_v58 = vmul.f32 %v1550_v56, %v1550_v56 }
 0x1b3   : > { %v777_v60 = vpop.xlane.xlu1 %776  ;;  %819 = vadd.xlane.f32.xlu1 %v818_v57 }
 0x1b4   : > { %v788_v61 = vmul.f32 0.0625, %v777_v60  ;;  %v821_v55 = vsel %vm756_vm0, %v803_v58, 0.0 }
 0x1b5   : > { %822 = vadd.xlane.f32.xlu0 %v821_v55  ;;  %v780_v62 = vpop.xlane.xlu0 %779 }
 0x1b6   : > { %v1559_v63 = vsub.f32 %v1478_v11, %v788_v61  ;;  %v789_v59 = vmul.f32 0.0625, %v780_v62 }
 0x1b7   : > { %v1576_v7 = vpop.permute.xlu1 %907 }
 0x1b8   : > { %v1562_v0 = vsub.f32 %v1482_v13, %v789_v59  ;;  %v804_v1 = vmul.f32 %v1559_v63, %v1559_v63 }
 0x1ba   : > { %v824_v2 = vsel %vm756_vm0, %v804_v1, 0.0  ;;  %v805_v3 = vmul.f32 %v1562_v0, %v1562_v0 }
 0x1bb   : > { %825 = vadd.xlane.f32.xlu1 %v824_v2  ;;  %v934_v9 = vpop.permute.xlu1 %933 }
 0x1bc   : > { %v827_v4 = vsel %vm756_vm0, %v805_v3, 0.0 }
 0x1bd   : > { %828 = vadd.xlane.f32.xlu0 %v827_v4  ;;  %v1578_v8 = vpop.permute.xlu0 %902 }
 0x1bf   : > { %v944_v11 = vpop.permute.xlu1 %943 }
 0x1c1   : > { %v929_v10 = vpop.permute.xlu0 %928 }
 0x1c3   : > { %v1580_v13 = vpop.permute.xlu1 %953 }
 0x1c5   : > { %v939_v12 = vpop.permute.xlu0 %938 }
 0x1c9   : > { %v1582_v14 = vpop.permute.xlu0 %948 }
 0x1cc   : > { %963 = vperm.xlu1 %1204, %v925_v5  }
 0x1d3   : > { %958 = vperm.xlu0 %1203, %v924_v6  }
 0x230   : > { %v808_v16 = vpop.xlane.xlu1 %807 }
 0x231   : > { %v830_v17 = vmul.f32 0.0625, %v808_v16 }
 0x232   : > { %v811_v18 = vpop.xlane.xlu0 %810 }
 0x233   : > { %v838_v20 = vadd.f32 1e-05, %v830_v17  ;;  %v831_v21 = vmul.f32 0.0625, %v811_v18 }
 0x235   : > { %1261 = vrsqrt.f32 %v838_v20  ;;  %v839_v22 = vadd.f32 1e-05, %v831_v21 }
 0x237   : > { %1263 = vrsqrt.f32 %v839_v22 }
 0x238   : > { %v814_v23 = vpop.xlane.xlu1 %813 }
 0x239   : > { %v832_v24 = vmul.f32 0.0625, %v814_v23 }
 0x23b   : > { %v840_v31 = vadd.f32 1e-05, %v832_v24 }
 0x23c   : > { %v817_v32 = vpop.xlane.xlu0 %816 }
 0x23d   : > { %1265 = vrsqrt.f32 %v840_v31  ;;  %v833_v33 = vmul.f32 0.0625, %v817_v32 }
 0x23f   : > { %v1262_v36 = vpop.eup %1261  ;;  %v841_v38 = vadd.f32 1e-05, %v833_v33 }
 0x240   : > { %v854_v40 = vmul.f32 %v1262_v36, %v1523_v34  ;;  %v820_v41 = vpop.xlane.xlu1 %819 }
 0x241   : > { %v1264_v42 = vpop.eup %1263  ;;  %1267 = vrsqrt.f32 %v841_v38  ;;  %v834_v43 = vmul.f32 0.0625, %v820_v41 }
 0x242   : > { %v910_v44 = vmul.f32 %v1510_v25, %v854_v40  ;;  %v855_v45 = vmul.f32 %v1264_v42, %v1526_v37  ;;  %v823_v19 = vpop.xlane.xlu0 %822 }
 0x243   : > { %v842_v46 = vadd.f32 1e-05, %v834_v43  ;;  %v835_v48 = vmul.f32 0.0625, %v823_v19 }
 0x244   : > { %v966_v49 = vadd.f32 %v929_v10, %v910_v44  ;;  %v911_v50 = vmul.f32 %v1514_v27, %v855_v45 }
 0x245   : > { %1269 = vrsqrt.f32 %v842_v46  ;;  %v843_v51 = vadd.f32 1e-05, %v835_v48 }
 0x246   : > { %v974_v52 = vmul.f32 0.2, %v966_v49  ;;  %v967_v53 = vadd.f32 %v934_v9, %v911_v50 }
 0x247   : > { %v1266_v34 = vpop.eup %1265  ;;  %1271 = vrsqrt.f32 %v843_v51 }
 0x248   : > { %v982_v25 = vmax.f32 %v966_v49, %v974_v52  ;;  %v975_v37 = vmul.f32 0.2, %v967_v53  ;;  %v856_v54 = vmul.f32 %v1266_v34, %v1535_v15  ;;  %v826_v39 = vpop.xlane.xlu1 %825 }
 0x249   : > { %v836_v57 = vmul.f32 0.0625, %v826_v39 }
 0x24a   : > { %990 = vst.msk [vmem:[%s1592_s13] sm:$0xff] %vm756_vm0, %v982_v25  ;;  %v983_v27 = vmax.f32 %v967_v53, %v975_v37  ;;  %v912_v58 = vmul.f32 %v1512_v26, %v856_v54  ;;  %v829_v60 = vpop.xlane.xlu0 %828 }
 0x24b   : > { %v1268_v61 = vpop.eup %1267  ;;  %v844_v55 = vadd.f32 1e-05, %v836_v57  ;;  %v837_v62 = vmul.f32 0.0625, %v829_v60 }
 0x24c   : > { %991 = vst.msk [vmem:[%s1592_s13 + $0x8] sm:$0xff] %vm756_vm0, %v983_v27  ;;  %v968_v59 = vadd.f32 %v939_v12, %v912_v58  ;;  %v857_v1 = vmul.f32 %v1268_v61, %v1540_v47  ;;  %v964_v31 = vpop.permute.xlu1 %963 }
 0x24d   : > { %1273 = vrsqrt.f32 %v844_v55  ;;  %v845_v2 = vadd.f32 1e-05, %v837_v62 }
 0x24e   : > { %v976_v15 = vmul.f32 0.2, %v968_v59  ;;  %v913_v3 = vmul.f32 %v1516_v28, %v857_v1 }
 0x24f   : > { %v1270_v4 = vpop.eup %1269  ;;  %1275 = vrsqrt.f32 %v845_v2 }
 0x250   : > { %v984_v5 = vmax.f32 %v968_v59, %v976_v15  ;;  %v969_v26 = vadd.f32 %v944_v11, %v913_v3  ;;  %v858_v6 = vmul.f32 %v1270_v4, %v1546_v35 }
 0x251   : > { %v1272_v9 = vpop.eup %1271 }
 0x252   : > { %992 = vst.msk [vmem:[%s1592_s13 + $0x10] sm:$0xff] %vm756_vm0, %v984_v5  ;;  %v977_v10 = vmul.f32 0.2, %v969_v26  ;;  %v914_v12 = vmul.f32 %v1518_v29, %v858_v6  ;;  %v859_v47 = vmul.f32 %v1272_v9, %v1550_v56  ;;  %v959_v23 = vpop.permute.xlu0 %958 }
 0x254   : > { %v985_v16 = vmax.f32 %v969_v26, %v977_v10  ;;  %v970_v17 = vadd.f32 %v1582_v14, %v914_v12  ;;  %v915_v28 = vmul.f32 %v1520_v30, %v859_v47 }
 0x256   : > { %993 = vst.msk [vmem:[%s1592_s13 + $0x18] sm:$0xff] %vm756_vm0, %v985_v16  ;;  %v978_v11 = vmul.f32 0.2, %v970_v17  ;;  %v971_v35 = vadd.f32 %v1580_v13, %v915_v28 }
 0x257   : > { %v1274_v18 = vpop.eup %1273 }
 0x258   : > { %v986_v20 = vmax.f32 %v970_v17, %v978_v11  ;;  %v979_v21 = vmul.f32 0.2, %v971_v35  ;;  %v860_v22 = vmul.f32 %v1274_v18, %v1559_v63 }
 0x259   : > { %v1276_v29 = vpop.eup %1275 }
 0x25a   : > { %994 = vst.msk [vmem:[%s1592_s13 + $0x20] sm:$0xff] %vm756_vm0, %v986_v20  ;;  %v987_v56 = vmax.f32 %v971_v35, %v979_v21  ;;  %v861_v14 = vmul.f32 %v1276_v29, %v1562_v0  ;;  %v916_v30 = vmul.f32 %v1578_v8, %v860_v22 }
 0x25c   : > { %995 = vst.msk [vmem:[%s1592_s13 + $0x28] sm:$0xff] %vm756_vm0, %v987_v56  ;;  %v917_v13 = vmul.f32 %v1576_v7, %v861_v14  ;;  %v972_v24 = vadd.f32 %v959_v23, %v916_v30 }
 0x25e   : > { %v973_v32 = vadd.f32 %v964_v31, %v917_v13  ;;  %v980_v33 = vmul.f32 0.2, %v972_v24 }
 0x260   : > { %v981_v63 = vmul.f32 0.2, %v973_v32  ;;  %v988_v36 = vmax.f32 %v972_v24, %v980_v33 }
 0x262   : > { %v989_v38 = vmax.f32 %v973_v32, %v981_v63  ;;  %996 = vst.msk [vmem:[%s1592_s13 + $0x30] sm:$0xff] %vm756_vm0, %v988_v36 }
 0x264   : > { %997 = vst.msk [vmem:[%s1592_s13 + $0x38] sm:$0xff] %vm756_vm0, %v989_v38 }
 0x265 PF: > { %s15_s18 = sadd.s32 1, %s1283_s18  }
 0x266   : > { %p12_p4 = scmp.ge.s32.totalorder %s15_s18, 4  }
 0x268   :  { %14 = sbr.rel (!%p12_p4) target bundleno = 1 (0x1), region = 70 }

// kernel: _lambda_.11
= control target key start
LH: loop header
LB: loop body
LE: loop exit
PB: predicated region body
PF: predicated region fallthrough
CT: control target
= control target key end

     0   :  { %s1296_s20 = smov 0   ;;  %s1404_s0 = inlined_call_operand.vmem [shape: bf16[2,1024,1], index: 0, kind: input, shape index: {}]   ;;  %s1405_s1 = inlined_call_operand.vmem [shape: bf16[1,1024], index: 1, kind: input, shape index: {}]   ;;  %s1406_s2 = inlined_call_operand.<no memory space> [shape: f32[1,1], index: 2, kind: input, shape index: {}]   ;;  %s1407_s5 = inlined_call_operand.vmem [shape: f32[2,1,1], index: 5, kind: output, shape index: {}]   ;;  %s1408_s3 = inlined_call_operand.<no memory space> [shape: f32[1,1], index: 3, kind: input, shape index: {}]   ;;  %s1409_s4 = inlined_call_operand.<no memory space> [shape: f32[1,1], index: 4, kind: input, shape index: {}]  }
   0x1   :  { %v10_v0 = vstv %s1406_s2 }
   0x2   :  { %11 = vst [vmem:[#allocation2] sm:$0x1] %v10_v0 }
   0x3 LB: > { %s1014_s21 = sadd.s32 4294967295, %s1260_s20   ;;  %p1018_p0 = scmp.ge.s32.totalorder %s1260_s20, 1  ;;  %s1260_s20 = sphi %s1296_s20, %s21_s20  }
   0x4   : > { %p193_p1 = scmp.lt.s32.totalorder %s1260_s20, 3 }
   0x6   : > { %p194_p2 = pnand %p1018_p0, %p193_p1 }
   0x7   : > { %p219_p3 = scmp.lt.s32.totalorder (!%p194_p2), %s1014_s21, 1  ;;  %v363_v1 = vlaneseq (!%p194_p2)  ;;  %v1262_v2 = vmov (!%p194_p2), 1966171168   ;;  %v356_v6 = vld [vmem:[%s1405_s1] sm:$0xff] (!%p194_p2)  ;;  %vm965_vm0 = vcmask (!%p194_p2), 0  }
   0x8   : > { %197 = sbr.rel (%p194_p2) target bundleno = 332 (0x14c), region = 40  ;;  %v361_v3 = vunpack.c.l.s4 (!%p194_p2), %v1262_v2  ;;  %v359_v31 = vcombine.high (!%p194_p2), %v356_v6, %v356_v6 }
   0x9   : > { %v364_v4 = vshrl.u32 (!%p194_p2), %v363_v1, 7 }
   0xa   : > { %v362_v5 = vunpack.c.0.s8 (!%p194_p2), %v361_v3 }
   0xc   : > { %v1315_v7 = vsub.s32 (!%p194_p2), %v362_v5, %v364_v4 }
   0xe   : > { %v1320_v10 = vrot.slane (!%p194_p2), %v356_v6, %v1315_v7  ;;  %v1347_v36 = vrot.slane (!%p194_p2), %v359_v31, %v1315_v7 }
   0xf   : > { %s1411_s21 = smov (!%p219_p3, %s1014_s21), 1 }
  0x10   : > { %s1087_s2 = sshll.u32 %s1411_s21, 9  ;;  %v374_v13 = vcombine.high %v1320_v10, %v1320_v10  ;;  %v375_v41 = vcombine.high %v1347_v36, %v1347_v36  ;;  %v382_v44 = vrot.slane %v1320_v10, %v1315_v7  ;;  %s226_s27 = scalar_lea.vmem %s1407_s5, %s1411_s21 }
  0x11   : > { %s1313_s24 = scalar_lea.vmem %s1404_s0, %s1087_s2 }
  0x12   : > { %v1185_v8 = vld [vmem:[%s1313_s24 + $0x40] sm:$0xff]   ;;  %v1189_v14 = vld [vmem:[%s1313_s24 + $0x48] sm:$0xff]   ;;  %v396_v16 = vrot.slane %v374_v13, %v1315_v7  ;;  %v1193_v20 = vld [vmem:[%s1313_s24 + $0x50] sm:$0xff]   ;;  %v403_v47 = vrot.slane %v375_v41, %v1315_v7  ;;  %v404_v49 = vcombine.high %v382_v44, %v382_v44 }
  0x13   : > { %v1186_v9 = vld [vmem:[%s1313_s24 + $0xc0] sm:$0xff]   ;;  %1088 = vmatprep.subr.bf16.mxu0 %v1185_v8  ;;  %v1190_v15 = vld [vmem:[%s1313_s24 + $0xc8] sm:$0xff]   ;;  %v1194_v21 = vld [vmem:[%s1313_s24 + $0xd0] sm:$0xff]  }
  0x14   : > { %v1187_v11 = vld [vmem:[%s1313_s24] sm:$0xff]   ;;  %1110 = vmatprep.subr.bf16.mxu1 %v1186_v9  ;;  %v1191_v17 = vld [vmem:[%s1313_s24 + $0x8] sm:$0xff]   ;;  %832 = vmatprep.mubr.bf16.mxu0 %v396_v16  ;;  %v406_v19 = vcombine.high %v396_v16, %v396_v16  ;;  %v1195_v22 = vld [vmem:[%s1313_s24 + $0x10] sm:$0xff]   ;;  %v407_v53 = vcombine.high %v403_v47, %v403_v47 }
  0x15   : > { %v1188_v12 = vld [vmem:[%s1313_s24 + $0x80] sm:$0xff]   ;;  %1089 = vmatpush3.bf16.msra.mxu0 %v1187_v11  ;;  %v1192_v18 = vld [vmem:[%s1313_s24 + $0x88] sm:$0xff]   ;;  %v1196_v23 = vld [vmem:[%s1313_s24 + $0x90] sm:$0xff]  }
  0x16   : > { %1111 = vmatpush3.bf16.msra.mxu1 %v1188_v12  ;;  %1090 = vmatprep.subr.bf16.mxu0 %v1189_v14  ;;  %v1197_v24 = vld [vmem:[%s1313_s24 + $0x58] sm:$0xff]   ;;  %v1201_v28 = vld [vmem:[%s1313_s24 + $0x60] sm:$0xff]   ;;  %v1205_v33 = vld [vmem:[%s1313_s24 + $0x68] sm:$0xff]  }
  0x17   : > { %1112 = vmatprep.subr.bf16.mxu1 %v1190_v15  ;;  %872 = vmatprep.mubr.bf16.mxu1 %v406_v19  ;;  %v1198_v25 = vld [vmem:[%s1313_s24 + $0xd8] sm:$0xff]   ;;  %v1202_v29 = vld [vmem:[%s1313_s24 + $0xe0] sm:$0xff]   ;;  %v1206_v34 = vld [vmem:[%s1313_s24 + $0xe8] sm:$0xff]  }
  0x18   : > { %v1199_v26 = vld [vmem:[%s1313_s24 + $0x18] sm:$0xff]   ;;  %v1203_v30 = vld [vmem:[%s1313_s24 + $0x20] sm:$0xff]   ;;  %v1207_v35 = vld [vmem:[%s1313_s24 + $0x28] sm:$0xff]  }
  0x19   : > { %1091 = vmatpush3.bf16.msra.mxu0 %v1191_v17  ;;  %v1200_v27 = vld [vmem:[%s1313_s24 + $0x98] sm:$0xff]   ;;  %v1204_v32 = vld [vmem:[%s1313_s24 + $0xa0] sm:$0xff]   ;;  %v1208_v37 = vld [vmem:[%s1313_s24 + $0xa8] sm:$0xff]   ;;  %v389_v17 = vrot.slane %v1347_v36, %v1315_v7 }
  0x1a   : > { %1113 = vmatpush3.bf16.msra.mxu1 %v1192_v18  ;;  %1092 = vmatprep.subr.bf16.mxu0 %v1193_v20  ;;  %v1209_v38 = vld [vmem:[%s1313_s24 + $0x70] sm:$0xff]   ;;  %v1213_v43 = vld [vmem:[%s1313_s24 + $0x78] sm:$0xff]   ;;  %v1218_v50 = vld [vmem:[%s1313_s24 + $0x140] sm:$0xff]  }
  0x1b   : > { %1114 = vmatprep.subr.bf16.mxu1 %v1194_v21  ;;  %v1210_v39 = vld [vmem:[%s1313_s24 + $0xf0] sm:$0xff]   ;;  %v1214_v45 = vld [vmem:[%s1313_s24 + $0xf8] sm:$0xff]   ;;  %v1219_v51 = vld [vmem:[%s1313_s24 + $0x1c0] sm:$0xff]   ;;  %v405_v21 = vcombine.high %v389_v17, %v389_v17 }
  0x1c   : > { %v1211_v40 = vld [vmem:[%s1313_s24 + $0x30] sm:$0xff]   ;;  %v1215_v46 = vld [vmem:[%s1313_s24 + $0x38] sm:$0xff]   ;;  %v1220_v52 = vld [vmem:[%s1313_s24 + $0x100] sm:$0xff]  }
  0x1d   : > { %1093 = vmatpush3.bf16.msra.mxu0 %v1195_v22  ;;  %v1212_v42 = vld [vmem:[%s1313_s24 + $0xb0] sm:$0xff]   ;;  %v1216_v48 = vld [vmem:[%s1313_s24 + $0xb8] sm:$0xff]   ;;  %v1221_v54 = vld [vmem:[%s1313_s24 + $0x180] sm:$0xff]  }
  0x1e   : > { %1115 = vmatpush3.bf16.msra.mxu1 %v1196_v23  ;;  %1094 = vmatprep.subr.bf16.mxu0 %v1197_v24  ;;  %v1222_v55 = vld [vmem:[%s1313_s24 + $0x148] sm:$0xff]   ;;  %v1226_v59 = vld [vmem:[%s1313_s24 + $0x150] sm:$0xff]   ;;  %v1230_v63 = vld [vmem:[%s1313_s24 + $0x158] sm:$0xff]  }
  0x1f   : > { %1116 = vmatprep.subr.bf16.mxu1 %v1198_v25  ;;  %v1223_v56 = vld [vmem:[%s1313_s24 + $0x1c8] sm:$0xff]   ;;  %v1227_v60 = vld [vmem:[%s1313_s24 + $0x1d0] sm:$0xff]   ;;  %v1231_v0 = vld [vmem:[%s1313_s24 + $0x1d8] sm:$0xff]  }
  0x20   : > { %v1224_v57 = vld [vmem:[%s1313_s24 + $0x108] sm:$0xff]   ;;  %v1228_v61 = vld [vmem:[%s1313_s24 + $0x110] sm:$0xff]   ;;  %v1232_v1 = vld [vmem:[%s1313_s24 + $0x118] sm:$0xff]  }
  0x21   : > { %1095 = vmatpush3.bf16.msra.mxu0 %v1199_v26  ;;  %v1225_v58 = vld [vmem:[%s1313_s24 + $0x188] sm:$0xff]   ;;  %v1229_v62 = vld [vmem:[%s1313_s24 + $0x190] sm:$0xff]   ;;  %v1233_v2 = vld [vmem:[%s1313_s24 + $0x198] sm:$0xff]  }
  0x22   : > { %1117 = vmatpush3.bf16.msra.mxu1 %v1200_v27  ;;  %1096 = vmatprep.subr.bf16.mxu0 %v1201_v28  ;;  %v1234_v3 = vld [vmem:[%s1313_s24 + $0x160] sm:$0xff]   ;;  %v1238_v8 = vld [vmem:[%s1313_s24 + $0x168] sm:$0xff]   ;;  %v1242_v12 = vld [vmem:[%s1313_s24 + $0x170] sm:$0xff]  }
  0x23   : > { %1118 = vmatprep.subr.bf16.mxu1 %v1202_v29  ;;  %v1235_v4 = vld [vmem:[%s1313_s24 + $0x1e0] sm:$0xff]   ;;  %v1239_v9 = vld [vmem:[%s1313_s24 + $0x1e8] sm:$0xff]   ;;  %v1243_v13 = vld [vmem:[%s1313_s24 + $0x1f0] sm:$0xff]  }
  0x24   : > { %v1236_v5 = vld [vmem:[%s1313_s24 + $0x120] sm:$0xff]   ;;  %v1240_v10 = vld [vmem:[%s1313_s24 + $0x128] sm:$0xff]   ;;  %v1244_v14 = vld [vmem:[%s1313_s24 + $0x130] sm:$0xff]  }
  0x25   : > { %1097 = vmatpush3.bf16.msra.mxu0 %v1203_v30  ;;  %v1237_v6 = vld [vmem:[%s1313_s24 + $0x1a0] sm:$0xff]   ;;  %v1241_v11 = vld [vmem:[%s1313_s24 + $0x1a8] sm:$0xff]   ;;  %v1245_v15 = vld [vmem:[%s1313_s24 + $0x1b0] sm:$0xff]  }
  0x26   : > { %1119 = vmatpush3.bf16.msra.mxu1 %v1204_v32  ;;  %1098 = vmatprep.subr.bf16.mxu0 %v1205_v33  ;;  %v1246_v16 = vld [vmem:[%s1313_s24 + $0x178] sm:$0xff]   ;;  %v357_v24 = vld [vmem:[#allocation2] sm:$0x1] }
  0x27   : > { %1120 = vmatprep.subr.bf16.mxu1 %v1206_v34  ;;  %v1247_v18 = vld [vmem:[%s1313_s24 + $0x1f8] sm:$0xff]  }
  0x28   : > { %v1248_v19 = vld [vmem:[%s1313_s24 + $0x138] sm:$0xff]  }
  0x29   : > { %1099 = vmatpush3.bf16.msra.mxu0 %v1207_v35  ;;  %v1249_v20 = vld [vmem:[%s1313_s24 + $0x1b8] sm:$0xff]  }
  0x2a   : > { %1121 = vmatpush3.bf16.msra.mxu1 %v1208_v37  ;;  %1100 = vmatprep.subr.bf16.mxu0 %v1209_v38 }
  0x2b   : > { %1122 = vmatprep.subr.bf16.mxu1 %v1210_v39 }
  0x2d   : > { %1101 = vmatpush3.bf16.msra.mxu0 %v1211_v40 }
  0x2e   : > { %1123 = vmatpush3.bf16.msra.mxu1 %v1212_v42  ;;  %1102 = vmatprep.subr.bf16.mxu0 %v1213_v43 }
  0x2f   : > { %1124 = vmatprep.subr.bf16.mxu1 %v1214_v45 }
  0x31   : > { %1103 = vmatpush3.bf16.msra.mxu0 %v1215_v46 }
  0x32   : > { %1125 = vmatpush3.bf16.msra.mxu1 %v1216_v48  ;;  %1132 = vmatprep.subr.bf16.mxu0 %v1218_v50 }
  0x33   : > { %1154 = vmatprep.subr.bf16.mxu1 %v1219_v51 }
  0x34   : > { %833 = vmatmul.mubr.bf16.vlgmr.msra.gmra.mrb[0].mxu0 %v382_v44 }
  0x35   : > { %873 = vmatmul.mubr.bf16.vlgmr.msra.gmra.mrb[0].mxu1 %v404_v49  ;;  %1133 = vmatpush3.bf16.msra.mxu0 %v1220_v52 }
  0x36   : > { %1155 = vmatpush3.bf16.msra.mxu1 %v1221_v54  ;;  %912 = vmatprep.mubr.bf16.mxu0 %v403_v47 }
  0x37   : > { %1134 = vmatprep.subr.bf16.mxu0 %v1222_v55  ;;  %952 = vmatprep.mubr.bf16.mxu1 %v407_v53 }
  0x38   : > { %1156 = vmatprep.subr.bf16.mxu1 %v1223_v56 }
  0x39   : > { %1135 = vmatpush3.bf16.msra.mxu0 %v1224_v57 }
  0x3a   : > { %1157 = vmatpush3.bf16.msra.mxu1 %v1225_v58  ;;  %1136 = vmatprep.subr.bf16.mxu0 %v1226_v59 }
  0x3b   : > { %1158 = vmatprep.subr.bf16.mxu1 %v1227_v60 }
  0x3d   : > { %1137 = vmatpush3.bf16.msra.mxu0 %v1228_v61 }
  0x3e   : > { %1159 = vmatpush3.bf16.msra.mxu1 %v1229_v62  ;;  %1138 = vmatprep.subr.bf16.mxu0 %v1230_v63 }
  0x3f   : > { %1160 = vmatprep.subr.bf16.mxu1 %v1231_v0 }
  0x41   : > { %1139 = vmatpush3.bf16.msra.mxu0 %v1232_v1 }
  0x42   : > { %1161 = vmatpush3.bf16.msra.mxu1 %v1233_v2  ;;  %1140 = vmatprep.subr.bf16.mxu0 %v1234_v3 }
  0x43   : > { %1162 = vmatprep.subr.bf16.mxu1 %v1235_v4 }
  0x45   : > { %1141 = vmatpush3.bf16.msra.mxu0 %v1236_v5 }
  0x46   : > { %1163 = vmatpush3.bf16.msra.mxu1 %v1237_v6  ;;  %1142 = vmatprep.subr.bf16.mxu0 %v1238_v8 }
  0x47   : > { %1164 = vmatprep.subr.bf16.mxu1 %v1239_v9 }
  0x49   : > { %1143 = vmatpush3.bf16.msra.mxu0 %v1240_v10 }
  0x4a   : > { %1165 = vmatpush3.bf16.msra.mxu1 %v1241_v11  ;;  %1144 = vmatprep.subr.bf16.mxu0 %v1242_v12 }
  0x4b   : > { %1166 = vmatprep.subr.bf16.mxu1 %v1243_v13 }
  0x4d   : > { %1145 = vmatpush3.bf16.msra.mxu0 %v1244_v14 }
  0x4e   : > { %1167 = vmatpush3.bf16.msra.mxu1 %v1245_v15  ;;  %1146 = vmatprep.subr.bf16.mxu0 %v1246_v16 }
  0x4f   : > { %1168 = vmatprep.subr.bf16.mxu1 %v1247_v18 }
  0x51   : > { %1147 = vmatpush3.bf16.msra.mxu0 %v1248_v19 }
  0x52   : > { %1169 = vmatpush3.bf16.msra.mxu1 %v1249_v20 }
  0x54   : > { %913 = vmatmul.mubr.bf16.vlgmr.msra.gmra.mrb[4].mxu0 %v389_v17 }
  0x55   : > { %953 = vmatmul.mubr.bf16.vlgmr.msra.gmra.mrb[4].mxu1 %v405_v21 }
 0x107   : > { %v1104_v22 = vpop.f32.mrb[0].mxu0 }
 0x108   : > { %v1126_v23 = vpop.f32.mrb[0].mxu1  ;;  %v1105_v25 = vpop.f32.mrb[1].mxu0 }
 0x109   : > { %v1106_v26 = vadd.f32 %v1105_v25, %v1104_v22  ;;  %v1127_v27 = vpop.f32.mrb[1].mxu1  ;;  %v1107_v28 = vpop.f32.mrb[2].mxu0 }
 0x10a   : > { %v1128_v29 = vadd.f32 %v1127_v27, %v1126_v23  ;;  %v1129_v7 = vpop.f32.mrb[2].mxu1  ;;  %v1108_v30 = vpop.f32.mrb[3].mxu0 }
 0x10b   : > { %v835_v31 = vadd.f32 %v1106_v26, %v357_v24  ;;  %v1130_v32 = vpop.f32.mrb[3].mxu1 }
 0x10d   : > { %v875_v33 = vadd.f32 %v1128_v29, %v835_v31 }
 0x127   : > { %v1148_v34 = vpop.f32.mrb[4].mxu0 }
 0x128   : > { %v1170_v35 = vpop.f32.mrb[4].mxu1  ;;  %v1149_v36 = vpop.f32.mrb[5].mxu0 }
 0x129   : > { %v1150_v37 = vadd.f32 %v1149_v36, %v1148_v34  ;;  %v1171_v38 = vpop.f32.mrb[5].mxu1  ;;  %v1151_v39 = vpop.f32.mrb[6].mxu0 }
 0x12a   : > { %v1172_v40 = vadd.f32 %v1171_v38, %v1170_v35  ;;  %v1173_v41 = vpop.f32.mrb[6].mxu1  ;;  %v1152_v42 = vpop.f32.mrb[7].mxu0 }
 0x12b   : > { %v915_v43 = vadd.f32 %v1150_v37, %v875_v33  ;;  %v1174_v44 = vpop.f32.mrb[7].mxu1 }
 0x12d   : > { %v955_v45 = vadd.f32 %v1172_v40, %v915_v43 }
 0x12f   : > { %v960_v46 = vsub.f32 0.0, %v955_v45 }
 0x131   : > { %v961_v47 = vmul.f32 1.442695, %v960_v46 }
 0x133   : > { %1250 = vpow2.f32 %v961_v47 }
 0x13d   : > { %v1251_v48 = vpop.eup %1250 }
 0x13e   : > { %v963_v49 = vadd.f32 1.0, %v1251_v48 }
 0x140   : > { %1252 = vrcp.f32 %v963_v49 }
 0x14a   : > { %v1253_v50 = vpop.eup %1252 }
 0x14b   : > { %966 = vst.msk [vmem:[%s226_s27] sm:$0x1] %vm965_vm0, %v1253_v50 }
 0x14c PF: > { %s21_s20 = sadd.s32 1, %s1260_s20  }
 0x14d   : > { %p18_p4 = scmp.ge.s32.totalorder %s21_s20, 4  }
 0x14f   :  { %20 = sbr.rel (!%p18_p4) target bundleno = 3 (0x3), region = 70 }

</bundles_post_ra>
